<compile_context>
chip_gen: v6e
topology: v6e:2x2x1
jax: 0.10.0
libtpu: 0.0.40
codegen_flags: <defaults>
</compile_context>

<pallas_src>
import functools

import numpy as np

import jax
import jax.numpy as jnp
from jax.experimental import pallas as pl
from jax.experimental.pallas import tpu as pltpu


_FEAT = 16 * 4 * 4      # 256 features per tower (NCHW flatten of 16x4x4)
_HID = 64
_OUT = 8


# ----------------------------------------------------------------------------
# Fused kernel: conv1..conv4 + flatten + fc1 + fc2, all VMEM resident.
# ----------------------------------------------------------------------------
def _rpl_fused_kernel(x_ref, w1_ref, b1_ref, w2_ref, b2_ref, w3_ref, b3_ref,
                      w4_ref, b4_ref, w1c_ref, w1o_ref, fb1_ref, fc2w_ref,
                      fb2_ref, out_ref, a1_ref, a2_ref, a3_ref, a4_ref, *,
                      n_pairs):
    B = 2 * n_pairs
    f32 = jnp.float32

    def dot(a, b):
        return jnp.dot(a, b, preferred_element_type=f32)

    def conv_stride1(in_ref, o_ref, w_ref, b_ref, h):
        # Activation rows are (h * B + b); a kh tap is a row shift by (kh - 1),
        # W-direction taps + padding are folded into the banded weight.
        hb = h * B
        o_ref[...] = dot(in_ref[...], w_ref[1]) + b_ref[...]          # kh = 1
        o_ref[B:hb, :] += dot(in_ref[0:hb - B, :], w_ref[0])          # kh = 0
        o_ref[0:hb - B, :] += dot(in_ref[B:hb, :], w_ref[2])          # kh = 2
        o_ref[...] = jnp.maximum(o_ref[...], 0.0)

    def conv_stride2(in_ref, o_ref, w_ref, b_ref, h_in, h_out, n_lanes):
        for ho in range(h_out):
            acc = jnp.zeros((B, n_lanes), f32) + b_ref[...]
            for kh in range(3):
                hi = 2 * ho + kh - 1
                if 0 <= hi < h_in:                                    # pad rows skipped
                    acc = acc + dot(in_ref[hi * B:(hi + 1) * B, :], w_ref[kh])
            o_ref[ho * B:(ho + 1) * B, :] = jnp.maximum(acc, 0.0)

    # Encoder (center + offset towers batched along the row axis).
    conv_stride1(x_ref, a1_ref, w1_ref, b1_ref, h=16)                 # (16B, 128)
    conv_stride2(a1_ref, a2_ref, w2_ref, b2_ref, 16, 8, 64)           # ( 8B,  64)
    conv_stride1(a2_ref, a3_ref, w3_ref, b3_ref, h=8)                 # ( 8B, 128)
    conv_stride2(a3_ref, a4_ref, w4_ref, b4_ref, 8, 4, 64)            # ( 4B,  64)

    # Head.  The NCHW flatten + concat(center, offset) is absorbed into the
    # pre-permuted fc1 weight blocks w1c/w1o (one 64x64 block per output row).
    hid = jnp.zeros((n_pairs, _HID), f32) + fb1_ref[...]
    for ho in range(4):
        base = ho * B
        hid = hid + dot(a4_ref[base:base + n_pairs, :], w1c_ref[ho])          # center
        hid = hid + dot(a4_ref[base + n_pairs:base + B, :], w1o_ref[ho])      # offset
    hid = jnp.maximum(hid, 0.0)
    out_ref[...] = dot(hid, fc2w_ref[...]) + fb2_ref[...]


def _full_spec(shape):
    nd = len(shape)

    def index_map(i):
        return (0,) * nd

    return pl.BlockSpec(tuple(shape), index_map)


def rpl_pallas_forward(x_rows, packed, n_pairs):
    B = 2 * n_pairs
    ins = [x_rows,
           packed["w1"], packed["b1"], packed["w2"], packed["b2"],
           packed["w3"], packed["b3"], packed["w4"], packed["b4"],
           packed["w1c"], packed["w1o"], packed["fb1"],
           packed["fc2w"], packed["fb2"]]
    kernel = functools.partial(_rpl_fused_kernel, n_pairs=n_pairs)
    return pl.pallas_call(
        kernel,
        out_shape=jax.ShapeDtypeStruct((n_pairs, _OUT), jnp.float32),
        grid=(1,),
        in_specs=[_full_spec(a.shape) for a in ins],
        out_specs=_full_spec((n_pairs, _OUT)),
        scratch_shapes=[
            pltpu.VMEM((16 * B, 128), jnp.float32),   # conv1 out (16x16x 8)
            pltpu.VMEM((8 * B, 64), jnp.float32),     # conv2 out ( 8x 8x 8)
            pltpu.VMEM((8 * B, 128), jnp.float32),    # conv3 out ( 8x 8x16)
            pltpu.VMEM((4 * B, 64), jnp.float32),     # conv4 out ( 4x 4x16)
        ],
        compiler_params=pltpu.CompilerParams(
            dimension_semantics=("arbitrary",)),
    )(*ins)


def relative_patch_location_forward(patches, packed):
    """patches: (2, N, 4, 16, 16) NCHW -> (N, 8) logits."""
    two, n, c, h, w = patches.shape
    assert (two, c, h, w) == (2, 4, 16, 16), patches.shape
    b = two * n
    x = patches.reshape(b, c, h, w)
    # (B, C, H, W) -> (H, B, W, C) -> (H*B, W*C): row h*B+b, column w*C+c.
    x_rows = jnp.transpose(x, (2, 0, 3, 1)).reshape(h * b, w * c)
    return rpl_pallas_forward(x_rows, packed, n)


# ----------------------------------------------------------------------------
# One-time parameter packing (host side, NOT part of the jitted forward).
# ----------------------------------------------------------------------------
def pack_params(p):
    def band(w_oihw, win, stride):
        # (Cout,Cin,3,3) -> 3 banded matrices (Win*Cin, Wo*Cout): the W taps
        # and W padding are encoded as a sparse band; H taps stay as row shifts.
        w = np.asarray(jax.device_get(w_oihw), np.float32)
        cout, cin, _, _ = w.shape
        wo_n = (win + 2 - 3) // stride + 1
        m = np.zeros((3, win * cin, wo_n * cout), np.float32)
        for kh in range(3):
            for wo in range(wo_n):
                for kw in range(3):
                    wi = wo * stride + kw - 1                       # pad = 1
                    if 0 <= wi < win:
                        m[kh, wi * cin:(wi + 1) * cin,
                          wo * cout:(wo + 1) * cout] = w[:, :, kh, kw].T
        return jnp.asarray(m)

    def brow(b_vec, wo_n):
        b = np.asarray(jax.device_get(b_vec), np.float32)
        return jnp.asarray(np.tile(b, wo_n)[None, :])

    # fc1 row permutation: kernel feature column (per conv4 output row ho) is
    # wo*16 + co; the torch NCHW-flat index is co*16 + ho*4 + wo.
    f1 = np.asarray(jax.device_get(p["fc1_w"]), np.float32)        # (512, 64)
    w1c = np.zeros((4, 64, _HID), np.float32)
    w1o = np.zeros((4, 64, _HID), np.float32)
    for ho in range(4):
        for wo in range(4):
            for co in range(16):
                i = co * 16 + ho * 4 + wo
                j = wo * 16 + co
                w1c[ho, j, :] = f1[i, :]
                w1o[ho, j, :] = f1[_FEAT + i, :]

    return {
        "w1": band(p["conv1_w"], 16, 1), "b1": brow(p["conv1_b"], 16),
        "w2": band(p["conv2_w"], 16, 2), "b2": brow(p["conv2_b"], 8),
        "w3": band(p["conv3_w"], 8, 1),  "b3": brow(p["conv3_b"], 8),
        "w4": band(p["conv4_w"], 8, 2),  "b4": brow(p["conv4_b"], 4),
        "w1c": jnp.asarray(w1c), "w1o": jnp.asarray(w1o),
        "fb1": jnp.asarray(np.asarray(jax.device_get(p["fc1_b"]), np.float32)[None, :]),
        "fc2w": p["fc2_w"].astype(jnp.float32),
        "fb2": jnp.asarray(np.asarray(jax.device_get(p["fc2_b"]), np.float32)[None, :]),
    }


# ----------------------------------------------------------------------------
# Parameter init (PyTorch layouts) and a pure-JAX reference for self-checking.
# ----------------------------------------------------------------------------
def init_params(key):
    ks = jax.random.split(key, 12)

    def conv_w(k, cout, cin, ksz=3):
        fan_in = cin * ksz * ksz
        return jax.random.normal(k, (cout, cin, ksz, ksz), jnp.float32) * ((2.0 / fan_in) ** 0.5)

    def lin_w(k, kin, kout):
        return jax.random.normal(k, (kin, kout), jnp.float32) * ((2.0 / kin) ** 0.5)

    def bias(k, n):
        return 0.2 * jax.random.normal(k, (n,), jnp.float32)

    return {
        "conv1_w": conv_w(ks[0], 8, 4),   "conv1_b": bias(ks[1], 8),
        "conv2_w": conv_w(ks[2], 8, 8),   "conv2_b": bias(ks[3], 8),
        "conv3_w": conv_w(ks[4], 16, 8),  "conv3_b": bias(ks[5], 16),
        "conv4_w": conv_w(ks[6], 16, 16), "conv4_b": bias(ks[7], 16),
        "fc1_w": lin_w(ks[8], 2 * _FEAT, _HID), "fc1_b": bias(ks[9], _HID),
        "fc2_w": lin_w(ks[10], _HID, _OUT),     "fc2_b": bias(ks[11], _OUT),
    }


def reference_forward(patches, p):
    """Pure-JAX/XLA reference mirroring the PyTorch module (NCHW end to end)."""

    def conv(x, w, b, stride):
        y = jax.lax.conv_general_dilated(
            x, w, window_strides=(stride, stride), padding=((1, 1), (1, 1)),
            dimension_numbers=("NCHW", "OIHW", "NCHW"))
        return jax.nn.relu(y + b[None, :, None, None])

    def encoder(x):
        x = conv(x, p["conv1_w"], p["conv1_b"], 1)
        x = conv(x, p["conv2_w"], p["conv2_b"], 2)
        x = conv(x, p["conv3_w"], p["conv3_b"], 1)
        x = conv(x, p["conv4_w"], p["conv4_b"], 2)
        return x

    n = patches.shape[1]
    c = encoder(patches[0]).reshape(n, -1)       # torch.flatten(start_dim=1)
    o = encoder(patches[1]).reshape(n, -1)
    h = jnp.concatenate([c, o], axis=1)
    h = jax.nn.relu(h @ p["fc1_w"] + p["fc1_b"])
    return h @ p["fc2_w"] + p["fc2_b"]


if __name__ == "__main__":
    key = jax.random.PRNGKey(0)
    k_data, k_param = jax.random.split(key)

    # (2 patches, batch=2, channels=4, 16x16 spatial), NCHW like PyTorch.
    patches = jax.random.normal(k_data, (2, 2, 4, 16, 16), jnp.float32)
    params = init_params(k_param)
    packed = pack_params(params)            # one-time host-side weight repack

    fwd = jax.jit(relative_patch_location_forward)
    out = jax.block_until_ready(fwd(patches, packed))

    assert out.shape == (2, _OUT), out.shape
    assert out.dtype == jnp.float32
    assert bool(jnp.all(jnp.isfinite(out)))

    # Correctness check vs. pure-JAX reference (tolerance covers bf16 MXU passes).
    ref = jax.block_until_ready(jax.jit(reference_forward)(patches, params))
    max_err = float(jnp.max(jnp.abs(out - ref)))
    assert max_err < 1e-1, f"kernel/reference mismatch: max|diff|={max_err}"

    print("KERNEL_OK")
</pallas_src>

<mosaic_0001>
module attributes {stable_mosaic.version = 11 : i64} {
  func.func @_rpl_fused_kernel(%arg0: i32, %arg1: memref<64x64xf32, #tpu.memory_space<vmem>>, %arg2: memref<3x64x128xf32, #tpu.memory_space<vmem>>, %arg3: memref<1x128xf32, #tpu.memory_space<vmem>>, %arg4: memref<3x128x64xf32, #tpu.memory_space<vmem>>, %arg5: memref<1x64xf32, #tpu.memory_space<vmem>>, %arg6: memref<3x64x128xf32, #tpu.memory_space<vmem>>, %arg7: memref<1x128xf32, #tpu.memory_space<vmem>>, %arg8: memref<3x128x64xf32, #tpu.memory_space<vmem>>, %arg9: memref<1x64xf32, #tpu.memory_space<vmem>>, %arg10: memref<4x64x64xf32, #tpu.memory_space<vmem>>, %arg11: memref<4x64x64xf32, #tpu.memory_space<vmem>>, %arg12: memref<1x64xf32, #tpu.memory_space<vmem>>, %arg13: memref<64x8xf32, #tpu.memory_space<vmem>>, %arg14: memref<1x8xf32, #tpu.memory_space<vmem>>, %arg15: memref<2x8xf32, #tpu.memory_space<vmem>>, %arg16: memref<64x128xf32, #tpu.memory_space<vmem>>, %arg17: memref<32x64xf32, #tpu.memory_space<vmem>>, %arg18: memref<32x128xf32, #tpu.memory_space<vmem>>, %arg19: memref<16x64xf32, #tpu.memory_space<vmem>>) attributes {dimension_semantics = [#tpu.dimension_semantics<arbitrary>], iteration_bounds = array<i64: 1>, scalar_prefetch = 0 : i64, scratch_operands = 4 : i64, tpu.core_type = #tpu.core_type<tc>, window_params = [{pipeline_mode = #tpu.pipeline_mode<synchronous>, transform_indices = @transform_0, window_bounds = array<i64: 64, 64>}, {pipeline_mode = #tpu.pipeline_mode<synchronous>, transform_indices = @transform_1, window_bounds = array<i64: 3, 64, 128>}, {pipeline_mode = #tpu.pipeline_mode<synchronous>, transform_indices = @transform_2, window_bounds = array<i64: 1, 128>}, {pipeline_mode = #tpu.pipeline_mode<synchronous>, transform_indices = @transform_3, window_bounds = array<i64: 3, 128, 64>}, {pipeline_mode = #tpu.pipeline_mode<synchronous>, transform_indices = @transform_4, window_bounds = array<i64: 1, 64>}, {pipeline_mode = #tpu.pipeline_mode<synchronous>, transform_indices = @transform_5, window_bounds = array<i64: 3, 64, 128>}, {pipeline_mode = #tpu.pipeline_mode<synchronous>, transform_indices = @transform_6, window_bounds = array<i64: 1, 128>}, {pipeline_mode = #tpu.pipeline_mode<synchronous>, transform_indices = @transform_7, window_bounds = array<i64: 3, 128, 64>}, {pipeline_mode = #tpu.pipeline_mode<synchronous>, transform_indices = @transform_8, window_bounds = array<i64: 1, 64>}, {pipeline_mode = #tpu.pipeline_mode<synchronous>, transform_indices = @transform_9, window_bounds = array<i64: 4, 64, 64>}, {pipeline_mode = #tpu.pipeline_mode<synchronous>, transform_indices = @transform_10, window_bounds = array<i64: 4, 64, 64>}, {pipeline_mode = #tpu.pipeline_mode<synchronous>, transform_indices = @transform_11, window_bounds = array<i64: 1, 64>}, {pipeline_mode = #tpu.pipeline_mode<synchronous>, transform_indices = @transform_12, window_bounds = array<i64: 64, 8>}, {pipeline_mode = #tpu.pipeline_mode<synchronous>, transform_indices = @transform_13, window_bounds = array<i64: 1, 8>}, {pipeline_mode = #tpu.pipeline_mode<synchronous>, transform_indices = @transform_14, window_bounds = array<i64: 2, 8>}]} {
    %c0 = arith.constant 0 : index
    %c0_0 = arith.constant 0 : index
    %0 = vector.load %arg1[%c0, %c0_0] : memref<64x64xf32, #tpu.memory_space<vmem>>, vector<64x64xf32>
    %c1 = arith.constant 1 : index
    %c0_1 = arith.constant 0 : index
    %c0_2 = arith.constant 0 : index
    %1 = vector.load %arg2[%c1, %c0_1, %c0_2] : memref<3x64x128xf32, #tpu.memory_space<vmem>>, vector<1x64x128xf32>
    %2 = vector.shape_cast %1 : vector<1x64x128xf32> to vector<64x128xf32>
    %cst = arith.constant dense<0.000000e+00> : vector<64x128xf32>
    %3 = tpu.matmul %0, %2, %cst {dimension_numbers = #tpu.dot_dimension_numbers<[1], [0], [0], [1], [0, 0, 1, 1], [], []>} : vector<64x64xf32>, vector<64x128xf32>, vector<64x128xf32> -> vector<64x128xf32>
    %c0_3 = arith.constant 0 : index
    %c0_4 = arith.constant 0 : index
    %4 = vector.load %arg3[%c0_3, %c0_4] : memref<1x128xf32, #tpu.memory_space<vmem>>, vector<1x128xf32>
    %5 = vector.broadcast %4 : vector<1x128xf32> to vector<64x128xf32>
    %6 = arith.addf %3, %5 : vector<64x128xf32>
    %c0_5 = arith.constant 0 : index
    %c0_6 = arith.constant 0 : index
    %7 = vector.load %arg16[%c0_5, %c0_6] : memref<64x128xf32, #tpu.memory_space<vmem>>, vector<64x128xf32>
    tpu.vector_store %arg16[%c0_5, %c0_6], %6 {strides = array<i32>} : memref<64x128xf32, #tpu.memory_space<vmem>>, vector<64x128xf32>,
    %c4 = arith.constant 4 : index
    %c0_7 = arith.constant 0 : index
    %8 = vector.load %arg16[%c4, %c0_7] : memref<64x128xf32, #tpu.memory_space<vmem>>, vector<60x128xf32>
    %c0_8 = arith.constant 0 : index
    %c0_9 = arith.constant 0 : index
    %9 = vector.load %arg1[%c0_8, %c0_9] : memref<64x64xf32, #tpu.memory_space<vmem>>, vector<60x64xf32>
    %c0_10 = arith.constant 0 : index
    %c0_11 = arith.constant 0 : index
    %c0_12 = arith.constant 0 : index
    %10 = vector.load %arg2[%c0_10, %c0_11, %c0_12] : memref<3x64x128xf32, #tpu.memory_space<vmem>>, vector<1x64x128xf32>
    %11 = vector.shape_cast %10 : vector<1x64x128xf32> to vector<64x128xf32>
    %cst_13 = arith.constant dense<0.000000e+00> : vector<60x128xf32>
    %12 = tpu.matmul %9, %11, %cst_13 {dimension_numbers = #tpu.dot_dimension_numbers<[1], [0], [0], [1], [0, 0, 1, 1], [], []>} : vector<60x64xf32>, vector<64x128xf32>, vector<60x128xf32> -> vector<60x128xf32>
    %13 = arith.addf %8, %12 : vector<60x128xf32>
    %c4_14 = arith.constant 4 : index
    %c0_15 = arith.constant 0 : index
    %14 = vector.load %arg16[%c4_14, %c0_15] : memref<64x128xf32, #tpu.memory_space<vmem>>, vector<60x128xf32>
    tpu.vector_store %arg16[%c4_14, %c0_15], %13 {strides = array<i32>} : memref<64x128xf32, #tpu.memory_space<vmem>>, vector<60x128xf32>,
    %c0_16 = arith.constant 0 : index
    %c0_17 = arith.constant 0 : index
    %15 = vector.load %arg16[%c0_16, %c0_17] : memref<64x128xf32, #tpu.memory_space<vmem>>, vector<60x128xf32>
    %c4_18 = arith.constant 4 : index
    %c0_19 = arith.constant 0 : index
    %16 = vector.load %arg1[%c4_18, %c0_19] : memref<64x64xf32, #tpu.memory_space<vmem>>, vector<60x64xf32>
    %c2 = arith.constant 2 : index
    %c0_20 = arith.constant 0 : index
    %c0_21 = arith.constant 0 : index
    %17 = vector.load %arg2[%c2, %c0_20, %c0_21] : memref<3x64x128xf32, #tpu.memory_space<vmem>>, vector<1x64x128xf32>
    %18 = vector.shape_cast %17 : vector<1x64x128xf32> to vector<64x128xf32>
    %cst_22 = arith.constant dense<0.000000e+00> : vector<60x128xf32>
    %19 = tpu.matmul %16, %18, %cst_22 {dimension_numbers = #tpu.dot_dimension_numbers<[1], [0], [0], [1], [0, 0, 1, 1], [], []>} : vector<60x64xf32>, vector<64x128xf32>, vector<60x128xf32> -> vector<60x128xf32>
    %20 = arith.addf %15, %19 : vector<60x128xf32>
    %c0_23 = arith.constant 0 : index
    %c0_24 = arith.constant 0 : index
    %21 = vector.load %arg16[%c0_23, %c0_24] : memref<64x128xf32, #tpu.memory_space<vmem>>, vector<60x128xf32>
    tpu.vector_store %arg16[%c0_23, %c0_24], %20 {strides = array<i32>} : memref<64x128xf32, #tpu.memory_space<vmem>>, vector<60x128xf32>,
    %c0_25 = arith.constant 0 : index
    %c0_26 = arith.constant 0 : index
    %22 = vector.load %arg16[%c0_25, %c0_26] : memref<64x128xf32, #tpu.memory_space<vmem>>, vector<64x128xf32>
    %cst_27 = arith.constant 0.000000e+00 : f32
    %23 = vector.broadcast %cst_27 : f32 to vector<64x128xf32>
    %24 = arith.maximumf %22, %23 : vector<64x128xf32>
    %c0_28 = arith.constant 0 : index
    %c0_29 = arith.constant 0 : index
    %25 = vector.load %arg16[%c0_28, %c0_29] : memref<64x128xf32, #tpu.memory_space<vmem>>, vector<64x128xf32>
    tpu.vector_store %arg16[%c0_28, %c0_29], %24 {strides = array<i32>} : memref<64x128xf32, #tpu.memory_space<vmem>>, vector<64x128xf32>,
    %cst_30 = arith.constant 0.000000e+00 : f32
    %26 = vector.broadcast %cst_30 : f32 to vector<4x64xf32>
    %c0_31 = arith.constant 0 : index
    %c0_32 = arith.constant 0 : index
    %27 = vector.load %arg5[%c0_31, %c0_32] : memref<1x64xf32, #tpu.memory_space<vmem>>, vector<1x64xf32>
    %28 = vector.broadcast %27 : vector<1x64xf32> to vector<4x64xf32>
    %29 = arith.addf %26, %28 : vector<4x64xf32>
    %c0_33 = arith.constant 0 : index
    %c0_34 = arith.constant 0 : index
    %30 = vector.load %arg16[%c0_33, %c0_34] : memref<64x128xf32, #tpu.memory_space<vmem>>, vector<4x128xf32>
    %c1_35 = arith.constant 1 : index
    %c0_36 = arith.constant 0 : index
    %c0_37 = arith.constant 0 : index
    %31 = vector.load %arg4[%c1_35, %c0_36, %c0_37] : memref<3x128x64xf32, #tpu.memory_space<vmem>>, vector<1x128x64xf32>
    %32 = vector.shape_cast %31 : vector<1x128x64xf32> to vector<128x64xf32>
    %cst_38 = arith.constant dense<0.000000e+00> : vector<4x64xf32>
    %33 = tpu.matmul %30, %32, %cst_38 {dimension_numbers = #tpu.dot_dimension_numbers<[1], [0], [0], [1], [0, 0, 1, 1], [], []>} : vector<4x128xf32>, vector<128x64xf32>, vector<4x64xf32> -> vector<4x64xf32>
    %34 = arith.addf %29, %33 : vector<4x64xf32>
    %c4_39 = arith.constant 4 : index
    %c0_40 = arith.constant 0 : index
    %35 = vector.load %arg16[%c4_39, %c0_40] : memref<64x128xf32, #tpu.memory_space<vmem>>, vector<4x128xf32>
    %c2_41 = arith.constant 2 : index
    %c0_42 = arith.constant 0 : index
    %c0_43 = arith.constant 0 : index
    %36 = vector.load %arg4[%c2_41, %c0_42, %c0_43] : memref<3x128x64xf32, #tpu.memory_space<vmem>>, vector<1x128x64xf32>
    %37 = vector.shape_cast %36 : vector<1x128x64xf32> to vector<128x64xf32>
    %cst_44 = arith.constant dense<0.000000e+00> : vector<4x64xf32>
    %38 = tpu.matmul %35, %37, %cst_44 {dimension_numbers = #tpu.dot_dimension_numbers<[1], [0], [0], [1], [0, 0, 1, 1], [], []>} : vector<4x128xf32>, vector<128x64xf32>, vector<4x64xf32> -> vector<4x64xf32>
    %39 = arith.addf %34, %38 : vector<4x64xf32>
    %cst_45 = arith.constant 0.000000e+00 : f32
    %40 = vector.broadcast %cst_45 : f32 to vector<4x64xf32>
    %41 = arith.maximumf %39, %40 : vector<4x64xf32>
    %c0_46 = arith.constant 0 : index
    %c0_47 = arith.constant 0 : index
    %42 = vector.load %arg17[%c0_46, %c0_47] : memref<32x64xf32, #tpu.memory_space<vmem>>, vector<4x64xf32>
    tpu.vector_store %arg17[%c0_46, %c0_47], %41 {strides = array<i32>} : memref<32x64xf32, #tpu.memory_space<vmem>>, vector<4x64xf32>,
    %cst_48 = arith.constant 0.000000e+00 : f32
    %43 = vector.broadcast %cst_48 : f32 to vector<4x64xf32>
    %c0_49 = arith.constant 0 : index
    %c0_50 = arith.constant 0 : index
    %44 = vector.load %arg5[%c0_49, %c0_50] : memref<1x64xf32, #tpu.memory_space<vmem>>, vector<1x64xf32>
    %45 = vector.broadcast %44 : vector<1x64xf32> to vector<4x64xf32>
    %46 = arith.addf %43, %45 : vector<4x64xf32>
    %c4_51 = arith.constant 4 : index
    %c0_52 = arith.constant 0 : index
    %47 = vector.load %arg16[%c4_51, %c0_52] : memref<64x128xf32, #tpu.memory_space<vmem>>, vector<4x128xf32>
    %c0_53 = arith.constant 0 : index
    %c0_54 = arith.constant 0 : index
    %c0_55 = arith.constant 0 : index
    %48 = vector.load %arg4[%c0_53, %c0_54, %c0_55] : memref<3x128x64xf32, #tpu.memory_space<vmem>>, vector<1x128x64xf32>
    %49 = vector.shape_cast %48 : vector<1x128x64xf32> to vector<128x64xf32>
    %cst_56 = arith.constant dense<0.000000e+00> : vector<4x64xf32>
    %50 = tpu.matmul %47, %49, %cst_56 {dimension_numbers = #tpu.dot_dimension_numbers<[1], [0], [0], [1], [0, 0, 1, 1], [], []>} : vector<4x128xf32>, vector<128x64xf32>, vector<4x64xf32> -> vector<4x64xf32>
    %51 = arith.addf %46, %50 : vector<4x64xf32>
    %c8 = arith.constant 8 : index
    %c0_57 = arith.constant 0 : index
    %52 = vector.load %arg16[%c8, %c0_57] : memref<64x128xf32, #tpu.memory_space<vmem>>, vector<4x128xf32>
    %c1_58 = arith.constant 1 : index
    %c0_59 = arith.constant 0 : index
    %c0_60 = arith.constant 0 : index
    %53 = vector.load %arg4[%c1_58, %c0_59, %c0_60] : memref<3x128x64xf32, #tpu.memory_space<vmem>>, vector<1x128x64xf32>
    %54 = vector.shape_cast %53 : vector<1x128x64xf32> to vector<128x64xf32>
    %cst_61 = arith.constant dense<0.000000e+00> : vector<4x64xf32>
    %55 = tpu.matmul %52, %54, %cst_61 {dimension_numbers = #tpu.dot_dimension_numbers<[1], [0], [0], [1], [0, 0, 1, 1], [], []>} : vector<4x128xf32>, vector<128x64xf32>, vector<4x64xf32> -> vector<4x64xf32>
    %56 = arith.addf %51, %55 : vector<4x64xf32>
    %c12 = arith.constant 12 : index
    %c0_62 = arith.constant 0 : index
    %57 = vector.load %arg16[%c12, %c0_62] : memref<64x128xf32, #tpu.memory_space<vmem>>, vector<4x128xf32>
    %c2_63 = arith.constant 2 : index
    %c0_64 = arith.constant 0 : index
    %c0_65 = arith.constant 0 : index
    %58 = vector.load %arg4[%c2_63, %c0_64, %c0_65] : memref<3x128x64xf32, #tpu.memory_space<vmem>>, vector<1x128x64xf32>
    %59 = vector.shape_cast %58 : vector<1x128x64xf32> to vector<128x64xf32>
    %cst_66 = arith.constant dense<0.000000e+00> : vector<4x64xf32>
    %60 = tpu.matmul %57, %59, %cst_66 {dimension_numbers = #tpu.dot_dimension_numbers<[1], [0], [0], [1], [0, 0, 1, 1], [], []>} : vector<4x128xf32>, vector<128x64xf32>, vector<4x64xf32> -> vector<4x64xf32>
    %61 = arith.addf %56, %60 : vector<4x64xf32>
    %cst_67 = arith.constant 0.000000e+00 : f32
    %62 = vector.broadcast %cst_67 : f32 to vector<4x64xf32>
    %63 = arith.maximumf %61, %62 : vector<4x64xf32>
    %c4_68 = arith.constant 4 : index
    %c0_69 = arith.constant 0 : index
    %64 = vector.load %arg17[%c4_68, %c0_69] : memref<32x64xf32, #tpu.memory_space<vmem>>, vector<4x64xf32>
    tpu.vector_store %arg17[%c4_68, %c0_69], %63 {strides = array<i32>} : memref<32x64xf32, #tpu.memory_space<vmem>>, vector<4x64xf32>,
    %cst_70 = arith.constant 0.000000e+00 : f32
    %65 = vector.broadcast %cst_70 : f32 to vector<4x64xf32>
    %c0_71 = arith.constant 0 : index
    %c0_72 = arith.constant 0 : index
    %66 = vector.load %arg5[%c0_71, %c0_72] : memref<1x64xf32, #tpu.memory_space<vmem>>, vector<1x64xf32>
    %67 = vector.broadcast %66 : vector<1x64xf32> to vector<4x64xf32>
    %68 = arith.addf %65, %67 : vector<4x64xf32>
    %c12_73 = arith.constant 12 : index
    %c0_74 = arith.constant 0 : index
    %69 = vector.load %arg16[%c12_73, %c0_74] : memref<64x128xf32, #tpu.memory_space<vmem>>, vector<4x128xf32>
    %c0_75 = arith.constant 0 : index
    %c0_76 = arith.constant 0 : index
    %c0_77 = arith.constant 0 : index
    %70 = vector.load %arg4[%c0_75, %c0_76, %c0_77] : memref<3x128x64xf32, #tpu.memory_space<vmem>>, vector<1x128x64xf32>
    %71 = vector.shape_cast %70 : vector<1x128x64xf32> to vector<128x64xf32>
    %cst_78 = arith.constant dense<0.000000e+00> : vector<4x64xf32>
    %72 = tpu.matmul %69, %71, %cst_78 {dimension_numbers = #tpu.dot_dimension_numbers<[1], [0], [0], [1], [0, 0, 1, 1], [], []>} : vector<4x128xf32>, vector<128x64xf32>, vector<4x64xf32> -> vector<4x64xf32>
    %73 = arith.addf %68, %72 : vector<4x64xf32>
    %c16 = arith.constant 16 : index
    %c0_79 = arith.constant 0 : index
    %74 = vector.load %arg16[%c16, %c0_79] : memref<64x128xf32, #tpu.memory_space<vmem>>, vector<4x128xf32>
    %c1_80 = arith.constant 1 : index
    %c0_81 = arith.constant 0 : index
    %c0_82 = arith.constant 0 : index
    %75 = vector.load %arg4[%c1_80, %c0_81, %c0_82] : memref<3x128x64xf32, #tpu.memory_space<vmem>>, vector<1x128x64xf32>
    %76 = vector.shape_cast %75 : vector<1x128x64xf32> to vector<128x64xf32>
    %cst_83 = arith.constant dense<0.000000e+00> : vector<4x64xf32>
    %77 = tpu.matmul %74, %76, %cst_83 {dimension_numbers = #tpu.dot_dimension_numbers<[1], [0], [0], [1], [0, 0, 1, 1], [], []>} : vector<4x128xf32>, vector<128x64xf32>, vector<4x64xf32> -> vector<4x64xf32>
    %78 = arith.addf %73, %77 : vector<4x64xf32>
    %c20 = arith.constant 20 : index
    %c0_84 = arith.constant 0 : index
    %79 = vector.load %arg16[%c20, %c0_84] : memref<64x128xf32, #tpu.memory_space<vmem>>, vector<4x128xf32>
    %c2_85 = arith.constant 2 : index
    %c0_86 = arith.constant 0 : index
    %c0_87 = arith.constant 0 : index
    %80 = vector.load %arg4[%c2_85, %c0_86, %c0_87] : memref<3x128x64xf32, #tpu.memory_space<vmem>>, vector<1x128x64xf32>
    %81 = vector.shape_cast %80 : vector<1x128x64xf32> to vector<128x64xf32>
    %cst_88 = arith.constant dense<0.000000e+00> : vector<4x64xf32>
    %82 = tpu.matmul %79, %81, %cst_88 {dimension_numbers = #tpu.dot_dimension_numbers<[1], [0], [0], [1], [0, 0, 1, 1], [], []>} : vector<4x128xf32>, vector<128x64xf32>, vector<4x64xf32> -> vector<4x64xf32>
    %83 = arith.addf %78, %82 : vector<4x64xf32>
    %cst_89 = arith.constant 0.000000e+00 : f32
    %84 = vector.broadcast %cst_89 : f32 to vector<4x64xf32>
    %85 = arith.maximumf %83, %84 : vector<4x64xf32>
    %c8_90 = arith.constant 8 : index
    %c0_91 = arith.constant 0 : index
    %86 = vector.load %arg17[%c8_90, %c0_91] : memref<32x64xf32, #tpu.memory_space<vmem>>, vector<4x64xf32>
    tpu.vector_store %arg17[%c8_90, %c0_91], %85 {strides = array<i32>} : memref<32x64xf32, #tpu.memory_space<vmem>>, vector<4x64xf32>,
    %cst_92 = arith.constant 0.000000e+00 : f32
    %87 = vector.broadcast %cst_92 : f32 to vector<4x64xf32>
    %c0_93 = arith.constant 0 : index
    %c0_94 = arith.constant 0 : index
    %88 = vector.load %arg5[%c0_93, %c0_94] : memref<1x64xf32, #tpu.memory_space<vmem>>, vector<1x64xf32>
    %89 = vector.broadcast %88 : vector<1x64xf32> to vector<4x64xf32>
    %90 = arith.addf %87, %89 : vector<4x64xf32>
    %c20_95 = arith.constant 20 : index
    %c0_96 = arith.constant 0 : index
    %91 = vector.load %arg16[%c20_95, %c0_96] : memref<64x128xf32, #tpu.memory_space<vmem>>, vector<4x128xf32>
    %c0_97 = arith.constant 0 : index
    %c0_98 = arith.constant 0 : index
    %c0_99 = arith.constant 0 : index
    %92 = vector.load %arg4[%c0_97, %c0_98, %c0_99] : memref<3x128x64xf32, #tpu.memory_space<vmem>>, vector<1x128x64xf32>
    %93 = vector.shape_cast %92 : vector<1x128x64xf32> to vector<128x64xf32>
    %cst_100 = arith.constant dense<0.000000e+00> : vector<4x64xf32>
    %94 = tpu.matmul %91, %93, %cst_100 {dimension_numbers = #tpu.dot_dimension_numbers<[1], [0], [0], [1], [0, 0, 1, 1], [], []>} : vector<4x128xf32>, vector<128x64xf32>, vector<4x64xf32> -> vector<4x64xf32>
    %95 = arith.addf %90, %94 : vector<4x64xf32>
    %c24 = arith.constant 24 : index
    %c0_101 = arith.constant 0 : index
    %96 = vector.load %arg16[%c24, %c0_101] : memref<64x128xf32, #tpu.memory_space<vmem>>, vector<4x128xf32>
    %c1_102 = arith.constant 1 : index
    %c0_103 = arith.constant 0 : index
    %c0_104 = arith.constant 0 : index
    %97 = vector.load %arg4[%c1_102, %c0_103, %c0_104] : memref<3x128x64xf32, #tpu.memory_space<vmem>>, vector<1x128x64xf32>
    %98 = vector.shape_cast %97 : vector<1x128x64xf32> to vector<128x64xf32>
    %cst_105 = arith.constant dense<0.000000e+00> : vector<4x64xf32>
    %99 = tpu.matmul %96, %98, %cst_105 {dimension_numbers = #tpu.dot_dimension_numbers<[1], [0], [0], [1], [0, 0, 1, 1], [], []>} : vector<4x128xf32>, vector<128x64xf32>, vector<4x64xf32> -> vector<4x64xf32>
    %100 = arith.addf %95, %99 : vector<4x64xf32>
    %c28 = arith.constant 28 : index
    %c0_106 = arith.constant 0 : index
    %101 = vector.load %arg16[%c28, %c0_106] : memref<64x128xf32, #tpu.memory_space<vmem>>, vector<4x128xf32>
    %c2_107 = arith.constant 2 : index
    %c0_108 = arith.constant 0 : index
    %c0_109 = arith.constant 0 : index
    %102 = vector.load %arg4[%c2_107, %c0_108, %c0_109] : memref<3x128x64xf32, #tpu.memory_space<vmem>>, vector<1x128x64xf32>
    %103 = vector.shape_cast %102 : vector<1x128x64xf32> to vector<128x64xf32>
    %cst_110 = arith.constant dense<0.000000e+00> : vector<4x64xf32>
    %104 = tpu.matmul %101, %103, %cst_110 {dimension_numbers = #tpu.dot_dimension_numbers<[1], [0], [0], [1], [0, 0, 1, 1], [], []>} : vector<4x128xf32>, vector<128x64xf32>, vector<4x64xf32> -> vector<4x64xf32>
    %105 = arith.addf %100, %104 : vector<4x64xf32>
    %cst_111 = arith.constant 0.000000e+00 : f32
    %106 = vector.broadcast %cst_111 : f32 to vector<4x64xf32>
    %107 = arith.maximumf %105, %106 : vector<4x64xf32>
    %c12_112 = arith.constant 12 : index
    %c0_113 = arith.constant 0 : index
    %108 = vector.load %arg17[%c12_112, %c0_113] : memref<32x64xf32, #tpu.memory_space<vmem>>, vector<4x64xf32>
    tpu.vector_store %arg17[%c12_112, %c0_113], %107 {strides = array<i32>} : memref<32x64xf32, #tpu.memory_space<vmem>>, vector<4x64xf32>,
    %cst_114 = arith.constant 0.000000e+00 : f32
    %109 = vector.broadcast %cst_114 : f32 to vector<4x64xf32>
    %c0_115 = arith.constant 0 : index
    %c0_116 = arith.constant 0 : index
    %110 = vector.load %arg5[%c0_115, %c0_116] : memref<1x64xf32, #tpu.memory_space<vmem>>, vector<1x64xf32>
    %111 = vector.broadcast %110 : vector<1x64xf32> to vector<4x64xf32>
    %112 = arith.addf %109, %111 : vector<4x64xf32>
    %c28_117 = arith.constant 28 : index
    %c0_118 = arith.constant 0 : index
    %113 = vector.load %arg16[%c28_117, %c0_118] : memref<64x128xf32, #tpu.memory_space<vmem>>, vector<4x128xf32>
    %c0_119 = arith.constant 0 : index
    %c0_120 = arith.constant 0 : index
    %c0_121 = arith.constant 0 : index
    %114 = vector.load %arg4[%c0_119, %c0_120, %c0_121] : memref<3x128x64xf32, #tpu.memory_space<vmem>>, vector<1x128x64xf32>
    %115 = vector.shape_cast %114 : vector<1x128x64xf32> to vector<128x64xf32>
    %cst_122 = arith.constant dense<0.000000e+00> : vector<4x64xf32>
    %116 = tpu.matmul %113, %115, %cst_122 {dimension_numbers = #tpu.dot_dimension_numbers<[1], [0], [0], [1], [0, 0, 1, 1], [], []>} : vector<4x128xf32>, vector<128x64xf32>, vector<4x64xf32> -> vector<4x64xf32>
    %117 = arith.addf %112, %116 : vector<4x64xf32>
    %c32 = arith.constant 32 : index
    %c0_123 = arith.constant 0 : index
    %118 = vector.load %arg16[%c32, %c0_123] : memref<64x128xf32, #tpu.memory_space<vmem>>, vector<4x128xf32>
    %c1_124 = arith.constant 1 : index
    %c0_125 = arith.constant 0 : index
    %c0_126 = arith.constant 0 : index
    %119 = vector.load %arg4[%c1_124, %c0_125, %c0_126] : memref<3x128x64xf32, #tpu.memory_space<vmem>>, vector<1x128x64xf32>
    %120 = vector.shape_cast %119 : vector<1x128x64xf32> to vector<128x64xf32>
    %cst_127 = arith.constant dense<0.000000e+00> : vector<4x64xf32>
    %121 = tpu.matmul %118, %120, %cst_127 {dimension_numbers = #tpu.dot_dimension_numbers<[1], [0], [0], [1], [0, 0, 1, 1], [], []>} : vector<4x128xf32>, vector<128x64xf32>, vector<4x64xf32> -> vector<4x64xf32>
    %122 = arith.addf %117, %121 : vector<4x64xf32>
    %c36 = arith.constant 36 : index
    %c0_128 = arith.constant 0 : index
    %123 = vector.load %arg16[%c36, %c0_128] : memref<64x128xf32, #tpu.memory_space<vmem>>, vector<4x128xf32>
    %c2_129 = arith.constant 2 : index
    %c0_130 = arith.constant 0 : index
    %c0_131 = arith.constant 0 : index
    %124 = vector.load %arg4[%c2_129, %c0_130, %c0_131] : memref<3x128x64xf32, #tpu.memory_space<vmem>>, vector<1x128x64xf32>
    %125 = vector.shape_cast %124 : vector<1x128x64xf32> to vector<128x64xf32>
    %cst_132 = arith.constant dense<0.000000e+00> : vector<4x64xf32>
    %126 = tpu.matmul %123, %125, %cst_132 {dimension_numbers = #tpu.dot_dimension_numbers<[1], [0], [0], [1], [0, 0, 1, 1], [], []>} : vector<4x128xf32>, vector<128x64xf32>, vector<4x64xf32> -> vector<4x64xf32>
    %127 = arith.addf %122, %126 : vector<4x64xf32>
    %cst_133 = arith.constant 0.000000e+00 : f32
    %128 = vector.broadcast %cst_133 : f32 to vector<4x64xf32>
    %129 = arith.maximumf %127, %128 : vector<4x64xf32>
    %c16_134 = arith.constant 16 : index
    %c0_135 = arith.constant 0 : index
    %130 = vector.load %arg17[%c16_134, %c0_135] : memref<32x64xf32, #tpu.memory_space<vmem>>, vector<4x64xf32>
    tpu.vector_store %arg17[%c16_134, %c0_135], %129 {strides = array<i32>} : memref<32x64xf32, #tpu.memory_space<vmem>>, vector<4x64xf32>,
    %cst_136 = arith.constant 0.000000e+00 : f32
    %131 = vector.broadcast %cst_136 : f32 to vector<4x64xf32>
    %c0_137 = arith.constant 0 : index
    %c0_138 = arith.constant 0 : index
    %132 = vector.load %arg5[%c0_137, %c0_138] : memref<1x64xf32, #tpu.memory_space<vmem>>, vector<1x64xf32>
    %133 = vector.broadcast %132 : vector<1x64xf32> to vector<4x64xf32>
    %134 = arith.addf %131, %133 : vector<4x64xf32>
    %c36_139 = arith.constant 36 : index
    %c0_140 = arith.constant 0 : index
    %135 = vector.load %arg16[%c36_139, %c0_140] : memref<64x128xf32, #tpu.memory_space<vmem>>, vector<4x128xf32>
    %c0_141 = arith.constant 0 : index
    %c0_142 = arith.constant 0 : index
    %c0_143 = arith.constant 0 : index
    %136 = vector.load %arg4[%c0_141, %c0_142, %c0_143] : memref<3x128x64xf32, #tpu.memory_space<vmem>>, vector<1x128x64xf32>
    %137 = vector.shape_cast %136 : vector<1x128x64xf32> to vector<128x64xf32>
    %cst_144 = arith.constant dense<0.000000e+00> : vector<4x64xf32>
    %138 = tpu.matmul %135, %137, %cst_144 {dimension_numbers = #tpu.dot_dimension_numbers<[1], [0], [0], [1], [0, 0, 1, 1], [], []>} : vector<4x128xf32>, vector<128x64xf32>, vector<4x64xf32> -> vector<4x64xf32>
    %139 = arith.addf %134, %138 : vector<4x64xf32>
    %c40 = arith.constant 40 : index
    %c0_145 = arith.constant 0 : index
    %140 = vector.load %arg16[%c40, %c0_145] : memref<64x128xf32, #tpu.memory_space<vmem>>, vector<4x128xf32>
    %c1_146 = arith.constant 1 : index
    %c0_147 = arith.constant 0 : index
    %c0_148 = arith.constant 0 : index
    %141 = vector.load %arg4[%c1_146, %c0_147, %c0_148] : memref<3x128x64xf32, #tpu.memory_space<vmem>>, vector<1x128x64xf32>
    %142 = vector.shape_cast %141 : vector<1x128x64xf32> to vector<128x64xf32>
    %cst_149 = arith.constant dense<0.000000e+00> : vector<4x64xf32>
    %143 = tpu.matmul %140, %142, %cst_149 {dimension_numbers = #tpu.dot_dimension_numbers<[1], [0], [0], [1], [0, 0, 1, 1], [], []>} : vector<4x128xf32>, vector<128x64xf32>, vector<4x64xf32> -> vector<4x64xf32>
    %144 = arith.addf %139, %143 : vector<4x64xf32>
    %c44 = arith.constant 44 : index
    %c0_150 = arith.constant 0 : index
    %145 = vector.load %arg16[%c44, %c0_150] : memref<64x128xf32, #tpu.memory_space<vmem>>, vector<4x128xf32>
    %c2_151 = arith.constant 2 : index
    %c0_152 = arith.constant 0 : index
    %c0_153 = arith.constant 0 : index
    %146 = vector.load %arg4[%c2_151, %c0_152, %c0_153] : memref<3x128x64xf32, #tpu.memory_space<vmem>>, vector<1x128x64xf32>
    %147 = vector.shape_cast %146 : vector<1x128x64xf32> to vector<128x64xf32>
    %cst_154 = arith.constant dense<0.000000e+00> : vector<4x64xf32>
    %148 = tpu.matmul %145, %147, %cst_154 {dimension_numbers = #tpu.dot_dimension_numbers<[1], [0], [0], [1], [0, 0, 1, 1], [], []>} : vector<4x128xf32>, vector<128x64xf32>, vector<4x64xf32> -> vector<4x64xf32>
    %149 = arith.addf %144, %148 : vector<4x64xf32>
    %cst_155 = arith.constant 0.000000e+00 : f32
    %150 = vector.broadcast %cst_155 : f32 to vector<4x64xf32>
    %151 = arith.maximumf %149, %150 : vector<4x64xf32>
    %c20_156 = arith.constant 20 : index
    %c0_157 = arith.constant 0 : index
    %152 = vector.load %arg17[%c20_156, %c0_157] : memref<32x64xf32, #tpu.memory_space<vmem>>, vector<4x64xf32>
    tpu.vector_store %arg17[%c20_156, %c0_157], %151 {strides = array<i32>} : memref<32x64xf32, #tpu.memory_space<vmem>>, vector<4x64xf32>,
    %cst_158 = arith.constant 0.000000e+00 : f32
    %153 = vector.broadcast %cst_158 : f32 to vector<4x64xf32>
    %c0_159 = arith.constant 0 : index
    %c0_160 = arith.constant 0 : index
    %154 = vector.load %arg5[%c0_159, %c0_160] : memref<1x64xf32, #tpu.memory_space<vmem>>, vector<1x64xf32>
    %155 = vector.broadcast %154 : vector<1x64xf32> to vector<4x64xf32>
    %156 = arith.addf %153, %155 : vector<4x64xf32>
    %c44_161 = arith.constant 44 : index
    %c0_162 = arith.constant 0 : index
    %157 = vector.load %arg16[%c44_161, %c0_162] : memref<64x128xf32, #tpu.memory_space<vmem>>, vector<4x128xf32>
    %c0_163 = arith.constant 0 : index
    %c0_164 = arith.constant 0 : index
    %c0_165 = arith.constant 0 : index
    %158 = vector.load %arg4[%c0_163, %c0_164, %c0_165] : memref<3x128x64xf32, #tpu.memory_space<vmem>>, vector<1x128x64xf32>
    %159 = vector.shape_cast %158 : vector<1x128x64xf32> to vector<128x64xf32>
    %cst_166 = arith.constant dense<0.000000e+00> : vector<4x64xf32>
    %160 = tpu.matmul %157, %159, %cst_166 {dimension_numbers = #tpu.dot_dimension_numbers<[1], [0], [0], [1], [0, 0, 1, 1], [], []>} : vector<4x128xf32>, vector<128x64xf32>, vector<4x64xf32> -> vector<4x64xf32>
    %161 = arith.addf %156, %160 : vector<4x64xf32>
    %c48 = arith.constant 48 : index
    %c0_167 = arith.constant 0 : index
    %162 = vector.load %arg16[%c48, %c0_167] : memref<64x128xf32, #tpu.memory_space<vmem>>, vector<4x128xf32>
    %c1_168 = arith.constant 1 : index
    %c0_169 = arith.constant 0 : index
    %c0_170 = arith.constant 0 : index
    %163 = vector.load %arg4[%c1_168, %c0_169, %c0_170] : memref<3x128x64xf32, #tpu.memory_space<vmem>>, vector<1x128x64xf32>
    %164 = vector.shape_cast %163 : vector<1x128x64xf32> to vector<128x64xf32>
    %cst_171 = arith.constant dense<0.000000e+00> : vector<4x64xf32>
    %165 = tpu.matmul %162, %164, %cst_171 {dimension_numbers = #tpu.dot_dimension_numbers<[1], [0], [0], [1], [0, 0, 1, 1], [], []>} : vector<4x128xf32>, vector<128x64xf32>, vector<4x64xf32> -> vector<4x64xf32>
    %166 = arith.addf %161, %165 : vector<4x64xf32>
    %c52 = arith.constant 52 : index
    %c0_172 = arith.constant 0 : index
    %167 = vector.load %arg16[%c52, %c0_172] : memref<64x128xf32, #tpu.memory_space<vmem>>, vector<4x128xf32>
    %c2_173 = arith.constant 2 : index
    %c0_174 = arith.constant 0 : index
    %c0_175 = arith.constant 0 : index
    %168 = vector.load %arg4[%c2_173, %c0_174, %c0_175] : memref<3x128x64xf32, #tpu.memory_space<vmem>>, vector<1x128x64xf32>
    %169 = vector.shape_cast %168 : vector<1x128x64xf32> to vector<128x64xf32>
    %cst_176 = arith.constant dense<0.000000e+00> : vector<4x64xf32>
    %170 = tpu.matmul %167, %169, %cst_176 {dimension_numbers = #tpu.dot_dimension_numbers<[1], [0], [0], [1], [0, 0, 1, 1], [], []>} : vector<4x128xf32>, vector<128x64xf32>, vector<4x64xf32> -> vector<4x64xf32>
    %171 = arith.addf %166, %170 : vector<4x64xf32>
    %cst_177 = arith.constant 0.000000e+00 : f32
    %172 = vector.broadcast %cst_177 : f32 to vector<4x64xf32>
    %173 = arith.maximumf %171, %172 : vector<4x64xf32>
    %c24_178 = arith.constant 24 : index
    %c0_179 = arith.constant 0 : index
    %174 = vector.load %arg17[%c24_178, %c0_179] : memref<32x64xf32, #tpu.memory_space<vmem>>, vector<4x64xf32>
    tpu.vector_store %arg17[%c24_178, %c0_179], %173 {strides = array<i32>} : memref<32x64xf32, #tpu.memory_space<vmem>>, vector<4x64xf32>,
    %cst_180 = arith.constant 0.000000e+00 : f32
    %175 = vector.broadcast %cst_180 : f32 to vector<4x64xf32>
    %c0_181 = arith.constant 0 : index
    %c0_182 = arith.constant 0 : index
    %176 = vector.load %arg5[%c0_181, %c0_182] : memref<1x64xf32, #tpu.memory_space<vmem>>, vector<1x64xf32>
    %177 = vector.broadcast %176 : vector<1x64xf32> to vector<4x64xf32>
    %178 = arith.addf %175, %177 : vector<4x64xf32>
    %c52_183 = arith.constant 52 : index
    %c0_184 = arith.constant 0 : index
    %179 = vector.load %arg16[%c52_183, %c0_184] : memref<64x128xf32, #tpu.memory_space<vmem>>, vector<4x128xf32>
    %c0_185 = arith.constant 0 : index
    %c0_186 = arith.constant 0 : index
    %c0_187 = arith.constant 0 : index
    %180 = vector.load %arg4[%c0_185, %c0_186, %c0_187] : memref<3x128x64xf32, #tpu.memory_space<vmem>>, vector<1x128x64xf32>
    %181 = vector.shape_cast %180 : vector<1x128x64xf32> to vector<128x64xf32>
    %cst_188 = arith.constant dense<0.000000e+00> : vector<4x64xf32>
    %182 = tpu.matmul %179, %181, %cst_188 {dimension_numbers = #tpu.dot_dimension_numbers<[1], [0], [0], [1], [0, 0, 1, 1], [], []>} : vector<4x128xf32>, vector<128x64xf32>, vector<4x64xf32> -> vector<4x64xf32>
    %183 = arith.addf %178, %182 : vector<4x64xf32>
    %c56 = arith.constant 56 : index
    %c0_189 = arith.constant 0 : index
    %184 = vector.load %arg16[%c56, %c0_189] : memref<64x128xf32, #tpu.memory_space<vmem>>, vector<4x128xf32>
    %c1_190 = arith.constant 1 : index
    %c0_191 = arith.constant 0 : index
    %c0_192 = arith.constant 0 : index
    %185 = vector.load %arg4[%c1_190, %c0_191, %c0_192] : memref<3x128x64xf32, #tpu.memory_space<vmem>>, vector<1x128x64xf32>
    %186 = vector.shape_cast %185 : vector<1x128x64xf32> to vector<128x64xf32>
    %cst_193 = arith.constant dense<0.000000e+00> : vector<4x64xf32>
    %187 = tpu.matmul %184, %186, %cst_193 {dimension_numbers = #tpu.dot_dimension_numbers<[1], [0], [0], [1], [0, 0, 1, 1], [], []>} : vector<4x128xf32>, vector<128x64xf32>, vector<4x64xf32> -> vector<4x64xf32>
    %188 = arith.addf %183, %187 : vector<4x64xf32>
    %c60 = arith.constant 60 : index
    %c0_194 = arith.constant 0 : index
    %189 = vector.load %arg16[%c60, %c0_194] : memref<64x128xf32, #tpu.memory_space<vmem>>, vector<4x128xf32>
    %c2_195 = arith.constant 2 : index
    %c0_196 = arith.constant 0 : index
    %c0_197 = arith.constant 0 : index
    %190 = vector.load %arg4[%c2_195, %c0_196, %c0_197] : memref<3x128x64xf32, #tpu.memory_space<vmem>>, vector<1x128x64xf32>
    %191 = vector.shape_cast %190 : vector<1x128x64xf32> to vector<128x64xf32>
    %cst_198 = arith.constant dense<0.000000e+00> : vector<4x64xf32>
    %192 = tpu.matmul %189, %191, %cst_198 {dimension_numbers = #tpu.dot_dimension_numbers<[1], [0], [0], [1], [0, 0, 1, 1], [], []>} : vector<4x128xf32>, vector<128x64xf32>, vector<4x64xf32> -> vector<4x64xf32>
    %193 = arith.addf %188, %192 : vector<4x64xf32>
    %cst_199 = arith.constant 0.000000e+00 : f32
    %194 = vector.broadcast %cst_199 : f32 to vector<4x64xf32>
    %195 = arith.maximumf %193, %194 : vector<4x64xf32>
    %c28_200 = arith.constant 28 : index
    %c0_201 = arith.constant 0 : index
    %196 = vector.load %arg17[%c28_200, %c0_201] : memref<32x64xf32, #tpu.memory_space<vmem>>, vector<4x64xf32>
    tpu.vector_store %arg17[%c28_200, %c0_201], %195 {strides = array<i32>} : memref<32x64xf32, #tpu.memory_space<vmem>>, vector<4x64xf32>,
    %c0_202 = arith.constant 0 : index
    %c0_203 = arith.constant 0 : index
    %197 = vector.load %arg17[%c0_202, %c0_203] : memref<32x64xf32, #tpu.memory_space<vmem>>, vector<32x64xf32>
    %c1_204 = arith.constant 1 : index
    %c0_205 = arith.constant 0 : index
    %c0_206 = arith.constant 0 : index
    %198 = vector.load %arg6[%c1_204, %c0_205, %c0_206] : memref<3x64x128xf32, #tpu.memory_space<vmem>>, vector<1x64x128xf32>
    %199 = vector.shape_cast %198 : vector<1x64x128xf32> to vector<64x128xf32>
    %cst_207 = arith.constant dense<0.000000e+00> : vector<32x128xf32>
    %200 = tpu.matmul %197, %199, %cst_207 {dimension_numbers = #tpu.dot_dimension_numbers<[1], [0], [0], [1], [0, 0, 1, 1], [], []>} : vector<32x64xf32>, vector<64x128xf32>, vector<32x128xf32> -> vector<32x128xf32>
    %c0_208 = arith.constant 0 : index
    %c0_209 = arith.constant 0 : index
    %201 = vector.load %arg7[%c0_208, %c0_209] : memref<1x128xf32, #tpu.memory_space<vmem>>, vector<1x128xf32>
    %202 = vector.broadcast %201 : vector<1x128xf32> to vector<32x128xf32>
    %203 = arith.addf %200, %202 : vector<32x128xf32>
    %c0_210 = arith.constant 0 : index
    %c0_211 = arith.constant 0 : index
    %204 = vector.load %arg18[%c0_210, %c0_211] : memref<32x128xf32, #tpu.memory_space<vmem>>, vector<32x128xf32>
    tpu.vector_store %arg18[%c0_210, %c0_211], %203 {strides = array<i32>} : memref<32x128xf32, #tpu.memory_space<vmem>>, vector<32x128xf32>,
    %c4_212 = arith.constant 4 : index
    %c0_213 = arith.constant 0 : index
    %205 = vector.load %arg18[%c4_212, %c0_213] : memref<32x128xf32, #tpu.memory_space<vmem>>, vector<28x128xf32>
    %c0_214 = arith.constant 0 : index
    %c0_215 = arith.constant 0 : index
    %206 = vector.load %arg17[%c0_214, %c0_215] : memref<32x64xf32, #tpu.memory_space<vmem>>, vector<28x64xf32>
    %c0_216 = arith.constant 0 : index
    %c0_217 = arith.constant 0 : index
    %c0_218 = arith.constant 0 : index
    %207 = vector.load %arg6[%c0_216, %c0_217, %c0_218] : memref<3x64x128xf32, #tpu.memory_space<vmem>>, vector<1x64x128xf32>
    %208 = vector.shape_cast %207 : vector<1x64x128xf32> to vector<64x128xf32>
    %cst_219 = arith.constant dense<0.000000e+00> : vector<28x128xf32>
    %209 = tpu.matmul %206, %208, %cst_219 {dimension_numbers = #tpu.dot_dimension_numbers<[1], [0], [0], [1], [0, 0, 1, 1], [], []>} : vector<28x64xf32>, vector<64x128xf32>, vector<28x128xf32> -> vector<28x128xf32>
    %210 = arith.addf %205, %209 : vector<28x128xf32>
    %c4_220 = arith.constant 4 : index
    %c0_221 = arith.constant 0 : index
    %211 = vector.load %arg18[%c4_220, %c0_221] : memref<32x128xf32, #tpu.memory_space<vmem>>, vector<28x128xf32>
    tpu.vector_store %arg18[%c4_220, %c0_221], %210 {strides = array<i32>} : memref<32x128xf32, #tpu.memory_space<vmem>>, vector<28x128xf32>,
    %c0_222 = arith.constant 0 : index
    %c0_223 = arith.constant 0 : index
    %212 = vector.load %arg18[%c0_222, %c0_223] : memref<32x128xf32, #tpu.memory_space<vmem>>, vector<28x128xf32>
    %c4_224 = arith.constant 4 : index
    %c0_225 = arith.constant 0 : index
    %213 = vector.load %arg17[%c4_224, %c0_225] : memref<32x64xf32, #tpu.memory_space<vmem>>, vector<28x64xf32>
    %c2_226 = arith.constant 2 : index
    %c0_227 = arith.constant 0 : index
    %c0_228 = arith.constant 0 : index
    %214 = vector.load %arg6[%c2_226, %c0_227, %c0_228] : memref<3x64x128xf32, #tpu.memory_space<vmem>>, vector<1x64x128xf32>
    %215 = vector.shape_cast %214 : vector<1x64x128xf32> to vector<64x128xf32>
    %cst_229 = arith.constant dense<0.000000e+00> : vector<28x128xf32>
    %216 = tpu.matmul %213, %215, %cst_229 {dimension_numbers = #tpu.dot_dimension_numbers<[1], [0], [0], [1], [0, 0, 1, 1], [], []>} : vector<28x64xf32>, vector<64x128xf32>, vector<28x128xf32> -> vector<28x128xf32>
    %217 = arith.addf %212, %216 : vector<28x128xf32>
    %c0_230 = arith.constant 0 : index
    %c0_231 = arith.constant 0 : index
    %218 = vector.load %arg18[%c0_230, %c0_231] : memref<32x128xf32, #tpu.memory_space<vmem>>, vector<28x128xf32>
    tpu.vector_store %arg18[%c0_230, %c0_231], %217 {strides = array<i32>} : memref<32x128xf32, #tpu.memory_space<vmem>>, vector<28x128xf32>,
    %c0_232 = arith.constant 0 : index
    %c0_233 = arith.constant 0 : index
    %219 = vector.load %arg18[%c0_232, %c0_233] : memref<32x128xf32, #tpu.memory_space<vmem>>, vector<32x128xf32>
    %cst_234 = arith.constant 0.000000e+00 : f32
    %220 = vector.broadcast %cst_234 : f32 to vector<32x128xf32>
    %221 = arith.maximumf %219, %220 : vector<32x128xf32>
    %c0_235 = arith.constant 0 : index
    %c0_236 = arith.constant 0 : index
    %222 = vector.load %arg18[%c0_235, %c0_236] : memref<32x128xf32, #tpu.memory_space<vmem>>, vector<32x128xf32>
    tpu.vector_store %arg18[%c0_235, %c0_236], %221 {strides = array<i32>} : memref<32x128xf32, #tpu.memory_space<vmem>>, vector<32x128xf32>,
    %cst_237 = arith.constant 0.000000e+00 : f32
    %223 = vector.broadcast %cst_237 : f32 to vector<4x64xf32>
    %c0_238 = arith.constant 0 : index
    %c0_239 = arith.constant 0 : index
    %224 = vector.load %arg9[%c0_238, %c0_239] : memref<1x64xf32, #tpu.memory_space<vmem>>, vector<1x64xf32>
    %225 = vector.broadcast %224 : vector<1x64xf32> to vector<4x64xf32>
    %226 = arith.addf %223, %225 : vector<4x64xf32>
    %c0_240 = arith.constant 0 : index
    %c0_241 = arith.constant 0 : index
    %227 = vector.load %arg18[%c0_240, %c0_241] : memref<32x128xf32, #tpu.memory_space<vmem>>, vector<4x128xf32>
    %c1_242 = arith.constant 1 : index
    %c0_243 = arith.constant 0 : index
    %c0_244 = arith.constant 0 : index
    %228 = vector.load %arg8[%c1_242, %c0_243, %c0_244] : memref<3x128x64xf32, #tpu.memory_space<vmem>>, vector<1x128x64xf32>
    %229 = vector.shape_cast %228 : vector<1x128x64xf32> to vector<128x64xf32>
    %cst_245 = arith.constant dense<0.000000e+00> : vector<4x64xf32>
    %230 = tpu.matmul %227, %229, %cst_245 {dimension_numbers = #tpu.dot_dimension_numbers<[1], [0], [0], [1], [0, 0, 1, 1], [], []>} : vector<4x128xf32>, vector<128x64xf32>, vector<4x64xf32> -> vector<4x64xf32>
    %231 = arith.addf %226, %230 : vector<4x64xf32>
    %c4_246 = arith.constant 4 : index
    %c0_247 = arith.constant 0 : index
    %232 = vector.load %arg18[%c4_246, %c0_247] : memref<32x128xf32, #tpu.memory_space<vmem>>, vector<4x128xf32>
    %c2_248 = arith.constant 2 : index
    %c0_249 = arith.constant 0 : index
    %c0_250 = arith.constant 0 : index
    %233 = vector.load %arg8[%c2_248, %c0_249, %c0_250] : memref<3x128x64xf32, #tpu.memory_space<vmem>>, vector<1x128x64xf32>
    %234 = vector.shape_cast %233 : vector<1x128x64xf32> to vector<128x64xf32>
    %cst_251 = arith.constant dense<0.000000e+00> : vector<4x64xf32>
    %235 = tpu.matmul %232, %234, %cst_251 {dimension_numbers = #tpu.dot_dimension_numbers<[1], [0], [0], [1], [0, 0, 1, 1], [], []>} : vector<4x128xf32>, vector<128x64xf32>, vector<4x64xf32> -> vector<4x64xf32>
    %236 = arith.addf %231, %235 : vector<4x64xf32>
    %cst_252 = arith.constant 0.000000e+00 : f32
    %237 = vector.broadcast %cst_252 : f32 to vector<4x64xf32>
    %238 = arith.maximumf %236, %237 : vector<4x64xf32>
    %c0_253 = arith.constant 0 : index
    %c0_254 = arith.constant 0 : index
    %239 = vector.load %arg19[%c0_253, %c0_254] : memref<16x64xf32, #tpu.memory_space<vmem>>, vector<4x64xf32>
    tpu.vector_store %arg19[%c0_253, %c0_254], %238 {strides = array<i32>} : memref<16x64xf32, #tpu.memory_space<vmem>>, vector<4x64xf32>,
    %cst_255 = arith.constant 0.000000e+00 : f32
    %240 = vector.broadcast %cst_255 : f32 to vector<4x64xf32>
    %c0_256 = arith.constant 0 : index
    %c0_257 = arith.constant 0 : index
    %241 = vector.load %arg9[%c0_256, %c0_257] : memref<1x64xf32, #tpu.memory_space<vmem>>, vector<1x64xf32>
    %242 = vector.broadcast %241 : vector<1x64xf32> to vector<4x64xf32>
    %243 = arith.addf %240, %242 : vector<4x64xf32>
    %c4_258 = arith.constant 4 : index
    %c0_259 = arith.constant 0 : index
    %244 = vector.load %arg18[%c4_258, %c0_259] : memref<32x128xf32, #tpu.memory_space<vmem>>, vector<4x128xf32>
    %c0_260 = arith.constant 0 : index
    %c0_261 = arith.constant 0 : index
    %c0_262 = arith.constant 0 : index
    %245 = vector.load %arg8[%c0_260, %c0_261, %c0_262] : memref<3x128x64xf32, #tpu.memory_space<vmem>>, vector<1x128x64xf32>
    %246 = vector.shape_cast %245 : vector<1x128x64xf32> to vector<128x64xf32>
    %cst_263 = arith.constant dense<0.000000e+00> : vector<4x64xf32>
    %247 = tpu.matmul %244, %246, %cst_263 {dimension_numbers = #tpu.dot_dimension_numbers<[1], [0], [0], [1], [0, 0, 1, 1], [], []>} : vector<4x128xf32>, vector<128x64xf32>, vector<4x64xf32> -> vector<4x64xf32>
    %248 = arith.addf %243, %247 : vector<4x64xf32>
    %c8_264 = arith.constant 8 : index
    %c0_265 = arith.constant 0 : index
    %249 = vector.load %arg18[%c8_264, %c0_265] : memref<32x128xf32, #tpu.memory_space<vmem>>, vector<4x128xf32>
    %c1_266 = arith.constant 1 : index
    %c0_267 = arith.constant 0 : index
    %c0_268 = arith.constant 0 : index
    %250 = vector.load %arg8[%c1_266, %c0_267, %c0_268] : memref<3x128x64xf32, #tpu.memory_space<vmem>>, vector<1x128x64xf32>
    %251 = vector.shape_cast %250 : vector<1x128x64xf32> to vector<128x64xf32>
    %cst_269 = arith.constant dense<0.000000e+00> : vector<4x64xf32>
    %252 = tpu.matmul %249, %251, %cst_269 {dimension_numbers = #tpu.dot_dimension_numbers<[1], [0], [0], [1], [0, 0, 1, 1], [], []>} : vector<4x128xf32>, vector<128x64xf32>, vector<4x64xf32> -> vector<4x64xf32>
    %253 = arith.addf %248, %252 : vector<4x64xf32>
    %c12_270 = arith.constant 12 : index
    %c0_271 = arith.constant 0 : index
    %254 = vector.load %arg18[%c12_270, %c0_271] : memref<32x128xf32, #tpu.memory_space<vmem>>, vector<4x128xf32>
    %c2_272 = arith.constant 2 : index
    %c0_273 = arith.constant 0 : index
    %c0_274 = arith.constant 0 : index
    %255 = vector.load %arg8[%c2_272, %c0_273, %c0_274] : memref<3x128x64xf32, #tpu.memory_space<vmem>>, vector<1x128x64xf32>
    %256 = vector.shape_cast %255 : vector<1x128x64xf32> to vector<128x64xf32>
    %cst_275 = arith.constant dense<0.000000e+00> : vector<4x64xf32>
    %257 = tpu.matmul %254, %256, %cst_275 {dimension_numbers = #tpu.dot_dimension_numbers<[1], [0], [0], [1], [0, 0, 1, 1], [], []>} : vector<4x128xf32>, vector<128x64xf32>, vector<4x64xf32> -> vector<4x64xf32>
    %258 = arith.addf %253, %257 : vector<4x64xf32>
    %cst_276 = arith.constant 0.000000e+00 : f32
    %259 = vector.broadcast %cst_276 : f32 to vector<4x64xf32>
    %260 = arith.maximumf %258, %259 : vector<4x64xf32>
    %c4_277 = arith.constant 4 : index
    %c0_278 = arith.constant 0 : index
    %261 = vector.load %arg19[%c4_277, %c0_278] : memref<16x64xf32, #tpu.memory_space<vmem>>, vector<4x64xf32>
    tpu.vector_store %arg19[%c4_277, %c0_278], %260 {strides = array<i32>} : memref<16x64xf32, #tpu.memory_space<vmem>>, vector<4x64xf32>,
    %cst_279 = arith.constant 0.000000e+00 : f32
    %262 = vector.broadcast %cst_279 : f32 to vector<4x64xf32>
    %c0_280 = arith.constant 0 : index
    %c0_281 = arith.constant 0 : index
    %263 = vector.load %arg9[%c0_280, %c0_281] : memref<1x64xf32, #tpu.memory_space<vmem>>, vector<1x64xf32>
    %264 = vector.broadcast %263 : vector<1x64xf32> to vector<4x64xf32>
    %265 = arith.addf %262, %264 : vector<4x64xf32>
    %c12_282 = arith.constant 12 : index
    %c0_283 = arith.constant 0 : index
    %266 = vector.load %arg18[%c12_282, %c0_283] : memref<32x128xf32, #tpu.memory_space<vmem>>, vector<4x128xf32>
    %c0_284 = arith.constant 0 : index
    %c0_285 = arith.constant 0 : index
    %c0_286 = arith.constant 0 : index
    %267 = vector.load %arg8[%c0_284, %c0_285, %c0_286] : memref<3x128x64xf32, #tpu.memory_space<vmem>>, vector<1x128x64xf32>
    %268 = vector.shape_cast %267 : vector<1x128x64xf32> to vector<128x64xf32>
    %cst_287 = arith.constant dense<0.000000e+00> : vector<4x64xf32>
    %269 = tpu.matmul %266, %268, %cst_287 {dimension_numbers = #tpu.dot_dimension_numbers<[1], [0], [0], [1], [0, 0, 1, 1], [], []>} : vector<4x128xf32>, vector<128x64xf32>, vector<4x64xf32> -> vector<4x64xf32>
    %270 = arith.addf %265, %269 : vector<4x64xf32>
    %c16_288 = arith.constant 16 : index
    %c0_289 = arith.constant 0 : index
    %271 = vector.load %arg18[%c16_288, %c0_289] : memref<32x128xf32, #tpu.memory_space<vmem>>, vector<4x128xf32>
    %c1_290 = arith.constant 1 : index
    %c0_291 = arith.constant 0 : index
    %c0_292 = arith.constant 0 : index
    %272 = vector.load %arg8[%c1_290, %c0_291, %c0_292] : memref<3x128x64xf32, #tpu.memory_space<vmem>>, vector<1x128x64xf32>
    %273 = vector.shape_cast %272 : vector<1x128x64xf32> to vector<128x64xf32>
    %cst_293 = arith.constant dense<0.000000e+00> : vector<4x64xf32>
    %274 = tpu.matmul %271, %273, %cst_293 {dimension_numbers = #tpu.dot_dimension_numbers<[1], [0], [0], [1], [0, 0, 1, 1], [], []>} : vector<4x128xf32>, vector<128x64xf32>, vector<4x64xf32> -> vector<4x64xf32>
    %275 = arith.addf %270, %274 : vector<4x64xf32>
    %c20_294 = arith.constant 20 : index
    %c0_295 = arith.constant 0 : index
    %276 = vector.load %arg18[%c20_294, %c0_295] : memref<32x128xf32, #tpu.memory_space<vmem>>, vector<4x128xf32>
    %c2_296 = arith.constant 2 : index
    %c0_297 = arith.constant 0 : index
    %c0_298 = arith.constant 0 : index
    %277 = vector.load %arg8[%c2_296, %c0_297, %c0_298] : memref<3x128x64xf32, #tpu.memory_space<vmem>>, vector<1x128x64xf32>
    %278 = vector.shape_cast %277 : vector<1x128x64xf32> to vector<128x64xf32>
    %cst_299 = arith.constant dense<0.000000e+00> : vector<4x64xf32>
    %279 = tpu.matmul %276, %278, %cst_299 {dimension_numbers = #tpu.dot_dimension_numbers<[1], [0], [0], [1], [0, 0, 1, 1], [], []>} : vector<4x128xf32>, vector<128x64xf32>, vector<4x64xf32> -> vector<4x64xf32>
    %280 = arith.addf %275, %279 : vector<4x64xf32>
    %cst_300 = arith.constant 0.000000e+00 : f32
    %281 = vector.broadcast %cst_300 : f32 to vector<4x64xf32>
    %282 = arith.maximumf %280, %281 : vector<4x64xf32>
    %c8_301 = arith.constant 8 : index
    %c0_302 = arith.constant 0 : index
    %283 = vector.load %arg19[%c8_301, %c0_302] : memref<16x64xf32, #tpu.memory_space<vmem>>, vector<4x64xf32>
    tpu.vector_store %arg19[%c8_301, %c0_302], %282 {strides = array<i32>} : memref<16x64xf32, #tpu.memory_space<vmem>>, vector<4x64xf32>,
    %cst_303 = arith.constant 0.000000e+00 : f32
    %284 = vector.broadcast %cst_303 : f32 to vector<4x64xf32>
    %c0_304 = arith.constant 0 : index
    %c0_305 = arith.constant 0 : index
    %285 = vector.load %arg9[%c0_304, %c0_305] : memref<1x64xf32, #tpu.memory_space<vmem>>, vector<1x64xf32>
    %286 = vector.broadcast %285 : vector<1x64xf32> to vector<4x64xf32>
    %287 = arith.addf %284, %286 : vector<4x64xf32>
    %c20_306 = arith.constant 20 : index
    %c0_307 = arith.constant 0 : index
    %288 = vector.load %arg18[%c20_306, %c0_307] : memref<32x128xf32, #tpu.memory_space<vmem>>, vector<4x128xf32>
    %c0_308 = arith.constant 0 : index
    %c0_309 = arith.constant 0 : index
    %c0_310 = arith.constant 0 : index
    %289 = vector.load %arg8[%c0_308, %c0_309, %c0_310] : memref<3x128x64xf32, #tpu.memory_space<vmem>>, vector<1x128x64xf32>
    %290 = vector.shape_cast %289 : vector<1x128x64xf32> to vector<128x64xf32>
    %cst_311 = arith.constant dense<0.000000e+00> : vector<4x64xf32>
    %291 = tpu.matmul %288, %290, %cst_311 {dimension_numbers = #tpu.dot_dimension_numbers<[1], [0], [0], [1], [0, 0, 1, 1], [], []>} : vector<4x128xf32>, vector<128x64xf32>, vector<4x64xf32> -> vector<4x64xf32>
    %292 = arith.addf %287, %291 : vector<4x64xf32>
    %c24_312 = arith.constant 24 : index
    %c0_313 = arith.constant 0 : index
    %293 = vector.load %arg18[%c24_312, %c0_313] : memref<32x128xf32, #tpu.memory_space<vmem>>, vector<4x128xf32>
    %c1_314 = arith.constant 1 : index
    %c0_315 = arith.constant 0 : index
    %c0_316 = arith.constant 0 : index
    %294 = vector.load %arg8[%c1_314, %c0_315, %c0_316] : memref<3x128x64xf32, #tpu.memory_space<vmem>>, vector<1x128x64xf32>
    %295 = vector.shape_cast %294 : vector<1x128x64xf32> to vector<128x64xf32>
    %cst_317 = arith.constant dense<0.000000e+00> : vector<4x64xf32>
    %296 = tpu.matmul %293, %295, %cst_317 {dimension_numbers = #tpu.dot_dimension_numbers<[1], [0], [0], [1], [0, 0, 1, 1], [], []>} : vector<4x128xf32>, vector<128x64xf32>, vector<4x64xf32> -> vector<4x64xf32>
    %297 = arith.addf %292, %296 : vector<4x64xf32>
    %c28_318 = arith.constant 28 : index
    %c0_319 = arith.constant 0 : index
    %298 = vector.load %arg18[%c28_318, %c0_319] : memref<32x128xf32, #tpu.memory_space<vmem>>, vector<4x128xf32>
    %c2_320 = arith.constant 2 : index
    %c0_321 = arith.constant 0 : index
    %c0_322 = arith.constant 0 : index
    %299 = vector.load %arg8[%c2_320, %c0_321, %c0_322] : memref<3x128x64xf32, #tpu.memory_space<vmem>>, vector<1x128x64xf32>
    %300 = vector.shape_cast %299 : vector<1x128x64xf32> to vector<128x64xf32>
    %cst_323 = arith.constant dense<0.000000e+00> : vector<4x64xf32>
    %301 = tpu.matmul %298, %300, %cst_323 {dimension_numbers = #tpu.dot_dimension_numbers<[1], [0], [0], [1], [0, 0, 1, 1], [], []>} : vector<4x128xf32>, vector<128x64xf32>, vector<4x64xf32> -> vector<4x64xf32>
    %302 = arith.addf %297, %301 : vector<4x64xf32>
    %cst_324 = arith.constant 0.000000e+00 : f32
    %303 = vector.broadcast %cst_324 : f32 to vector<4x64xf32>
    %304 = arith.maximumf %302, %303 : vector<4x64xf32>
    %c12_325 = arith.constant 12 : index
    %c0_326 = arith.constant 0 : index
    %305 = vector.load %arg19[%c12_325, %c0_326] : memref<16x64xf32, #tpu.memory_space<vmem>>, vector<4x64xf32>
    tpu.vector_store %arg19[%c12_325, %c0_326], %304 {strides = array<i32>} : memref<16x64xf32, #tpu.memory_space<vmem>>, vector<4x64xf32>,
    %cst_327 = arith.constant 0.000000e+00 : f32
    %306 = vector.broadcast %cst_327 : f32 to vector<2x64xf32>
    %c0_328 = arith.constant 0 : index
    %c0_329 = arith.constant 0 : index
    %307 = vector.load %arg12[%c0_328, %c0_329] : memref<1x64xf32, #tpu.memory_space<vmem>>, vector<1x64xf32>
    %308 = vector.broadcast %307 : vector<1x64xf32> to vector<2x64xf32>
    %309 = arith.addf %306, %308 : vector<2x64xf32>
    %c0_330 = arith.constant 0 : index
    %c0_331 = arith.constant 0 : index
    %310 = vector.load %arg19[%c0_330, %c0_331] : memref<16x64xf32, #tpu.memory_space<vmem>>, vector<2x64xf32>
    %c0_332 = arith.constant 0 : index
    %c0_333 = arith.constant 0 : index
    %c0_334 = arith.constant 0 : index
    %311 = vector.load %arg10[%c0_332, %c0_333, %c0_334] : memref<4x64x64xf32, #tpu.memory_space<vmem>>, vector<1x64x64xf32>
    %312 = vector.shape_cast %311 : vector<1x64x64xf32> to vector<64x64xf32>
    %cst_335 = arith.constant dense<0.000000e+00> : vector<2x64xf32>
    %313 = tpu.matmul %310, %312, %cst_335 {dimension_numbers = #tpu.dot_dimension_numbers<[1], [0], [0], [1], [0, 0, 1, 1], [], []>} : vector<2x64xf32>, vector<64x64xf32>, vector<2x64xf32> -> vector<2x64xf32>
    %314 = arith.addf %309, %313 : vector<2x64xf32>
    %c2_336 = arith.constant 2 : index
    %c0_337 = arith.constant 0 : index
    %315 = vector.load %arg19[%c2_336, %c0_337] : memref<16x64xf32, #tpu.memory_space<vmem>>, vector<2x64xf32>
    %c0_338 = arith.constant 0 : index
    %c0_339 = arith.constant 0 : index
    %c0_340 = arith.constant 0 : index
    %316 = vector.load %arg11[%c0_338, %c0_339, %c0_340] : memref<4x64x64xf32, #tpu.memory_space<vmem>>, vector<1x64x64xf32>
    %317 = vector.shape_cast %316 : vector<1x64x64xf32> to vector<64x64xf32>
    %cst_341 = arith.constant dense<0.000000e+00> : vector<2x64xf32>
    %318 = tpu.matmul %315, %317, %cst_341 {dimension_numbers = #tpu.dot_dimension_numbers<[1], [0], [0], [1], [0, 0, 1, 1], [], []>} : vector<2x64xf32>, vector<64x64xf32>, vector<2x64xf32> -> vector<2x64xf32>
    %319 = arith.addf %314, %318 : vector<2x64xf32>
    %c4_342 = arith.constant 4 : index
    %c0_343 = arith.constant 0 : index
    %320 = vector.load %arg19[%c4_342, %c0_343] : memref<16x64xf32, #tpu.memory_space<vmem>>, vector<2x64xf32>
    %c1_344 = arith.constant 1 : index
    %c0_345 = arith.constant 0 : index
    %c0_346 = arith.constant 0 : index
    %321 = vector.load %arg10[%c1_344, %c0_345, %c0_346] : memref<4x64x64xf32, #tpu.memory_space<vmem>>, vector<1x64x64xf32>
    %322 = vector.shape_cast %321 : vector<1x64x64xf32> to vector<64x64xf32>
    %cst_347 = arith.constant dense<0.000000e+00> : vector<2x64xf32>
    %323 = tpu.matmul %320, %322, %cst_347 {dimension_numbers = #tpu.dot_dimension_numbers<[1], [0], [0], [1], [0, 0, 1, 1], [], []>} : vector<2x64xf32>, vector<64x64xf32>, vector<2x64xf32> -> vector<2x64xf32>
    %324 = arith.addf %319, %323 : vector<2x64xf32>
    %c6 = arith.constant 6 : index
    %c0_348 = arith.constant 0 : index
    %325 = vector.load %arg19[%c6, %c0_348] : memref<16x64xf32, #tpu.memory_space<vmem>>, vector<2x64xf32>
    %c1_349 = arith.constant 1 : index
    %c0_350 = arith.constant 0 : index
    %c0_351 = arith.constant 0 : index
    %326 = vector.load %arg11[%c1_349, %c0_350, %c0_351] : memref<4x64x64xf32, #tpu.memory_space<vmem>>, vector<1x64x64xf32>
    %327 = vector.shape_cast %326 : vector<1x64x64xf32> to vector<64x64xf32>
    %cst_352 = arith.constant dense<0.000000e+00> : vector<2x64xf32>
    %328 = tpu.matmul %325, %327, %cst_352 {dimension_numbers = #tpu.dot_dimension_numbers<[1], [0], [0], [1], [0, 0, 1, 1], [], []>} : vector<2x64xf32>, vector<64x64xf32>, vector<2x64xf32> -> vector<2x64xf32>
    %329 = arith.addf %324, %328 : vector<2x64xf32>
    %c8_353 = arith.constant 8 : index
    %c0_354 = arith.constant 0 : index
    %330 = vector.load %arg19[%c8_353, %c0_354] : memref<16x64xf32, #tpu.memory_space<vmem>>, vector<2x64xf32>
    %c2_355 = arith.constant 2 : index
    %c0_356 = arith.constant 0 : index
    %c0_357 = arith.constant 0 : index
    %331 = vector.load %arg10[%c2_355, %c0_356, %c0_357] : memref<4x64x64xf32, #tpu.memory_space<vmem>>, vector<1x64x64xf32>
    %332 = vector.shape_cast %331 : vector<1x64x64xf32> to vector<64x64xf32>
    %cst_358 = arith.constant dense<0.000000e+00> : vector<2x64xf32>
    %333 = tpu.matmul %330, %332, %cst_358 {dimension_numbers = #tpu.dot_dimension_numbers<[1], [0], [0], [1], [0, 0, 1, 1], [], []>} : vector<2x64xf32>, vector<64x64xf32>, vector<2x64xf32> -> vector<2x64xf32>
    %334 = arith.addf %329, %333 : vector<2x64xf32>
    %c10 = arith.constant 10 : index
    %c0_359 = arith.constant 0 : index
    %335 = vector.load %arg19[%c10, %c0_359] : memref<16x64xf32, #tpu.memory_space<vmem>>, vector<2x64xf32>
    %c2_360 = arith.constant 2 : index
    %c0_361 = arith.constant 0 : index
    %c0_362 = arith.constant 0 : index
    %336 = vector.load %arg11[%c2_360, %c0_361, %c0_362] : memref<4x64x64xf32, #tpu.memory_space<vmem>>, vector<1x64x64xf32>
    %337 = vector.shape_cast %336 : vector<1x64x64xf32> to vector<64x64xf32>
    %cst_363 = arith.constant dense<0.000000e+00> : vector<2x64xf32>
    %338 = tpu.matmul %335, %337, %cst_363 {dimension_numbers = #tpu.dot_dimension_numbers<[1], [0], [0], [1], [0, 0, 1, 1], [], []>} : vector<2x64xf32>, vector<64x64xf32>, vector<2x64xf32> -> vector<2x64xf32>
    %339 = arith.addf %334, %338 : vector<2x64xf32>
    %c12_364 = arith.constant 12 : index
    %c0_365 = arith.constant 0 : index
    %340 = vector.load %arg19[%c12_364, %c0_365] : memref<16x64xf32, #tpu.memory_space<vmem>>, vector<2x64xf32>
    %c3 = arith.constant 3 : index
    %c0_366 = arith.constant 0 : index
    %c0_367 = arith.constant 0 : index
    %341 = vector.load %arg10[%c3, %c0_366, %c0_367] : memref<4x64x64xf32, #tpu.memory_space<vmem>>, vector<1x64x64xf32>
    %342 = vector.shape_cast %341 : vector<1x64x64xf32> to vector<64x64xf32>
    %cst_368 = arith.constant dense<0.000000e+00> : vector<2x64xf32>
    %343 = tpu.matmul %340, %342, %cst_368 {dimension_numbers = #tpu.dot_dimension_numbers<[1], [0], [0], [1], [0, 0, 1, 1], [], []>} : vector<2x64xf32>, vector<64x64xf32>, vector<2x64xf32> -> vector<2x64xf32>
    %344 = arith.addf %339, %343 : vector<2x64xf32>
    %c14 = arith.constant 14 : index
    %c0_369 = arith.constant 0 : index
    %345 = vector.load %arg19[%c14, %c0_369] : memref<16x64xf32, #tpu.memory_space<vmem>>, vector<2x64xf32>
    %c3_370 = arith.constant 3 : index
    %c0_371 = arith.constant 0 : index
    %c0_372 = arith.constant 0 : index
    %346 = vector.load %arg11[%c3_370, %c0_371, %c0_372] : memref<4x64x64xf32, #tpu.memory_space<vmem>>, vector<1x64x64xf32>
    %347 = vector.shape_cast %346 : vector<1x64x64xf32> to vector<64x64xf32>
    %cst_373 = arith.constant dense<0.000000e+00> : vector<2x64xf32>
    %348 = tpu.matmul %345, %347, %cst_373 {dimension_numbers = #tpu.dot_dimension_numbers<[1], [0], [0], [1], [0, 0, 1, 1], [], []>} : vector<2x64xf32>, vector<64x64xf32>, vector<2x64xf32> -> vector<2x64xf32>
    %349 = arith.addf %344, %348 : vector<2x64xf32>
    %cst_374 = arith.constant 0.000000e+00 : f32
    %350 = vector.broadcast %cst_374 : f32 to vector<2x64xf32>
    %351 = arith.maximumf %349, %350 : vector<2x64xf32>
    %c0_375 = arith.constant 0 : index
    %c0_376 = arith.constant 0 : index
    %352 = vector.load %arg13[%c0_375, %c0_376] : memref<64x8xf32, #tpu.memory_space<vmem>>, vector<64x8xf32>
    %cst_377 = arith.constant dense<0.000000e+00> : vector<2x8xf32>
    %353 = tpu.matmul %351, %352, %cst_377 {dimension_numbers = #tpu.dot_dimension_numbers<[1], [0], [0], [1], [0, 0, 1, 1], [], []>} : vector<2x64xf32>, vector<64x8xf32>, vector<2x8xf32> -> vector<2x8xf32>
    %c0_378 = arith.constant 0 : index
    %c0_379 = arith.constant 0 : index
    %354 = vector.load %arg14[%c0_378, %c0_379] : memref<1x8xf32, #tpu.memory_space<vmem>>, vector<1x8xf32>
    %355 = vector.broadcast %354 : vector<1x8xf32> to vector<2x8xf32>
    %356 = arith.addf %353, %355 : vector<2x8xf32>
    %c0_380 = arith.constant 0 : index
    %c0_381 = arith.constant 0 : index
    %357 = vector.load %arg15[%c0_380, %c0_381] : memref<2x8xf32, #tpu.memory_space<vmem>>, vector<2x8xf32>
    tpu.vector_store %arg15[%c0_380, %c0_381], %356 {strides = array<i32>} : memref<2x8xf32, #tpu.memory_space<vmem>>, vector<2x8xf32>,
    return
  }
  func.func @transform_0(%arg0: i32) -> (i32, i32) {
    %c0_i32 = arith.constant 0 : i32
    %c0_i32_0 = arith.constant 0 : i32
    %c0_i32_1 = arith.constant 0 : i32
    return %c0_i32, %c0_i32_0 : i32, i32
  }
  func.func @transform_1(%arg0: i32) -> (i32, i32, i32) {
    %c0_i32 = arith.constant 0 : i32
    %c0_i32_0 = arith.constant 0 : i32
    %c0_i32_1 = arith.constant 0 : i32
    %c0_i32_2 = arith.constant 0 : i32
    return %c0_i32, %c0_i32_0, %c0_i32_1 : i32, i32, i32
  }
  func.func @transform_2(%arg0: i32) -> (i32, i32) {
    %c0_i32 = arith.constant 0 : i32
    %c0_i32_0 = arith.constant 0 : i32
    %c0_i32_1 = arith.constant 0 : i32
    return %c0_i32, %c0_i32_0 : i32, i32
  }
  func.func @transform_3(%arg0: i32) -> (i32, i32, i32) {
    %c0_i32 = arith.constant 0 : i32
    %c0_i32_0 = arith.constant 0 : i32
    %c0_i32_1 = arith.constant 0 : i32
    %c0_i32_2 = arith.constant 0 : i32
    return %c0_i32, %c0_i32_0, %c0_i32_1 : i32, i32, i32
  }
  func.func @transform_4(%arg0: i32) -> (i32, i32) {
    %c0_i32 = arith.constant 0 : i32
    %c0_i32_0 = arith.constant 0 : i32
    %c0_i32_1 = arith.constant 0 : i32
    return %c0_i32, %c0_i32_0 : i32, i32
  }
  func.func @transform_5(%arg0: i32) -> (i32, i32, i32) {
    %c0_i32 = arith.constant 0 : i32
    %c0_i32_0 = arith.constant 0 : i32
    %c0_i32_1 = arith.constant 0 : i32
    %c0_i32_2 = arith.constant 0 : i32
    return %c0_i32, %c0_i32_0, %c0_i32_1 : i32, i32, i32
  }
  func.func @transform_6(%arg0: i32) -> (i32, i32) {
    %c0_i32 = arith.constant 0 : i32
    %c0_i32_0 = arith.constant 0 : i32
    %c0_i32_1 = arith.constant 0 : i32
    return %c0_i32, %c0_i32_0 : i32, i32
  }
  func.func @transform_7(%arg0: i32) -> (i32, i32, i32) {
    %c0_i32 = arith.constant 0 : i32
    %c0_i32_0 = arith.constant 0 : i32
    %c0_i32_1 = arith.constant 0 : i32
    %c0_i32_2 = arith.constant 0 : i32
    return %c0_i32, %c0_i32_0, %c0_i32_1 : i32, i32, i32
  }
  func.func @transform_8(%arg0: i32) -> (i32, i32) {
    %c0_i32 = arith.constant 0 : i32
    %c0_i32_0 = arith.constant 0 : i32
    %c0_i32_1 = arith.constant 0 : i32
    return %c0_i32, %c0_i32_0 : i32, i32
  }
  func.func @transform_9(%arg0: i32) -> (i32, i32, i32) {
    %c0_i32 = arith.constant 0 : i32
    %c0_i32_0 = arith.constant 0 : i32
    %c0_i32_1 = arith.constant 0 : i32
    %c0_i32_2 = arith.constant 0 : i32
    return %c0_i32, %c0_i32_0, %c0_i32_1 : i32, i32, i32
  }
  func.func @transform_10(%arg0: i32) -> (i32, i32, i32) {
    %c0_i32 = arith.constant 0 : i32
    %c0_i32_0 = arith.constant 0 : i32
    %c0_i32_1 = arith.constant 0 : i32
    %c0_i32_2 = arith.constant 0 : i32
    return %c0_i32, %c0_i32_0, %c0_i32_1 : i32, i32, i32
  }
  func.func @transform_11(%arg0: i32) -> (i32, i32) {
    %c0_i32 = arith.constant 0 : i32
    %c0_i32_0 = arith.constant 0 : i32
    %c0_i32_1 = arith.constant 0 : i32
    return %c0_i32, %c0_i32_0 : i32, i32
  }
  func.func @transform_12(%arg0: i32) -> (i32, i32) {
    %c0_i32 = arith.constant 0 : i32
    %c0_i32_0 = arith.constant 0 : i32
    %c0_i32_1 = arith.constant 0 : i32
    return %c0_i32, %c0_i32_0 : i32, i32
  }
  func.func @transform_13(%arg0: i32) -> (i32, i32) {
    %c0_i32 = arith.constant 0 : i32
    %c0_i32_0 = arith.constant 0 : i32
    %c0_i32_1 = arith.constant 0 : i32
    return %c0_i32, %c0_i32_0 : i32, i32
  }
  func.func @transform_14(%arg0: i32) -> (i32, i32) {
    %c0_i32 = arith.constant 0 : i32
    %c0_i32_0 = arith.constant 0 : i32
    %c0_i32_1 = arith.constant 0 : i32
    return %c0_i32, %c0_i32_0 : i32, i32
  }
}

</mosaic_0001>

<bundles_post_ra>
// kernel: relative_patch_location_forward.1
= control target key start
LH: loop header
LB: loop body
LE: loop exit
PB: predicated region body
PF: predicated region fallthrough
CT: control target
= control target key end

     0   :  { %vm72_vm0 = vcmask 523264   ;;  %s10263_s0 = inlined_call_operand.vmem [shape: f32[64,64], index: 0, kind: input, shape index: {}]   ;;  %s10264_s1 = inlined_call_operand.vmem [shape: f32[3,64,128], index: 1, kind: input, shape index: {}]   ;;  %s10265_s2 = inlined_call_operand.vmem [shape: f32[1,128], index: 2, kind: input, shape index: {}]   ;;  %s10266_s3 = inlined_call_operand.vmem [shape: f32[3,128,64], index: 3, kind: input, shape index: {}]   ;;  %s10267_s4 = inlined_call_operand.vmem [shape: f32[1,64], index: 4, kind: input, shape index: {}]   ;;  %s10268_s5 = inlined_call_operand.vmem [shape: f32[3,64,128], index: 5, kind: input, shape index: {}]   ;;  %s10269_s6 = inlined_call_operand.vmem [shape: f32[1,128], index: 6, kind: input, shape index: {}]   ;;  %s10270_s7 = inlined_call_operand.vmem [shape: f32[3,128,64], index: 7, kind: input, shape index: {}]   ;;  %s10271_s8 = inlined_call_operand.vmem [shape: f32[1,64], index: 8, kind: input, shape index: {}]   ;;  %s10272_s9 = inlined_call_operand.vmem [shape: f32[4,64,64], index: 9, kind: input, shape index: {}]   ;;  %s10273_s10 = inlined_call_operand.vmem [shape: f32[4,64,64], index: 10, kind: input, shape index: {}]   ;;  %s10274_s11 = inlined_call_operand.vmem [shape: f32[1,64], index: 11, kind: input, shape index: {}]   ;;  %s10275_s12 = inlined_call_operand.vmem [shape: f32[64,8], index: 12, kind: input, shape index: {}]   ;;  %s10276_s13 = inlined_call_operand.vmem [shape: f32[1,8], index: 13, kind: input, shape index: {}]   ;;  %s10277_s14 = inlined_call_operand.hbm [shape: f32[2,8], index: 14, kind: output, shape index: {}]  }
   0x1   :  { %v4856_v0 = vld [vmem:[%s10264_s1 + $0x78] sm:$0xff]  ;;  %v4855_v1 = vld [vmem:[%s10264_s1 + $0x70] sm:$0xff]  ;;  %v4854_v3 = vld [vmem:[%s10264_s1 + $0x68] sm:$0xff] }
   0x2   :  { %6117 = vmatprep.subr.mxu0 %v4856_v0  ;;  %v233_v2 = vld [vmem:[%s10264_s1 + $0x38] sm:$0xff]  ;;  %v232_v4 = vld [vmem:[%s10264_s1 + $0x30] sm:$0xff]  ;;  %v231_v5 = vld [vmem:[%s10264_s1 + $0x28] sm:$0xff] }
   0x3   :  { %6118 = vmatpush3.msra.mxu0 %v4856_v0  ;;  %6145 = vmatprep.subr.mxu1 %v233_v2  ;;  %v4853_v6 = vld [vmem:[%s10264_s1 + $0x60] sm:$0xff]  ;;  %v4852_v8 = vld [vmem:[%s10264_s1 + $0x58] sm:$0xff]  ;;  %v4851_v10 = vld [vmem:[%s10264_s1 + $0x50] sm:$0xff] }
   0x4   :  { %6119 = vmatprep.subr.mxu0 %v4855_v1  ;;  %6146 = vmatpush3.msra.mxu1 %v233_v2  ;;  %v230_v7 = vld [vmem:[%s10264_s1 + $0x20] sm:$0xff]  ;;  %v229_v11 = vld [vmem:[%s10264_s1 + $0x18] sm:$0xff]  ;;  %v4850_v12 = vld [vmem:[%s10264_s1 + $0x48] sm:$0xff] }
   0x5   :  { %6120 = vmatpush3.msra.mxu0 %v4855_v1  ;;  %6147 = vmatprep.subr.mxu1 %v232_v4  ;;  %v48_v9 = vld [vmem:[%s10263_s0] sm:$0xff]  ;;  %v228_v13 = vld [vmem:[%s10264_s1 + $0x10] sm:$0xff]  ;;  %v227_v15 = vld [vmem:[%s10264_s1 + $0x8] sm:$0xff] }
   0x6   :  { %6121 = vmatprep.subr.mxu0 %v4854_v3  ;;  %6148 = vmatpush3.msra.mxu1 %v232_v4  ;;  %v4849_v14 = vld [vmem:[%s10264_s1 + $0x40] sm:$0xff] }
   0x7   :  { %6122 = vmatpush3.msra.mxu0 %v4854_v3  ;;  %6149 = vmatprep.subr.mxu1 %v231_v5 }
   0x8   :  { %6123 = vmatprep.subr.mxu0 %v4853_v6  ;;  %6150 = vmatpush3.msra.mxu1 %v231_v5 }
   0x9   :  { %6124 = vmatpush3.msra.mxu0 %v4853_v6  ;;  %6151 = vmatprep.subr.mxu1 %v230_v7 }
   0xa   :  { %6125 = vmatprep.subr.mxu0 %v4852_v8  ;;  %6133 = vmatprep.mubr.msk.f32.mxu0 %vm72_vm0, %v48_v9 }
   0xb   :  { %6126 = vmatpush3.msra.mxu0 %v4852_v8  ;;  %6152 = vmatpush3.msra.mxu1 %v230_v7 }
   0xc   :  { %6127 = vmatprep.subr.mxu0 %v4851_v10  ;;  %6153 = vmatprep.subr.mxu1 %v229_v11 }
   0xd   :  { %6128 = vmatpush3.msra.mxu0 %v4851_v10  ;;  %6154 = vmatpush3.msra.mxu1 %v229_v11 }
   0xe   :  { %6129 = vmatprep.subr.mxu0 %v4850_v12  ;;  %6155 = vmatprep.subr.mxu1 %v228_v13 }
   0xf   :  { %19 = vsyncpa [#allocation7], 0  ;;  %6130 = vmatpush3.msra.mxu0 %v4850_v12  ;;  %v49_v16 = vld [vmem:[%s10263_s0 + $0x8] sm:$0xff]  ;;  %v4881_v17 = vld [vmem:[%s10264_s1 + $0xb8] sm:$0xff]  ;;  %6156 = vmatpush3.msra.mxu1 %v228_v13  ;;  %v7653_v41 = vmov 0.0   ;;  %vm7654_vm1 = vmmov 0  }
  0x10   :  { %6131 = vmatprep.subr.mxu0 %v4849_v14  ;;  %v50_v18 = vld [vmem:[%s10263_s0 + $0x10] sm:$0xff]  ;;  %6157 = vmatprep.subr.mxu1 %v227_v15  ;;  %v226_v20 = vld [vmem:[%s10264_s1] sm:$0xff]  ;;  %v51_v21 = vld [vmem:[%s10263_s0 + $0x18] sm:$0xff]  ;;  %vm760_vm2 = vcmask 519168   ;;  %s7655_s24 = smov [#allocation6]   ;;  %vm4833_vm3 = vcmask 58368  }
  0x11   :  { %6132 = vmatpush3.msra.mxu0 %v4849_v14  ;;  %v4880_v19 = vld [vmem:[%s10264_s1 + $0xb0] sm:$0xff]  ;;  %6158 = vmatpush3.msra.mxu1 %v227_v15  ;;  %v4879_v22 = vld [vmem:[%s10264_s1 + $0xa8] sm:$0xff]  ;;  %v52_v23 = vld [vmem:[%s10263_s0 + $0x20] sm:$0xff] }
  0x12   :  { %6134 = vmatmul.mubr.msk.f32.vlgmr.msra.gmra.mxu0 %vm72_vm0, %v49_v16  ;;  %6173 = vmatprep.subr.mxu0 %v4881_v17  ;;  %v4878_v24 = vld [vmem:[%s10264_s1 + $0xa0] sm:$0xff]  ;;  %v53_v25 = vld [vmem:[%s10263_s0 + $0x28] sm:$0xff]  ;;  %v54_v26 = vld [vmem:[%s10263_s0 + $0x30] sm:$0xff] }
  0x13   :  { %6136 = vmatprep.mubr.msk.f32.mxu0 %vm72_vm0, %v50_v18  ;;  %6174 = vmatpush3.msra.mxu0 %v4881_v17  ;;  %v4877_v27 = vld [vmem:[%s10264_s1 + $0x98] sm:$0xff]  ;;  %v4876_v29 = vld [vmem:[%s10264_s1 + $0x90] sm:$0xff]  ;;  %v387_v30 = vld [vmem:[%s10263_s0 + $0x4] sm:$0xff] }
  0x14   :  { %6175 = vmatprep.subr.mxu0 %v4880_v19  ;;  %6159 = vmatprep.subr.mxu1 %v226_v20  ;;  %v55_v28 = vld [vmem:[%s10263_s0 + $0x38] sm:$0xff]  ;;  %v4875_v31 = vld [vmem:[%s10264_s1 + $0x88] sm:$0xff]  ;;  %v4874_v32 = vld [vmem:[%s10264_s1 + $0x80] sm:$0xff] }
  0x15   :  { %6176 = vmatpush3.msra.mxu0 %v4880_v19  ;;  %6160 = vmatpush3.msra.mxu1 %v226_v20  ;;  %v388_v33 = vld [vmem:[%s10263_s0 + $0xc] sm:$0xff]  ;;  %v225_v34 = vld [vmem:[%s10263_s0 + $0x38] sm:$0xf]  ;;  %v390_v36 = vld [vmem:[%s10263_s0 + $0x1c] sm:$0xff] }
  0x16   :  { %6137 = vmatmul.mubr.msk.f32.gmra.mxu0 %vm72_vm0, %v51_v21  ;;  %6177 = vmatprep.subr.mxu0 %v4879_v22  ;;  %v389_v35 = vld [vmem:[%s10263_s0 + $0x14] sm:$0xff]  ;;  %v391_v37 = vld [vmem:[%s10263_s0 + $0x24] sm:$0xff]  ;;  %v392_v38 = vld [vmem:[%s10263_s0 + $0x2c] sm:$0xff] }
  0x17   :  { %6139 = vmatprep.mubr.msk.f32.mxu0 %vm72_vm0, %v52_v23  ;;  %6161 = vmatprep.mubr.msk.f32.mxu1 %vm72_vm0, %v48_v9  ;;  %v393_v39 = vld [vmem:[%s10263_s0 + $0x34] sm:$0xff]  ;;  %v394_v40 = vld [vmem:[%s10263_s0 + $0x3c] sm:$0xf]  ;;  %v7911_v46 = vld [vmem:[%s10266_s3 + $0xe8] sm:$0xff] }
  0x18   :  { %6178 = vmatpush3.msra.mxu0 %v4879_v22  ;;  %6162 = vmatmul.mubr.msk.f32.vlgmr.msra.gmra.mxu1 %vm72_vm0, %v49_v16  ;;  %v7883_v42 = vld [vmem:[%s10266_s3 + $0xf8] sm:$0xff]  ;;  %v7897_v44 = vld [vmem:[%s10266_s3 + $0xf0] sm:$0xff]  ;;  %v7916_v47 = vld [vmem:[%s10266_s3 + $0x168] sm:$0xff] }
  0x19   :  { %6179 = vmatprep.subr.mxu0 %v4878_v24  ;;  %6164 = vmatprep.mubr.msk.f32.mxu1 %vm72_vm0, %v50_v18  ;;  %v7888_v43 = vld [vmem:[%s10266_s3 + $0x178] sm:$0xff]  ;;  %v7902_v45 = vld [vmem:[%s10266_s3 + $0x170] sm:$0xff]  ;;  %v7925_v48 = vld [vmem:[%s10266_s3 + $0xe0] sm:$0xff] }
  0x1a   :  { %6140 = vmatmul.mubr.msk.f32.gmra.mxu0 %vm72_vm0, %v53_v25  ;;  %6201 = vmatprep.subr.mxu1 %v7653_v41  ;;  %v7930_v49 = vld [vmem:[%s10266_s3 + $0x160] sm:$0xff]  ;;  %v7939_v50 = vld [vmem:[%s10266_s3 + $0xd8] sm:$0xff]  ;;  %v7953_v52 = vld [vmem:[%s10266_s3 + $0xd0] sm:$0xff] }
  0x1b   :  { %6180 = vmatpush3.msra.mxu0 %v4878_v24  ;;  %6142 = vmatprep.mubr.msk.f32.mxu0 %vm72_vm0, %v54_v26  ;;  %v7944_v51 = vld [vmem:[%s10266_s3 + $0x158] sm:$0xff]  ;;  %v7958_v53 = vld [vmem:[%s10266_s3 + $0x150] sm:$0xff]  ;;  %v7967_v54 = vld [vmem:[%s10266_s3 + $0xc8] sm:$0xff] }
  0x1c   :  { %6181 = vmatprep.subr.mxu0 %v4877_v27  ;;  %6165 = vmatmul.mubr.msk.f32.gmra.mxu1 %vm72_vm0, %v51_v21  ;;  %v7972_v55 = vld [vmem:[%s10266_s3 + $0x148] sm:$0xff]  ;;  %v7981_v56 = vld [vmem:[%s10266_s3 + $0xc0] sm:$0xff]  ;;  %v7995_v58 = vld [vmem:[%s10266_s3 + $0xb8] sm:$0xff] }
  0x1d   :  { %6182 = vmatpush3.msra.mxu0 %v4877_v27  ;;  %6167 = vmatprep.mubr.msk.f32.mxu1 %vm72_vm0, %v52_v23  ;;  %v7986_v57 = vld [vmem:[%s10266_s3 + $0x140] sm:$0xff]  ;;  %v8000_v59 = vld [vmem:[%s10266_s3 + $0x138] sm:$0xff]  ;;  %v8009_v60 = vld [vmem:[%s10266_s3 + $0xb0] sm:$0xff] }
  0x1e   :  { %6143 = vmatmul.mubr.msk.f32.gmra.mxu0 %vm72_vm0, %v55_v28  ;;  %6183 = vmatprep.subr.mxu0 %v4876_v29  ;;  %v8014_v61 = vld [vmem:[%s10266_s3 + $0x130] sm:$0xff]  ;;  %v8023_v62 = vld [vmem:[%s10266_s3 + $0xa8] sm:$0xff]  ;;  %v8037_v0 = vld [vmem:[%s10266_s3 + $0xa0] sm:$0xff] }
  0x1f   :  { %6184 = vmatpush3.msra.mxu0 %v4876_v29  ;;  %6189 = vmatprep.mubr.msk.f32.mxu0 %vm72_vm0, %v387_v30  ;;  %v8028_v63 = vld [vmem:[%s10266_s3 + $0x128] sm:$0xff]  ;;  %v8042_v1 = vld [vmem:[%s10266_s3 + $0x120] sm:$0xff]  ;;  %v8051_v2 = vld [vmem:[%s10266_s3 + $0x98] sm:$0xff] }
  0x20   :  { %6185 = vmatprep.subr.mxu0 %v4875_v31  ;;  %6168 = vmatmul.mubr.msk.f32.gmra.mxu1 %vm72_vm0, %v53_v25  ;;  %v8056_v3 = vld [vmem:[%s10266_s3 + $0x118] sm:$0xff]  ;;  %v8065_v4 = vld [vmem:[%s10266_s3 + $0x90] sm:$0xff]  ;;  %v8079_v6 = vld [vmem:[%s10266_s3 + $0x88] sm:$0xff] }
  0x21   :  { %6186 = vmatpush3.msra.mxu0 %v4875_v31  ;;  %6170 = vmatprep.mubr.msk.f32.mxu1 %vm72_vm0, %v54_v26  ;;  %v8070_v5 = vld [vmem:[%s10266_s3 + $0x110] sm:$0xff]  ;;  %v8084_v7 = vld [vmem:[%s10266_s3 + $0x108] sm:$0xff]  ;;  %v8093_v8 = vld [vmem:[%s10266_s3 + $0x80] sm:$0xff] }
  0x22   :  { %6187 = vmatprep.subr.mxu0 %v4874_v32  ;;  %6202 = vmatpush3.msra.mxu1 %v7883_v42  ;;  %v8098_v9 = vld [vmem:[%s10266_s3 + $0x100] sm:$0xff] }
  0x23   :  { %6188 = vmatpush3.msra.mxu0 %v4874_v32  ;;  %6203 = vmatprep.subr.mxu1 %v7653_v41  ;;  %v4857_v10 = vld [vmem:[%s10265_s2] ss:$0 sm:$0xff] }
  0x24   :  { %6190 = vmatmul.mubr.msk.f32.vlgmr.msra.gmra.mxu0 %vm72_vm0, %v388_v33  ;;  %6171 = vmatmul.mubr.msk.f32.gmra.mxu1 %vm72_vm0, %v225_v34 }
  0x25   :  { %6192 = vmatprep.mubr.msk.f32.mxu0 %vm72_vm0, %v389_v35  ;;  %6236 = vmatprep.subr.mxu0 %v7653_v41 }
  0x26   :  { %6237 = vmatpush3.msra.mxu0 %v7888_v43  ;;  %6204 = vmatpush3.msra.mxu1 %v7897_v44 }
  0x27   :  { %6238 = vmatprep.subr.mxu0 %v7653_v41  ;;  %6205 = vmatprep.subr.mxu1 %v7653_v41 }
  0x28   :  { %6193 = vmatmul.mubr.msk.f32.gmra.mxu0 %vm72_vm0, %v390_v36  ;;  %6206 = vmatpush3.msra.mxu1 %v7911_v46 }
  0x29   :  { %6195 = vmatprep.mubr.msk.f32.mxu0 %vm72_vm0, %v391_v37  ;;  %6239 = vmatpush3.msra.mxu0 %v7902_v45 }
  0x2a   :  { %6240 = vmatprep.subr.mxu0 %v7653_v41  ;;  %6207 = vmatprep.subr.mxu1 %v7653_v41 }
  0x2b   :  { %6241 = vmatpush3.msra.mxu0 %v7916_v47  ;;  %6208 = vmatpush3.msra.mxu1 %v7925_v48 }
  0x2c   :  { %6196 = vmatmul.mubr.msk.f32.gmra.mxu0 %vm72_vm0, %v392_v38  ;;  %6242 = vmatprep.subr.mxu0 %v7653_v41 }
  0x2d   :  { %6198 = vmatprep.mubr.msk.f32.mxu0 %vm72_vm0, %v393_v39  ;;  %6243 = vmatpush3.msra.mxu0 %v7930_v49 }
  0x2e   :  { %6209 = vmatprep.subr.mxu1 %v7653_v41  ;;  %6244 = vmatprep.subr.mxu0 %v7653_v41 }
  0x2f   :  { %6210 = vmatpush3.msra.mxu1 %v7939_v50  ;;  %6245 = vmatpush3.msra.mxu0 %v7944_v51 }
  0x30   :  { %6199 = vmatmul.mubr.msk.f32.gmra.mxu0 %vm72_vm0, %v394_v40  ;;  %6211 = vmatprep.subr.mxu1 %v7653_v41 }
  0x31   :  { %6246 = vmatprep.subr.mxu0 %v7653_v41  ;;  %6212 = vmatpush3.msra.mxu1 %v7953_v52 }
  0x32   :  { %6247 = vmatpush3.msra.mxu0 %v7958_v53  ;;  %6213 = vmatprep.subr.mxu1 %v7653_v41 }
  0x33   :  { %6248 = vmatprep.subr.mxu0 %v7653_v41  ;;  %6214 = vmatpush3.msra.mxu1 %v7967_v54 }
  0x34   :  { %6249 = vmatpush3.msra.mxu0 %v7972_v55  ;;  %6215 = vmatprep.subr.mxu1 %v7653_v41 }
  0x35   :  { %6250 = vmatprep.subr.mxu0 %v7653_v41  ;;  %6216 = vmatpush3.msra.mxu1 %v7981_v56 }
  0x36   :  { %6251 = vmatpush3.msra.mxu0 %v7986_v57  ;;  %6217 = vmatprep.subr.mxu1 %v7653_v41 }
  0x37   :  { %6252 = vmatprep.subr.mxu0 %v7653_v41  ;;  %6218 = vmatpush3.msra.mxu1 %v7995_v58 }
  0x38   :  { %6253 = vmatpush3.msra.mxu0 %v8000_v59  ;;  %6219 = vmatprep.subr.mxu1 %v7653_v41 }
  0x39   :  { %6254 = vmatprep.subr.mxu0 %v7653_v41  ;;  %6220 = vmatpush3.msra.mxu1 %v8009_v60 }
  0x3a   :  { %6255 = vmatpush3.msra.mxu0 %v8014_v61  ;;  %6221 = vmatprep.subr.mxu1 %v7653_v41 }
  0x3b   :  { %6256 = vmatprep.subr.mxu0 %v7653_v41  ;;  %6222 = vmatpush3.msra.mxu1 %v8023_v62 }
  0x3c   :  { %6257 = vmatpush3.msra.mxu0 %v8028_v63  ;;  %6223 = vmatprep.subr.mxu1 %v7653_v41 }
  0x3d   :  { %6258 = vmatprep.subr.mxu0 %v7653_v41  ;;  %6224 = vmatpush3.msra.mxu1 %v8037_v0 }
  0x3e   :  { %6259 = vmatpush3.msra.mxu0 %v8042_v1  ;;  %6225 = vmatprep.subr.mxu1 %v7653_v41 }
  0x3f   :  { %6260 = vmatprep.subr.mxu0 %v7653_v41  ;;  %6226 = vmatpush3.msra.mxu1 %v8051_v2 }
  0x40   :  { %6261 = vmatpush3.msra.mxu0 %v8056_v3  ;;  %6227 = vmatprep.subr.mxu1 %v7653_v41 }
  0x41   :  { %6262 = vmatprep.subr.mxu0 %v7653_v41  ;;  %6228 = vmatpush3.msra.mxu1 %v8065_v4 }
  0x42   :  { %6263 = vmatpush3.msra.mxu0 %v8070_v5  ;;  %6229 = vmatprep.subr.mxu1 %v7653_v41 }
  0x43   :  { %6264 = vmatprep.subr.mxu0 %v7653_v41  ;;  %6230 = vmatpush3.msra.mxu1 %v8079_v6 }
  0x44   :  { %6265 = vmatpush3.msra.mxu0 %v8084_v7  ;;  %6231 = vmatprep.subr.mxu1 %v7653_v41 }
  0x45   :  { %6266 = vmatprep.subr.mxu0 %v7653_v41  ;;  %6232 = vmatpush3.msra.mxu1 %v8093_v8 }
  0x46   :  { %6267 = vmatpush3.msra.mxu0 %v8098_v9  ;;  %6233 = vmatprep.mubr.msk.f32.mxu1 %vm7654_vm1, %v7653_v41 }
  0x47   :  { %6268 = vmatprep.mubr.msk.f32.mxu0 %vm7654_vm1, %v7653_v41  ;;  %6271 = vmatprep.subr.mxu1 %v7653_v41 }
  0x48   :  { %6306 = vmatprep.subr.mxu0 %v7653_v41 }
  0xd2   :  { %v6135_v11 = vpop.f32.mrf.mxu0 }
  0xd3   :  { %v169_v12 = vadd.f32 %v6135_v11, %v4857_v10 }
  0xd4   :  { %v163_v13 = vpop.f32.mrf.mxu0 }
  0xd5   :  { %203 = vst [vmem:[#allocation2 + $0x8] sm:$0xff] %v169_v12  ;;  %v164_v14 = vadd.f32 %v4857_v10, %v163_v13 }
  0xd6   :  { %v6138_v15 = vpop.f32.mrf.mxu0 }
  0xd7   :  { %202 = vst [vmem:[#allocation2] sm:$0xff] %v164_v14  ;;  %v179_v16 = vadd.f32 %v6138_v15, %v4857_v10 }
  0xd8   :  { %v173_v17 = vpop.f32.mrf.mxu0  ;;  %v6163_v18 = vpop.f32.mrf.mxu1 }
  0xd9   :  { %205 = vst [vmem:[#allocation2 + $0x18] sm:$0xff] %v179_v16  ;;  %v174_v19 = vadd.f32 %v4857_v10, %v173_v17 }
  0xda   :  { %v6141_v20 = vpop.f32.mrf.mxu0  ;;  %v324_v21 = vpop.f32.mrf.mxu1 }
  0xdb   :  { %204 = vst [vmem:[#allocation2 + $0x10] sm:$0xff] %v174_v19  ;;  %v189_v22 = vadd.f32 %v6141_v20, %v4857_v10 }
  0xdc   :  { %v183_v23 = vpop.f32.mrf.mxu0  ;;  %v6166_v24 = vpop.f32.mrf.mxu1 }
  0xdd   :  { %207 = vst [vmem:[#allocation2 + $0x28] sm:$0xff] %v189_v22  ;;  %v184_v25 = vadd.f32 %v4857_v10, %v183_v23 }
  0xde   :  { %v210_v26 = vld [vmem:[#allocation2 + $0x4] sm:$0xff]  ;;  %v6144_v27 = vpop.f32.mrf.mxu0  ;;  %v334_v28 = vpop.f32.mrf.mxu1 }
  0xdf   :  { %206 = vst [vmem:[#allocation2 + $0x20] sm:$0xff] %v184_v25  ;;  %v363_v29 = vadd.f32 %v324_v21, %v210_v26  ;;  %v199_v30 = vadd.f32 %v6144_v27, %v4857_v10 }
  0xe0   :  { %v193_v31 = vpop.f32.mrf.mxu0  ;;  %v6169_v32 = vpop.f32.mrf.mxu1 }
  0xe1   :  { %371 = vst [vmem:[#allocation2 + $0x4] sm:$0xff] %v363_v29  ;;  %209 = vst [vmem:[#allocation2 + $0x38] sm:$0xff] %v199_v30  ;;  %v194_v33 = vadd.f32 %v4857_v10, %v193_v31 }
  0xe2   :  { %v211_v34 = vld [vmem:[#allocation2 + $0xc] sm:$0xff]  ;;  %v212_v35 = vld [vmem:[#allocation2 + $0x14] sm:$0xff]  ;;  %v344_v36 = vpop.f32.mrf.mxu1 }
  0xe3   :  { %v364_v37 = vadd.f32 %v6163_v18, %v211_v34  ;;  %208 = vst [vmem:[#allocation2 + $0x30] sm:$0xff] %v194_v33  ;;  %v365_v38 = vadd.f32 %v334_v28, %v212_v35 }
  0xe4   :  { %v6191_v39 = vpop.f32.mrf.mxu0  ;;  %v6172_v40 = vpop.f32.mrf.mxu1 }
  0xe5   :  { %372 = vst [vmem:[#allocation2 + $0xc] sm:$0xff] %v364_v37  ;;  %373 = vst [vmem:[#allocation2 + $0x14] sm:$0xff] %v365_v38 }
  0xe6   :  { %v213_v11 = vld [vmem:[#allocation2 + $0x1c] sm:$0xff]  ;;  %v214_v12 = vld [vmem:[#allocation2 + $0x24] sm:$0xff]  ;;  %v494_v13 = vpop.f32.mrf.mxu0  ;;  %v354_v19 = vpop.f32.mrf.mxu1 }
  0xe7   :  { %v366_v14 = vadd.f32 %v6166_v24, %v213_v11  ;;  %v367_v15 = vadd.f32 %v344_v36, %v214_v12 }
  0xe8   :  { %v379_v16 = vld [vmem:[#allocation2] sm:$0xff]  ;;  %v217_v17 = vld [vmem:[#allocation2 + $0x3c] sm:$0xf]  ;;  %v6194_v20 = vpop.f32.mrf.mxu0 }
  0xe9   :  { %374 = vst [vmem:[#allocation2 + $0x1c] sm:$0xff] %v366_v14  ;;  %375 = vst [vmem:[#allocation2 + $0x24] sm:$0xff] %v367_v15  ;;  %v533_v10 = vadd.f32 %v494_v13, %v379_v16  ;;  %v370_v21 = vadd.f32 %v6172_v40, %v217_v17 }
  0xea   :  { %v215_v18 = vld [vmem:[#allocation2 + $0x2c] sm:$0xff]  ;;  %v216_v22 = vld [vmem:[#allocation2 + $0x34] sm:$0xff]  ;;  %v504_v23 = vpop.f32.mrf.mxu0 }
  0xeb   :  { %v368_v25 = vadd.f32 %v6169_v32, %v215_v18  ;;  %v557_v26 = vmax.f32 %v533_v10, 0.0  ;;  %378 = vst [vmem:[#allocation2 + $0x3c] sm:$0xf] %v370_v21  ;;  %v369_v27 = vadd.f32 %v354_v19, %v216_v22  ;;  %v8119_v18 = vld [vmem:[%s10266_s3 + $0x70] sm:$0xff] }
  0xec   :  { %v380_v28 = vld [vmem:[#allocation2 + $0x8] sm:$0xff]  ;;  %v381_v29 = vld [vmem:[#allocation2 + $0x10] sm:$0xff]  ;;  %v6197_v30 = vpop.f32.mrf.mxu0 }
  0xed   :  { %376 = vst [vmem:[#allocation2 + $0x2c] sm:$0xff] %v368_v25  ;;  %v534_v24 = vadd.f32 %v6191_v39, %v380_v28  ;;  %565 = vst [vmem:[#allocation2] sm:$0xff] %v557_v26  ;;  %v535_v31 = vadd.f32 %v504_v23, %v381_v29  ;;  %v8114_v39 = vld [vmem:[%s10266_s3 + $0x78] sm:$0xff]  ;;  %v8128_v25 = vld [vmem:[%s10266_s3 + $0x68] sm:$0xff] }
  0xee   :  { %377 = vst [vmem:[#allocation2 + $0x34] sm:$0xff] %v369_v27  ;;  %v514_v33 = vpop.f32.mrf.mxu0  ;;  %v8137_v26 = vld [vmem:[%s10266_s3 + $0x60] sm:$0xff]  ;;  %v8146_v27 = vld [vmem:[%s10266_s3 + $0x58] sm:$0xff]  ;;  %v8155_v29 = vld [vmem:[%s10266_s3 + $0x50] sm:$0xff] }
  0xef   :  { %v558_v34 = vmax.f32 %v534_v24, 0.0  ;;  %v559_v35 = vmax.f32 %v535_v31, 0.0  ;;  %v8164_v24 = vld [vmem:[%s10266_s3 + $0x48] sm:$0xff]  ;;  %v8173_v31 = vld [vmem:[%s10266_s3 + $0x40] sm:$0xff] }
  0xf0   :  { %v382_v36 = vld [vmem:[#allocation2 + $0x18] sm:$0xff]  ;;  %v383_v37 = vld [vmem:[#allocation2 + $0x20] sm:$0xff]  ;;  %v6200_v38 = vpop.f32.mrf.mxu0 }
  0xf1   :  { %566 = vst [vmem:[#allocation2 + $0x8] sm:$0xff] %v558_v34  ;;  %v536_v40 = vadd.f32 %v6194_v20, %v382_v36  ;;  %567 = vst [vmem:[#allocation2 + $0x10] sm:$0xff] %v559_v35  ;;  %v537_v32 = vadd.f32 %v514_v33, %v383_v37  ;;  %v8182_v33 = vld [vmem:[%s10266_s3 + $0x38] sm:$0xff]  ;;  %v8191_v34 = vld [vmem:[%s10266_s3 + $0x30] sm:$0xff] }
  0xf2   :  { %v524_v11 = vpop.f32.mrf.mxu0  ;;  %v8200_v35 = vld [vmem:[%s10266_s3 + $0x28] sm:$0xff]  ;;  %v8209_v36 = vld [vmem:[%s10266_s3 + $0x20] sm:$0xff]  ;;  %v8218_v37 = vld [vmem:[%s10266_s3 + $0x18] sm:$0xff] }
  0xf3   :  { %v560_v12 = vmax.f32 %v536_v40, 0.0  ;;  %v561_v13 = vmax.f32 %v537_v32, 0.0  ;;  %v8236_v40 = vld [vmem:[%s10266_s3 + $0x8] sm:$0xff]  ;;  %v8245_v32 = vld [vmem:[%s10266_s3] sm:$0xff] }
  0xf4   :  { %v384_v14 = vld [vmem:[#allocation2 + $0x28] sm:$0xff]  ;;  %v581_v21 = vld [vmem:[#allocation2] sm:$0xf]  ;;  %v670_v20 = vld [vmem:[#allocation2 + $0x4] sm:$0xf] }
  0xf5   :  { %v386_v15 = vld [vmem:[#allocation2 + $0x38] sm:$0xf]  ;;  %v385_v16 = vld [vmem:[#allocation2 + $0x30] sm:$0xff]  ;;  %568 = vst [vmem:[#allocation2 + $0x18] sm:$0xff] %v560_v12  ;;  %v538_v17 = vadd.f32 %v6197_v30, %v384_v14  ;;  %569 = vst [vmem:[#allocation2 + $0x20] sm:$0xff] %v561_v13  ;;  %6234 = vmatmul.mubr.f32.vlgmr.msra.gmra.mxu1 %v581_v21  ;;  %6269 = vmatmul.mubr.f32.vlgmr.msra.gmra.mxu0 %v670_v20 }
  0xf6   :  { %v540_v19 = vadd.f32 %v6200_v38, %v386_v15  ;;  %v539_v10 = vadd.f32 %v524_v11, %v385_v16  ;;  %6272 = vmatpush3.msra.mxu1 %v8114_v39  ;;  %6307 = vmatpush3.msra.mxu0 %v7883_v42  ;;  %v8227_v38 = vld [vmem:[%s10266_s3 + $0x10] sm:$0xff]  ;;  %v770_v11 = vld [vmem:[#allocation2 + $0x4] sm:$0xf] }
  0xf7   :  { %v562_v22 = vmax.f32 %v538_v17, 0.0  ;;  %6273 = vmatprep.subr.mxu1 %v7653_v41  ;;  %6308 = vmatprep.subr.mxu0 %v7653_v41 }
  0xf8   :  { %548 = vst [vmem:[#allocation2 + $0x38] sm:$0xf] %v540_v19  ;;  %v563_v23 = vmax.f32 %v539_v10, 0.0  ;;  %6274 = vmatpush3.msra.mxu1 %v8119_v18  ;;  %6309 = vmatpush3.msra.mxu0 %v7897_v44  ;;  %v858_v12 = vld [vmem:[#allocation2 + $0x8] sm:$0xf]  ;;  %v8718_v19 = vld [vmem:[%s10266_s3 + $0x90] sm:$0xff] }
  0xf9   :  { %570 = vst [vmem:[#allocation2 + $0x28] sm:$0xff] %v562_v22  ;;  %6275 = vmatprep.subr.mxu1 %v7653_v41  ;;  %6310 = vmatprep.subr.mxu0 %v7653_v41  ;;  %v946_v13 = vld [vmem:[#allocation2 + $0xc] sm:$0xf]  ;;  %v8723_v10 = vld [vmem:[%s10266_s3 + $0x110] sm:$0xff] }
  0xfa   :  { %571 = vst [vmem:[#allocation2 + $0x30] sm:$0xff] %v563_v23  ;;  %6276 = vmatpush3.msra.mxu1 %v8128_v25  ;;  %6311 = vmatpush3.msra.mxu0 %v7911_v46  ;;  %v1044_v14 = vld [vmem:[#allocation2 + $0xc] sm:$0xf] }
  0xfb   :  { %6277 = vmatprep.subr.mxu1 %v7653_v41  ;;  %6312 = vmatprep.subr.mxu0 %v7653_v41  ;;  %v8732_v22 = vld [vmem:[%s10266_s3 + $0x88] sm:$0xff] }
  0xfc   :  { %6278 = vmatpush3.msra.mxu1 %v8137_v26  ;;  %6313 = vmatpush3.msra.mxu0 %v7925_v48  ;;  %v8737_v23 = vld [vmem:[%s10266_s3 + $0x108] sm:$0xff] }
  0xfd   :  { %6279 = vmatprep.subr.mxu1 %v7653_v41  ;;  %6314 = vmatprep.subr.mxu0 %v7653_v41 }
  0xfe   :  { %6280 = vmatpush3.msra.mxu1 %v8146_v27  ;;  %6315 = vmatpush3.msra.mxu0 %v7939_v50 }
  0xff   :  { %v556_v28 = vld [vmem:[#allocation2 + $0x38] sm:$0xff]  ;;  %6281 = vmatprep.subr.mxu1 %v7653_v41  ;;  %6316 = vmatprep.subr.mxu0 %v7653_v41 }
 0x100   :  { %v564_v30 = vmax.f32 %v556_v28, 0.0  ;;  %6282 = vmatpush3.msra.mxu1 %v8155_v29  ;;  %6317 = vmatpush3.msra.mxu0 %v7953_v52  ;;  %v1680_v28 = vld [vmem:[#allocation2 + $0x20] sm:$0xf] }
 0x101   :  { %6283 = vmatprep.subr.mxu1 %v7653_v41  ;;  %6318 = vmatprep.subr.mxu0 %v7653_v41 }
 0x102   :  { %572 = vst [vmem:[#allocation2 + $0x38] sm:$0xff] %v564_v30  ;;  %6284 = vmatpush3.msra.mxu1 %v8164_v24  ;;  %6319 = vmatpush3.msra.mxu0 %v7967_v54  ;;  %v8767_v30 = vld [vmem:[%s10266_s3 + $0x78] sm:$0xff] }
 0x103   :  { %6285 = vmatprep.subr.mxu1 %v7653_v41  ;;  %6320 = vmatprep.subr.mxu0 %v7653_v41 }
 0x104   :  { %6286 = vmatpush3.msra.mxu1 %v8173_v31  ;;  %6321 = vmatpush3.msra.mxu0 %v7981_v56 }
 0x105   :  { %6287 = vmatprep.subr.mxu1 %v7653_v41  ;;  %6322 = vmatprep.subr.mxu0 %v7653_v41 }
 0x106   :  { %6288 = vmatpush3.msra.mxu1 %v8182_v33  ;;  %6323 = vmatpush3.msra.mxu0 %v7995_v58 }
 0x107   :  { %6289 = vmatprep.subr.mxu1 %v7653_v41  ;;  %6324 = vmatprep.subr.mxu0 %v7653_v41 }
 0x108   :  { %6290 = vmatpush3.msra.mxu1 %v8191_v34  ;;  %6325 = vmatpush3.msra.mxu0 %v8009_v60 }
 0x109   :  { %6291 = vmatprep.subr.mxu1 %v7653_v41  ;;  %6326 = vmatprep.subr.mxu0 %v7653_v41 }
 0x10a   :  { %6292 = vmatpush3.msra.mxu1 %v8200_v35  ;;  %6327 = vmatpush3.msra.mxu0 %v8023_v62 }
 0x10b   :  { %6293 = vmatprep.subr.mxu1 %v7653_v41  ;;  %6328 = vmatprep.subr.mxu0 %v7653_v41 }
 0x10c   :  { %6294 = vmatpush3.msra.mxu1 %v8209_v36  ;;  %6329 = vmatpush3.msra.mxu0 %v8037_v0 }
 0x10d   :  { %6295 = vmatprep.subr.mxu1 %v7653_v41  ;;  %6330 = vmatprep.subr.mxu0 %v7653_v41 }
 0x10e   :  { %6296 = vmatpush3.msra.mxu1 %v8218_v37  ;;  %6331 = vmatpush3.msra.mxu0 %v8051_v2 }
 0x10f   :  { %6297 = vmatprep.subr.mxu1 %v7653_v41  ;;  %6332 = vmatprep.subr.mxu0 %v7653_v41 }
 0x110   :  { %6298 = vmatpush3.msra.mxu1 %v8227_v38  ;;  %6333 = vmatpush3.msra.mxu0 %v8065_v4 }
 0x111   :  { %6299 = vmatprep.subr.mxu1 %v7653_v41  ;;  %6334 = vmatprep.subr.mxu0 %v7653_v41 }
 0x112   :  { %6300 = vmatpush3.msra.mxu1 %v8236_v40  ;;  %6335 = vmatpush3.msra.mxu0 %v8079_v6 }
 0x113   :  { %6301 = vmatprep.subr.mxu1 %v7653_v41  ;;  %6336 = vmatprep.subr.mxu0 %v7653_v41 }
 0x114   :  { %6302 = vmatpush3.msra.mxu1 %v8245_v32  ;;  %6303 = vmatprep.mubr.msk.f32.mxu1 %vm7654_vm1, %v7653_v41 }
 0x115   :  { %6337 = vmatpush3.msra.mxu0 %v8093_v8  ;;  %6338 = vmatprep.mubr.msk.f32.mxu0 %vm7654_vm1, %v7653_v41 }
 0x116   :  { %6304 = vmatmul.mubr.f32.vlgmr.msra.gmra.mxu1 %v770_v11  ;;  %6339 = vmatmul.mubr.f32.vlgmr.msra.gmra.mxu0 %v858_v12  ;;  %v8864_v11 = vld [vmem:[%s10266_s3 + $0x20] sm:$0xff] }
 0x117   :  { %6341 = vmatprep.subr.mxu1 %v7653_v41  ;;  %6376 = vmatprep.subr.mxu0 %v7653_v41 }
 0x118   :  { %6342 = vmatpush3.msra.mxu1 %v7888_v43  ;;  %6377 = vmatpush3.msra.mxu0 %v8114_v39 }
 0x119   :  { %6343 = vmatprep.subr.mxu1 %v7653_v41  ;;  %6378 = vmatprep.subr.mxu0 %v7653_v41 }
 0x11a   :  { %6344 = vmatpush3.msra.mxu1 %v7902_v45  ;;  %6379 = vmatpush3.msra.mxu0 %v8119_v18 }
 0x11b   :  { %6345 = vmatprep.subr.mxu1 %v7653_v41  ;;  %6380 = vmatprep.subr.mxu0 %v7653_v41 }
 0x11c   :  { %6346 = vmatpush3.msra.mxu1 %v7916_v47  ;;  %6381 = vmatpush3.msra.mxu0 %v8128_v25 }
 0x11d   :  { %6347 = vmatprep.subr.mxu1 %v7653_v41  ;;  %6382 = vmatprep.subr.mxu0 %v7653_v41 }
 0x11e   :  { %6348 = vmatpush3.msra.mxu1 %v7930_v49  ;;  %6383 = vmatpush3.msra.mxu0 %v8137_v26 }
 0x11f   :  { %6349 = vmatprep.subr.mxu1 %v7653_v41  ;;  %6384 = vmatprep.subr.mxu0 %v7653_v41 }
 0x120   :  { %6350 = vmatpush3.msra.mxu1 %v7944_v51  ;;  %6385 = vmatpush3.msra.mxu0 %v8146_v27 }
 0x121   :  { %6351 = vmatprep.subr.mxu1 %v7653_v41  ;;  %6386 = vmatprep.subr.mxu0 %v7653_v41 }
 0x122   :  { %6352 = vmatpush3.msra.mxu1 %v7958_v53  ;;  %6387 = vmatpush3.msra.mxu0 %v8155_v29 }
 0x123   :  { %6353 = vmatprep.subr.mxu1 %v7653_v41  ;;  %6388 = vmatprep.subr.mxu0 %v7653_v41 }
 0x124   :  { %6354 = vmatpush3.msra.mxu1 %v7972_v55  ;;  %6389 = vmatpush3.msra.mxu0 %v8164_v24 }
 0x125   :  { %6355 = vmatprep.subr.mxu1 %v7653_v41  ;;  %6390 = vmatprep.subr.mxu0 %v7653_v41 }
 0x126   :  { %6356 = vmatpush3.msra.mxu1 %v7986_v57  ;;  %6391 = vmatpush3.msra.mxu0 %v8173_v31 }
 0x127   :  { %6357 = vmatprep.subr.mxu1 %v7653_v41  ;;  %6392 = vmatprep.subr.mxu0 %v7653_v41 }
 0x128   :  { %6358 = vmatpush3.msra.mxu1 %v8000_v59  ;;  %6393 = vmatpush3.msra.mxu0 %v8182_v33 }
 0x129   :  { %6359 = vmatprep.subr.mxu1 %v7653_v41  ;;  %6394 = vmatprep.subr.mxu0 %v7653_v41 }
 0x12a   :  { %6360 = vmatpush3.msra.mxu1 %v8014_v61  ;;  %6395 = vmatpush3.msra.mxu0 %v8191_v34 }
 0x12b   :  { %6361 = vmatprep.subr.mxu1 %v7653_v41  ;;  %6396 = vmatprep.subr.mxu0 %v7653_v41 }
 0x12c   :  { %6362 = vmatpush3.msra.mxu1 %v8028_v63  ;;  %6397 = vmatpush3.msra.mxu0 %v8200_v35 }
 0x12d   :  { %6363 = vmatprep.subr.mxu1 %v7653_v41  ;;  %6398 = vmatprep.subr.mxu0 %v7653_v41 }
 0x12e   :  { %6364 = vmatpush3.msra.mxu1 %v8042_v1  ;;  %6399 = vmatpush3.msra.mxu0 %v8209_v36 }
 0x12f   :  { %6365 = vmatprep.subr.mxu1 %v7653_v41  ;;  %6400 = vmatprep.subr.mxu0 %v7653_v41 }
 0x130   :  { %6366 = vmatpush3.msra.mxu1 %v8056_v3  ;;  %6401 = vmatpush3.msra.mxu0 %v8218_v37 }
 0x131   :  { %6367 = vmatprep.subr.mxu1 %v7653_v41  ;;  %6402 = vmatprep.subr.mxu0 %v7653_v41 }
 0x132   :  { %6368 = vmatpush3.msra.mxu1 %v8070_v5  ;;  %6403 = vmatpush3.msra.mxu0 %v8227_v38 }
 0x133   :  { %6369 = vmatprep.subr.mxu1 %v7653_v41  ;;  %6404 = vmatprep.subr.mxu0 %v7653_v41 }
 0x134   :  { %6370 = vmatpush3.msra.mxu1 %v8084_v7  ;;  %6405 = vmatpush3.msra.mxu0 %v8236_v40 }
 0x135   :  { %6371 = vmatprep.subr.mxu1 %v7653_v41  ;;  %6406 = vmatprep.subr.mxu0 %v7653_v41 }
 0x136   :  { %6372 = vmatpush3.msra.mxu1 %v8098_v9  ;;  %6373 = vmatprep.mubr.msk.f32.mxu1 %vm7654_vm1, %v7653_v41 }
 0x137   :  { %6407 = vmatpush3.msra.mxu0 %v8245_v32  ;;  %6408 = vmatprep.mubr.msk.f32.mxu0 %vm7654_vm1, %v7653_v41 }
 0x138   :  { %6374 = vmatmul.mubr.f32.vlgmr.msra.gmra.mxu1 %v946_v13  ;;  %6409 = vmatmul.mubr.f32.vlgmr.msra.gmra.mxu0 %v1044_v14  ;;  %v8877_v14 = vld [vmem:[%s10266_s3 + $0x18] sm:$0xff] }
 0x139   :  { %6411 = vmatprep.subr.mxu1 %v7653_v41  ;;  %6446 = vmatprep.subr.mxu0 %v7653_v41 }
 0x13a   :  { %6412 = vmatpush3.msra.mxu1 %v7883_v42  ;;  %6447 = vmatpush3.msra.mxu0 %v7888_v43  ;;  %v1132_v43 = vld [vmem:[#allocation2 + $0x10] sm:$0xf] }
 0x13b   :  { %6413 = vmatprep.subr.mxu1 %v7653_v41  ;;  %6448 = vmatprep.subr.mxu0 %v7653_v41 }
 0x13c   :  { %6414 = vmatpush3.msra.mxu1 %v7897_v44  ;;  %6449 = vmatpush3.msra.mxu0 %v7902_v45  ;;  %v1220_v45 = vld [vmem:[#allocation2 + $0x14] sm:$0xf] }
 0x13d   :  { %6415 = vmatprep.subr.mxu1 %v7653_v41  ;;  %6450 = vmatprep.subr.mxu0 %v7653_v41 }
 0x13e   :  { %6416 = vmatpush3.msra.mxu1 %v7911_v46  ;;  %6451 = vmatpush3.msra.mxu0 %v7916_v47  ;;  %v8471_v47 = vld [vmem:[%s10266_s3 + $0x170] sm:$0xff] }
 0x13f   :  { %6417 = vmatprep.subr.mxu1 %v7653_v41  ;;  %6452 = vmatprep.subr.mxu0 %v7653_v41 }
 0x140   :  { %6418 = vmatpush3.msra.mxu1 %v7925_v48  ;;  %6453 = vmatpush3.msra.mxu0 %v7930_v49  ;;  %v8489_v49 = vld [vmem:[%s10266_s3 + $0x160] sm:$0xff] }
 0x141   :  { %6419 = vmatprep.subr.mxu1 %v7653_v41  ;;  %6454 = vmatprep.subr.mxu0 %v7653_v41 }
 0x142   :  { %6420 = vmatpush3.msra.mxu1 %v7939_v50  ;;  %6455 = vmatpush3.msra.mxu0 %v7944_v51  ;;  %v8507_v51 = vld [vmem:[%s10266_s3 + $0x150] sm:$0xff] }
 0x143   :  { %6421 = vmatprep.subr.mxu1 %v7653_v41  ;;  %6456 = vmatprep.subr.mxu0 %v7653_v41 }
 0x144   :  { %6422 = vmatpush3.msra.mxu1 %v7953_v52  ;;  %6457 = vmatpush3.msra.mxu0 %v7958_v53  ;;  %v8525_v53 = vld [vmem:[%s10266_s3 + $0x140] sm:$0xff] }
 0x145   :  { %6423 = vmatprep.subr.mxu1 %v7653_v41  ;;  %6458 = vmatprep.subr.mxu0 %v7653_v41 }
 0x146   :  { %6424 = vmatpush3.msra.mxu1 %v7967_v54  ;;  %6459 = vmatpush3.msra.mxu0 %v7972_v55  ;;  %v8543_v55 = vld [vmem:[%s10266_s3 + $0x130] sm:$0xff] }
 0x147   :  { %6425 = vmatprep.subr.mxu1 %v7653_v41  ;;  %6460 = vmatprep.subr.mxu0 %v7653_v41 }
 0x148   :  { %6426 = vmatpush3.msra.mxu1 %v7981_v56  ;;  %6461 = vmatpush3.msra.mxu0 %v7986_v57  ;;  %v8561_v57 = vld [vmem:[%s10266_s3 + $0x120] sm:$0xff] }
 0x149   :  { %6427 = vmatprep.subr.mxu1 %v7653_v41  ;;  %6462 = vmatprep.subr.mxu0 %v7653_v41 }
 0x14a   :  { %6428 = vmatpush3.msra.mxu1 %v7995_v58  ;;  %6463 = vmatpush3.msra.mxu0 %v8000_v59  ;;  %v1592_v59 = vld [vmem:[#allocation2 + $0x1c] sm:$0xf] }
 0x14b   :  { %6429 = vmatprep.subr.mxu1 %v7653_v41  ;;  %6464 = vmatprep.subr.mxu0 %v7653_v41 }
 0x14c   :  { %6430 = vmatpush3.msra.mxu1 %v8009_v60  ;;  %6465 = vmatpush3.msra.mxu0 %v8014_v61  ;;  %v8599_v61 = vld [vmem:[%s10266_s3 + $0xf0] sm:$0xff] }
 0x14d   :  { %6431 = vmatprep.subr.mxu1 %v7653_v41  ;;  %6466 = vmatprep.subr.mxu0 %v7653_v41 }
 0x14e   :  { %6432 = vmatpush3.msra.mxu1 %v8023_v62  ;;  %6467 = vmatpush3.msra.mxu0 %v8028_v63  ;;  %v8617_v63 = vld [vmem:[%s10266_s3 + $0xe0] sm:$0xff] }
 0x14f   :  { %6433 = vmatprep.subr.mxu1 %v7653_v41  ;;  %6468 = vmatprep.subr.mxu0 %v7653_v41 }
 0x150   :  { %6434 = vmatpush3.msra.mxu1 %v8037_v0  ;;  %6469 = vmatpush3.msra.mxu0 %v8042_v1  ;;  %v8635_v1 = vld [vmem:[%s10266_s3 + $0xd0] sm:$0xff] }
 0x151   :  { %6435 = vmatprep.subr.mxu1 %v7653_v41  ;;  %6470 = vmatprep.subr.mxu0 %v7653_v41 }
 0x152   :  { %6436 = vmatpush3.msra.mxu1 %v8051_v2  ;;  %6471 = vmatpush3.msra.mxu0 %v8056_v3 }
 0x153   :  { %6437 = vmatprep.subr.mxu1 %v7653_v41  ;;  %6472 = vmatprep.subr.mxu0 %v7653_v41 }
 0x154   :  { %6438 = vmatpush3.msra.mxu1 %v8065_v4  ;;  %6473 = vmatpush3.msra.mxu0 %v8070_v5 }
 0x155   :  { %6439 = vmatprep.subr.mxu1 %v7653_v41  ;;  %6474 = vmatprep.subr.mxu0 %v7653_v41 }
 0x156   :  { %6440 = vmatpush3.msra.mxu1 %v8079_v6  ;;  %6475 = vmatpush3.msra.mxu0 %v8084_v7 }
 0x157   :  { %6441 = vmatprep.subr.mxu1 %v7653_v41  ;;  %6476 = vmatprep.subr.mxu0 %v7653_v41 }
 0x158   :  { %6442 = vmatpush3.msra.mxu1 %v8093_v8  ;;  %6443 = vmatprep.mubr.msk.f32.mxu1 %vm7654_vm1, %v7653_v41 }
 0x159   :  { %6477 = vmatpush3.msra.mxu0 %v8098_v9  ;;  %6478 = vmatprep.mubr.msk.f32.mxu0 %vm7654_vm1, %v7653_v41 }
 0x15a   :  { %6444 = vmatmul.mubr.f32.vlgmr.msra.gmra.mxu1 %v1132_v43  ;;  %6479 = vmatmul.mubr.f32.vlgmr.msra.gmra.mxu0 %v1220_v45 }
 0x15b   :  { %6481 = vmatprep.subr.mxu1 %v7653_v41  ;;  %6516 = vmatprep.subr.mxu0 %v7653_v41 }
 0x15c   :  { %6482 = vmatpush3.msra.mxu1 %v8114_v39  ;;  %6517 = vmatpush3.msra.mxu0 %v7883_v42  ;;  %v1318_v42 = vld [vmem:[#allocation2 + $0x14] sm:$0xf] }
 0x15d   :  { %6483 = vmatprep.subr.mxu1 %v7653_v41  ;;  %6518 = vmatprep.subr.mxu0 %v7653_v41 }
 0x15e   :  { %6484 = vmatpush3.msra.mxu1 %v8119_v18  ;;  %6519 = vmatpush3.msra.mxu0 %v7897_v44  ;;  %v1406_v44 = vld [vmem:[#allocation2 + $0x18] sm:$0xf] }
 0x15f   :  { %6485 = vmatprep.subr.mxu1 %v7653_v41  ;;  %6520 = vmatprep.subr.mxu0 %v7653_v41 }
 0x160   :  { %6486 = vmatpush3.msra.mxu1 %v8128_v25  ;;  %6521 = vmatpush3.msra.mxu0 %v7911_v46  ;;  %v8464_v46 = vld [vmem:[%s10266_s3 + $0x178] sm:$0xff] }
 0x161   :  { %6487 = vmatprep.subr.mxu1 %v7653_v41  ;;  %6522 = vmatprep.subr.mxu0 %v7653_v41 }
 0x162   :  { %6488 = vmatpush3.msra.mxu1 %v8137_v26  ;;  %6523 = vmatpush3.msra.mxu0 %v7925_v48  ;;  %v8480_v48 = vld [vmem:[%s10266_s3 + $0x168] sm:$0xff] }
 0x163   :  { %6489 = vmatprep.subr.mxu1 %v7653_v41  ;;  %6524 = vmatprep.subr.mxu0 %v7653_v41 }
 0x164   :  { %6490 = vmatpush3.msra.mxu1 %v8146_v27  ;;  %6525 = vmatpush3.msra.mxu0 %v7939_v50  ;;  %v8498_v50 = vld [vmem:[%s10266_s3 + $0x158] sm:$0xff] }
 0x165   :  { %6491 = vmatprep.subr.mxu1 %v7653_v41  ;;  %6526 = vmatprep.subr.mxu0 %v7653_v41 }
 0x166   :  { %6492 = vmatpush3.msra.mxu1 %v8155_v29  ;;  %6527 = vmatpush3.msra.mxu0 %v7953_v52  ;;  %v8516_v52 = vld [vmem:[%s10266_s3 + $0x148] sm:$0xff] }
 0x167   :  { %6493 = vmatprep.subr.mxu1 %v7653_v41  ;;  %6528 = vmatprep.subr.mxu0 %v7653_v41 }
 0x168   :  { %6494 = vmatpush3.msra.mxu1 %v8164_v24  ;;  %6529 = vmatpush3.msra.mxu0 %v7967_v54  ;;  %v8534_v54 = vld [vmem:[%s10266_s3 + $0x138] sm:$0xff] }
 0x169   :  { %6495 = vmatprep.subr.mxu1 %v7653_v41  ;;  %6530 = vmatprep.subr.mxu0 %v7653_v41 }
 0x16a   :  { %6496 = vmatpush3.msra.mxu1 %v8173_v31  ;;  %6531 = vmatpush3.msra.mxu0 %v7981_v56  ;;  %v8552_v56 = vld [vmem:[%s10266_s3 + $0x128] sm:$0xff] }
 0x16b   :  { %6497 = vmatprep.subr.mxu1 %v7653_v41  ;;  %6532 = vmatprep.subr.mxu0 %v7653_v41 }
 0x16c   :  { %6498 = vmatpush3.msra.mxu1 %v8182_v33  ;;  %6533 = vmatpush3.msra.mxu0 %v7995_v58  ;;  %v1494_v58 = vld [vmem:[#allocation2 + $0x1c] sm:$0xf] }
 0x16d   :  { %6499 = vmatprep.subr.mxu1 %v7653_v41  ;;  %6534 = vmatprep.subr.mxu0 %v7653_v41 }
 0x16e   :  { %6500 = vmatpush3.msra.mxu1 %v8191_v34  ;;  %6535 = vmatpush3.msra.mxu0 %v8009_v60  ;;  %v8592_v60 = vld [vmem:[%s10266_s3 + $0xf8] sm:$0xff] }
 0x16f   :  { %6501 = vmatprep.subr.mxu1 %v7653_v41  ;;  %6536 = vmatprep.subr.mxu0 %v7653_v41 }
 0x170   :  { %6502 = vmatpush3.msra.mxu1 %v8200_v35  ;;  %6537 = vmatpush3.msra.mxu0 %v8023_v62  ;;  %v8608_v62 = vld [vmem:[%s10266_s3 + $0xe8] sm:$0xff] }
 0x171   :  { %6503 = vmatprep.subr.mxu1 %v7653_v41  ;;  %6538 = vmatprep.subr.mxu0 %v7653_v41 }
 0x172   :  { %6504 = vmatpush3.msra.mxu1 %v8209_v36  ;;  %6539 = vmatpush3.msra.mxu0 %v8037_v0  ;;  %v8626_v0 = vld [vmem:[%s10266_s3 + $0xd8] sm:$0xff] }
 0x173   :  { %6505 = vmatprep.subr.mxu1 %v7653_v41  ;;  %6540 = vmatprep.subr.mxu0 %v7653_v41 }
 0x174   :  { %6506 = vmatpush3.msra.mxu1 %v8218_v37  ;;  %6541 = vmatpush3.msra.mxu0 %v8051_v2  ;;  %v8644_v2 = vld [vmem:[%s10266_s3 + $0xc8] sm:$0xff] }
 0x175   :  { %6507 = vmatprep.subr.mxu1 %v7653_v41  ;;  %6542 = vmatprep.subr.mxu0 %v7653_v41 }
 0x176   :  { %6508 = vmatpush3.msra.mxu1 %v8227_v38  ;;  %6543 = vmatpush3.msra.mxu0 %v8065_v4  ;;  %v8662_v4 = vld [vmem:[%s10266_s3 + $0xb8] sm:$0xff] }
 0x177   :  { %6509 = vmatprep.subr.mxu1 %v7653_v41  ;;  %6544 = vmatprep.subr.mxu0 %v7653_v41 }
 0x178   :  { %6510 = vmatpush3.msra.mxu1 %v8236_v40  ;;  %6545 = vmatpush3.msra.mxu0 %v8079_v6  ;;  %v8680_v6 = vld [vmem:[%s10266_s3 + $0xa8] sm:$0xff] }
 0x179   :  { %6511 = vmatprep.subr.mxu1 %v7653_v41  ;;  %6546 = vmatprep.subr.mxu0 %v7653_v41 }
 0x17a   :  { %6512 = vmatpush3.msra.mxu1 %v8245_v32  ;;  %6513 = vmatprep.mubr.msk.f32.mxu1 %vm7654_vm1, %v7653_v41 }
 0x17b   :  { %6547 = vmatpush3.msra.mxu0 %v8093_v8  ;;  %6548 = vmatprep.mubr.msk.f32.mxu0 %vm7654_vm1, %v7653_v41  ;;  %v8694_v8 = vld [vmem:[%s10267_s4] ss:$0 sm:$0xff] }
 0x17c   :  { %6514 = vmatmul.mubr.f32.vlgmr.msra.gmra.mxu1 %v1318_v42  ;;  %6549 = vmatmul.mubr.f32.vlgmr.msra.gmra.mxu0 %v1406_v44  ;;  %v8886_v42 = vld [vmem:[%s10266_s3 + $0x10] sm:$0xff]  ;;  %v8895_v44 = vld [vmem:[%s10266_s3 + $0x8] sm:$0xff] }
 0x17d   :  { %6551 = vmatprep.subr.mxu1 %v7653_v41  ;;  %6586 = vmatprep.subr.mxu0 %v7653_v41 }
 0x17e   :  { %6552 = vmatpush3.msra.mxu1 %v8464_v46  ;;  %6587 = vmatpush3.msra.mxu0 %v8114_v39  ;;  %v8708_v39 = vld [vmem:[%s10266_s3 + $0x118] sm:$0xff] }
 0x17f   :  { %6553 = vmatprep.subr.mxu1 %v7653_v41  ;;  %6588 = vmatprep.subr.mxu0 %v7653_v41 }
 0x180   :  { %6554 = vmatpush3.msra.mxu1 %v8471_v47  ;;  %6589 = vmatpush3.msra.mxu0 %v8119_v18 }
 0x181   :  { %6555 = vmatprep.subr.mxu1 %v7653_v41  ;;  %6590 = vmatprep.subr.mxu0 %v7653_v41 }
 0x182   :  { %6556 = vmatpush3.msra.mxu1 %v8480_v48  ;;  %6591 = vmatpush3.msra.mxu0 %v8128_v25 }
 0x183   :  { %6557 = vmatprep.subr.mxu1 %v7653_v41  ;;  %6592 = vmatprep.subr.mxu0 %v7653_v41 }
 0x184   :  { %6558 = vmatpush3.msra.mxu1 %v8489_v49  ;;  %6593 = vmatpush3.msra.mxu0 %v8137_v26  ;;  %v8746_v26 = vld [vmem:[%s10266_s3 + $0x80] sm:$0xff] }
 0x185   :  { %6559 = vmatprep.subr.mxu1 %v7653_v41  ;;  %6594 = vmatprep.subr.mxu0 %v7653_v41 }
 0x186   :  { %6560 = vmatpush3.msra.mxu1 %v8498_v50  ;;  %6595 = vmatpush3.msra.mxu0 %v8146_v27  ;;  %v8753_v27 = vld [vmem:[%s10266_s3 + $0x100] sm:$0xff] }
 0x187   :  { %6561 = vmatprep.subr.mxu1 %v7653_v41  ;;  %6596 = vmatprep.subr.mxu0 %v7653_v41 }
 0x188   :  { %6562 = vmatpush3.msra.mxu1 %v8507_v51  ;;  %6597 = vmatpush3.msra.mxu0 %v8155_v29  ;;  %v1768_v29 = vld [vmem:[#allocation2 + $0x24] sm:$0xf] }
 0x189   :  { %6563 = vmatprep.subr.mxu1 %v7653_v41  ;;  %6598 = vmatprep.subr.mxu0 %v7653_v41 }
 0x18a   :  { %6564 = vmatpush3.msra.mxu1 %v8516_v52  ;;  %6599 = vmatpush3.msra.mxu0 %v8164_v24  ;;  %v8774_v24 = vld [vmem:[%s10266_s3 + $0x70] sm:$0xff] }
 0x18b   :  { %6565 = vmatprep.subr.mxu1 %v7653_v41  ;;  %6600 = vmatprep.subr.mxu0 %v7653_v41 }
 0x18c   :  { %6566 = vmatpush3.msra.mxu1 %v8525_v53  ;;  %6601 = vmatpush3.msra.mxu0 %v8173_v31  ;;  %v8783_v31 = vld [vmem:[%s10266_s3 + $0x68] sm:$0xff] }
 0x18d   :  { %6567 = vmatprep.subr.mxu1 %v7653_v41  ;;  %6602 = vmatprep.subr.mxu0 %v7653_v41 }
 0x18e   :  { %6568 = vmatpush3.msra.mxu1 %v8534_v54  ;;  %6603 = vmatpush3.msra.mxu0 %v8182_v33  ;;  %v8792_v33 = vld [vmem:[%s10266_s3 + $0x60] sm:$0xff] }
 0x18f   :  { %6569 = vmatprep.subr.mxu1 %v7653_v41  ;;  %6604 = vmatprep.subr.mxu0 %v7653_v41 }
 0x190   :  { %6570 = vmatpush3.msra.mxu1 %v8543_v55  ;;  %6605 = vmatpush3.msra.mxu0 %v8191_v34  ;;  %v8801_v34 = vld [vmem:[%s10266_s3 + $0x58] sm:$0xff] }
 0x191   :  { %6571 = vmatprep.subr.mxu1 %v7653_v41  ;;  %6606 = vmatprep.subr.mxu0 %v7653_v41 }
 0x192   :  { %6572 = vmatpush3.msra.mxu1 %v8552_v56  ;;  %6607 = vmatpush3.msra.mxu0 %v8200_v35  ;;  %v8810_v35 = vld [vmem:[%s10266_s3 + $0x50] sm:$0xff] }
 0x193   :  { %6573 = vmatprep.subr.mxu1 %v7653_v41  ;;  %6608 = vmatprep.subr.mxu0 %v7653_v41 }
 0x194   :  { %6574 = vmatpush3.msra.mxu1 %v8561_v57  ;;  %6609 = vmatpush3.msra.mxu0 %v8209_v36  ;;  %v8819_v36 = vld [vmem:[%s10266_s3 + $0x48] sm:$0xff] }
 0x195   :  { %6575 = vmatprep.subr.mxu1 %v7653_v41  ;;  %6610 = vmatprep.subr.mxu0 %v7653_v41 }
 0x196   :  { %6576 = vmatpush3.msra.mxu1 %v8056_v3  ;;  %6611 = vmatpush3.msra.mxu0 %v8218_v37  ;;  %v8653_v3 = vld [vmem:[%s10266_s3 + $0xc0] sm:$0xff] }
 0x197   :  { %6577 = vmatprep.subr.mxu1 %v7653_v41  ;;  %6612 = vmatprep.subr.mxu0 %v7653_v41  ;;  %v8828_v37 = vld [vmem:[%s10266_s3 + $0x40] sm:$0xff] }
 0x198   :  { %6578 = vmatpush3.msra.mxu1 %v8070_v5  ;;  %6613 = vmatpush3.msra.mxu0 %v8227_v38  ;;  %v8671_v5 = vld [vmem:[%s10266_s3 + $0xb0] sm:$0xff]  ;;  %v8837_v38 = vld [vmem:[%s10266_s3 + $0x38] sm:$0xff] }
 0x199   :  { %6579 = vmatprep.subr.mxu1 %v7653_v41  ;;  %6614 = vmatprep.subr.mxu0 %v7653_v41 }
 0x19a   :  { %6580 = vmatpush3.msra.mxu1 %v8084_v7  ;;  %6615 = vmatpush3.msra.mxu0 %v8236_v40  ;;  %v8689_v7 = vld [vmem:[%s10266_s3 + $0xa0] sm:$0xff]  ;;  %v8846_v40 = vld [vmem:[%s10266_s3 + $0x30] sm:$0xff] }
 0x19b   :  { %6581 = vmatprep.subr.mxu1 %v7653_v41  ;;  %6616 = vmatprep.subr.mxu0 %v7653_v41 }
 0x19c   :  { %6582 = vmatpush3.msra.mxu1 %v8098_v9  ;;  %6583 = vmatprep.mubr.msk.f32.mxu1 %vm7654_vm1, %v7653_v41  ;;  %v8703_v9 = vld [vmem:[%s10266_s3 + $0x98] sm:$0xff] }
 0x19d   :  { %6617 = vmatpush3.msra.mxu0 %v8245_v32  ;;  %6618 = vmatprep.mubr.msk.f32.mxu0 %vm7654_vm1, %v7653_v41  ;;  %v8855_v32 = vld [vmem:[%s10266_s3 + $0x28] sm:$0xff] }
 0x19e   :  { %6584 = vmatmul.mubr.f32.vlgmr.msra.gmra.mxu1 %v1494_v58  ;;  %6619 = vmatmul.mubr.f32.vlgmr.msra.gmra.mxu0 %v1592_v59  ;;  %v8904_v58 = vld [vmem:[%s10266_s3] sm:$0xff] }
 0x19f   :  { %6621 = vmatprep.subr.mxu1 %v7653_v41  ;;  %6656 = vmatprep.subr.mxu0 %v7653_v41  ;;  %v1866_v59 = vld [vmem:[#allocation2 + $0x24] sm:$0xf] }
 0x1a0   :  { %6622 = vmatpush3.msra.mxu1 %v8592_v60  ;;  %6657 = vmatpush3.msra.mxu0 %v8464_v46 }
 0x1a1   :  { %6623 = vmatprep.subr.mxu1 %v7653_v41  ;;  %6658 = vmatprep.subr.mxu0 %v7653_v41 }
 0x1a2   :  { %6624 = vmatpush3.msra.mxu1 %v8599_v61  ;;  %6659 = vmatpush3.msra.mxu0 %v8471_v47 }
 0x1a3   :  { %6625 = vmatprep.subr.mxu1 %v7653_v41  ;;  %6660 = vmatprep.subr.mxu0 %v7653_v41 }
 0x1a4   :  { %6626 = vmatpush3.msra.mxu1 %v8608_v62  ;;  %6661 = vmatpush3.msra.mxu0 %v8480_v48 }
 0x1a5   :  { %6627 = vmatprep.subr.mxu1 %v7653_v41  ;;  %6662 = vmatprep.subr.mxu0 %v7653_v41 }
 0x1a6   :  { %6628 = vmatpush3.msra.mxu1 %v8617_v63  ;;  %6663 = vmatpush3.msra.mxu0 %v8489_v49 }
 0x1a7   :  { %6629 = vmatprep.subr.mxu1 %v7653_v41  ;;  %6664 = vmatprep.subr.mxu0 %v7653_v41 }
 0x1a8   :  { %6630 = vmatpush3.msra.mxu1 %v8626_v0  ;;  %6665 = vmatpush3.msra.mxu0 %v8498_v50 }
 0x1a9   :  { %6631 = vmatprep.subr.mxu1 %v7653_v41  ;;  %6666 = vmatprep.subr.mxu0 %v7653_v41 }
 0x1aa   :  { %6632 = vmatpush3.msra.mxu1 %v8635_v1  ;;  %6667 = vmatpush3.msra.mxu0 %v8507_v51 }
 0x1ab   :  { %6633 = vmatprep.subr.mxu1 %v7653_v41  ;;  %6668 = vmatprep.subr.mxu0 %v7653_v41 }
 0x1ac   :  { %6634 = vmatpush3.msra.mxu1 %v8644_v2  ;;  %6669 = vmatpush3.msra.mxu0 %v8516_v52 }
 0x1ad   :  { %6635 = vmatprep.subr.mxu1 %v7653_v41  ;;  %6670 = vmatprep.subr.mxu0 %v7653_v41 }
 0x1ae   :  { %6636 = vmatpush3.msra.mxu1 %v8653_v3  ;;  %6671 = vmatpush3.msra.mxu0 %v8525_v53 }
 0x1af   :  { %6637 = vmatprep.subr.mxu1 %v7653_v41  ;;  %6672 = vmatprep.subr.mxu0 %v7653_v41 }
 0x1b0   :  { %6638 = vmatpush3.msra.mxu1 %v8662_v4  ;;  %6673 = vmatpush3.msra.mxu0 %v8534_v54 }
 0x1b1   :  { %6639 = vmatprep.subr.mxu1 %v7653_v41  ;;  %6674 = vmatprep.subr.mxu0 %v7653_v41 }
 0x1b2   :  { %6640 = vmatpush3.msra.mxu1 %v8671_v5  ;;  %6675 = vmatpush3.msra.mxu0 %v8543_v55 }
 0x1b3   :  { %6641 = vmatprep.subr.mxu1 %v7653_v41  ;;  %6676 = vmatprep.subr.mxu0 %v7653_v41 }
 0x1b4   :  { %6642 = vmatpush3.msra.mxu1 %v8680_v6  ;;  %6677 = vmatpush3.msra.mxu0 %v8552_v56 }
 0x1b5   :  { %6643 = vmatprep.subr.mxu1 %v7653_v41  ;;  %6678 = vmatprep.subr.mxu0 %v7653_v41  ;;  %v665_v15 = vpop.f32.mrf.mxu1  ;;  %v754_v16 = vpop.f32.mrf.mxu0 }
 0x1b6   :  { %6644 = vmatpush3.msra.mxu1 %v8689_v7  ;;  %6679 = vmatpush3.msra.mxu0 %v8561_v57  ;;  %v669_v17 = vadd.f32 %v8694_v8, %v665_v15  ;;  %v1954_v15 = vld [vmem:[#allocation2 + $0x28] sm:$0xf] }
 0x1b7   :  { %6645 = vmatprep.subr.mxu1 %v7653_v41  ;;  %6680 = vmatprep.subr.mxu0 %v7653_v41  ;;  %v6235_v21 = vpop.f32.mrf.mxu1  ;;  %v6270_v20 = vpop.f32.mrf.mxu0 }
 0x1b8   :  { %6646 = vmatpush3.msra.mxu1 %v8703_v9  ;;  %6681 = vmatpush3.msra.mxu0 %v8708_v39  ;;  %v758_v18 = vadd.f32 %v754_v16, %v669_v17 }
 0x1b9   :  { %6647 = vmatprep.subr.mxu1 %v7653_v41  ;;  %6682 = vmatprep.subr.mxu0 %v7653_v41 }
 0x1ba   :  { %6648 = vmatpush3.msra.mxu1 %v8718_v19  ;;  %6683 = vmatpush3.msra.mxu0 %v8723_v10  ;;  %v759_v25 = vmax.f32 %v758_v18, 0.0 }
 0x1bb   :  { %6649 = vmatprep.subr.mxu1 %v7653_v41  ;;  %6684 = vmatprep.subr.mxu0 %v7653_v41 }
 0x1bc   :  { %6650 = vmatpush3.msra.mxu1 %v8732_v22  ;;  %6685 = vmatpush3.msra.mxu0 %v8737_v23  ;;  %761 = vst.msk [vmem:[#allocation3] sm:$0xf] %vm760_vm2, %v759_v25 }
 0x1bd   :  { %6651 = vmatprep.subr.mxu1 %v7653_v41  ;;  %6686 = vmatprep.subr.mxu0 %v7653_v41 }
 0x1be   :  { %6652 = vmatpush3.msra.mxu1 %v8746_v26  ;;  %6653 = vmatprep.mubr.msk.f32.mxu1 %vm7654_vm1, %v7653_v41 }
 0x1bf   :  { %6687 = vmatpush3.msra.mxu0 %v8753_v27  ;;  %6688 = vmatprep.mubr.msk.f32.mxu0 %vm7654_vm1, %v7653_v41 }
 0x1c0   :  { %6654 = vmatmul.mubr.f32.vlgmr.msra.gmra.mxu1 %v1680_v28  ;;  %6689 = vmatmul.mubr.f32.vlgmr.msra.gmra.mxu0 %v1768_v29 }
 0x1c1   :  { %6691 = vmatprep.subr.mxu1 %v7653_v41  ;;  %6726 = vmatprep.subr.mxu0 %v7653_v41 }
 0x1c2   :  { %6692 = vmatpush3.msra.mxu1 %v8767_v30  ;;  %6727 = vmatpush3.msra.mxu0 %v8592_v60 }
 0x1c3   :  { %6693 = vmatprep.subr.mxu1 %v7653_v41  ;;  %6728 = vmatprep.subr.mxu0 %v7653_v41 }
 0x1c4   :  { %6694 = vmatpush3.msra.mxu1 %v8774_v24  ;;  %6729 = vmatpush3.msra.mxu0 %v8599_v61 }
 0x1c5   :  { %6695 = vmatprep.subr.mxu1 %v7653_v41  ;;  %6730 = vmatprep.subr.mxu0 %v7653_v41 }
 0x1c6   :  { %6696 = vmatpush3.msra.mxu1 %v8783_v31  ;;  %6731 = vmatpush3.msra.mxu0 %v8608_v62 }
 0x1c7   :  { %6697 = vmatprep.subr.mxu1 %v7653_v41  ;;  %6732 = vmatprep.subr.mxu0 %v7653_v41 }
 0x1c8   :  { %6698 = vmatpush3.msra.mxu1 %v8792_v33  ;;  %6733 = vmatpush3.msra.mxu0 %v8617_v63 }
 0x1c9   :  { %6699 = vmatprep.subr.mxu1 %v7653_v41  ;;  %6734 = vmatprep.subr.mxu0 %v7653_v41 }
 0x1ca   :  { %6700 = vmatpush3.msra.mxu1 %v8801_v34  ;;  %6735 = vmatpush3.msra.mxu0 %v8626_v0 }
 0x1cb   :  { %6701 = vmatprep.subr.mxu1 %v7653_v41  ;;  %6736 = vmatprep.subr.mxu0 %v7653_v41 }
 0x1cc   :  { %6702 = vmatpush3.msra.mxu1 %v8810_v35  ;;  %6737 = vmatpush3.msra.mxu0 %v8635_v1 }
 0x1cd   :  { %6703 = vmatprep.subr.mxu1 %v7653_v41  ;;  %6738 = vmatprep.subr.mxu0 %v7653_v41 }
 0x1ce   :  { %6704 = vmatpush3.msra.mxu1 %v8819_v36  ;;  %6739 = vmatpush3.msra.mxu0 %v8644_v2 }
 0x1cf   :  { %6705 = vmatprep.subr.mxu1 %v7653_v41  ;;  %6740 = vmatprep.subr.mxu0 %v7653_v41 }
 0x1d0   :  { %6706 = vmatpush3.msra.mxu1 %v8828_v37  ;;  %6741 = vmatpush3.msra.mxu0 %v8653_v3 }
 0x1d1   :  { %6707 = vmatprep.subr.mxu1 %v7653_v41  ;;  %6742 = vmatprep.subr.mxu0 %v7653_v41 }
 0x1d2   :  { %6708 = vmatpush3.msra.mxu1 %v8837_v38  ;;  %6743 = vmatpush3.msra.mxu0 %v8662_v4 }
 0x1d3   :  { %6709 = vmatprep.subr.mxu1 %v7653_v41  ;;  %6744 = vmatprep.subr.mxu0 %v7653_v41 }
 0x1d4   :  { %6710 = vmatpush3.msra.mxu1 %v8846_v40  ;;  %6745 = vmatpush3.msra.mxu0 %v8671_v5 }
 0x1d5   :  { %6711 = vmatprep.subr.mxu1 %v7653_v41  ;;  %6746 = vmatprep.subr.mxu0 %v7653_v41 }
 0x1d6   :  { %6712 = vmatpush3.msra.mxu1 %v8855_v32  ;;  %6747 = vmatpush3.msra.mxu0 %v8680_v6  ;;  %v8868_v12 = vpop.f32.mrf.mxu1  ;;  %v8870_v13 = vpop.f32.mrf.mxu0 }
 0x1d7   :  { %6713 = vmatprep.subr.mxu1 %v7653_v41  ;;  %6748 = vmatprep.subr.mxu0 %v7653_v41  ;;  %v857_v16 = vadd.f32 %v8694_v8, %v8868_v12  ;;  %v2042_v12 = vld [vmem:[#allocation2 + $0x2c] sm:$0xf] }
 0x1d8   :  { %6714 = vmatpush3.msra.mxu1 %v8864_v11  ;;  %6749 = vmatpush3.msra.mxu0 %v8689_v7  ;;  %v6305_v43 = vpop.f32.mrf.mxu1  ;;  %v6340_v45 = vpop.f32.mrf.mxu0 }
 0x1d9   :  { %6715 = vmatprep.subr.mxu1 %v7653_v41  ;;  %6750 = vmatprep.subr.mxu0 %v7653_v41  ;;  %v945_v17 = vadd.f32 %v8870_v13, %v857_v16  ;;  %v2140_v13 = vld [vmem:[#allocation2 + $0x2c] sm:$0xf] }
 0x1da   :  { %6716 = vmatpush3.msra.mxu1 %v8877_v14  ;;  %6751 = vmatpush3.msra.mxu0 %v8703_v9 }
 0x1db   :  { %6717 = vmatprep.subr.mxu1 %v7653_v41  ;;  %6752 = vmatprep.subr.mxu0 %v7653_v41 }
 0x1dc   :  { %6718 = vmatpush3.msra.mxu1 %v8886_v42  ;;  %6753 = vmatpush3.msra.mxu0 %v8718_v19 }
 0x1dd   :  { %6719 = vmatprep.subr.mxu1 %v7653_v41  ;;  %6754 = vmatprep.subr.mxu0 %v7653_v41 }
 0x1de   :  { %6720 = vmatpush3.msra.mxu1 %v8895_v44  ;;  %6755 = vmatpush3.msra.mxu0 %v8732_v22 }
 0x1df   :  { %6721 = vmatprep.subr.mxu1 %v7653_v41  ;;  %6756 = vmatprep.subr.mxu0 %v7653_v41 }
 0x1e0   :  { %6722 = vmatpush3.msra.mxu1 %v8904_v58  ;;  %6723 = vmatprep.mubr.msk.f32.mxu1 %vm7654_vm1, %v7653_v41 }
 0x1e1   :  { %6757 = vmatpush3.msra.mxu0 %v8746_v26  ;;  %6758 = vmatprep.mubr.msk.f32.mxu0 %vm7654_vm1, %v7653_v41 }
 0x1e2   :  { %6724 = vmatmul.mubr.f32.vlgmr.msra.gmra.mxu1 %v1866_v59  ;;  %6759 = vmatmul.mubr.f32.vlgmr.msra.gmra.mxu0 %v1954_v15  ;;  %v2590_v59 = vld [vmem:[#allocation2 + $0x3c] sm:$0xf]  ;;  %v5177_v15 = vld [vmem:[%s10268_s5 + $0xb0] sm:$0xff] }
 0x1e3   :  { %6761 = vmatprep.subr.mxu1 %v7653_v41  ;;  %6796 = vmatprep.subr.mxu0 %v7653_v41 }
 0x1e4   :  { %6762 = vmatpush3.msra.mxu1 %v8464_v46  ;;  %6797 = vmatpush3.msra.mxu0 %v8767_v30 }
 0x1e5   :  { %6763 = vmatprep.subr.mxu1 %v7653_v41  ;;  %6798 = vmatprep.subr.mxu0 %v7653_v41 }
 0x1e6   :  { %6764 = vmatpush3.msra.mxu1 %v8471_v47  ;;  %6799 = vmatpush3.msra.mxu0 %v8774_v24 }
 0x1e7   :  { %6765 = vmatprep.subr.mxu1 %v7653_v41  ;;  %6800 = vmatprep.subr.mxu0 %v7653_v41 }
 0x1e8   :  { %6766 = vmatpush3.msra.mxu1 %v8480_v48  ;;  %6801 = vmatpush3.msra.mxu0 %v8783_v31 }
 0x1e9   :  { %6767 = vmatprep.subr.mxu1 %v7653_v41  ;;  %6802 = vmatprep.subr.mxu0 %v7653_v41 }
 0x1ea   :  { %6768 = vmatpush3.msra.mxu1 %v8489_v49  ;;  %6803 = vmatpush3.msra.mxu0 %v8792_v33 }
 0x1eb   :  { %6769 = vmatprep.subr.mxu1 %v7653_v41  ;;  %6804 = vmatprep.subr.mxu0 %v7653_v41 }
 0x1ec   :  { %6770 = vmatpush3.msra.mxu1 %v8498_v50  ;;  %6805 = vmatpush3.msra.mxu0 %v8801_v34 }
 0x1ed   :  { %6771 = vmatprep.subr.mxu1 %v7653_v41  ;;  %6806 = vmatprep.subr.mxu0 %v7653_v41 }
 0x1ee   :  { %6772 = vmatpush3.msra.mxu1 %v8507_v51  ;;  %6807 = vmatpush3.msra.mxu0 %v8810_v35 }
 0x1ef   :  { %6773 = vmatprep.subr.mxu1 %v7653_v41  ;;  %6808 = vmatprep.subr.mxu0 %v7653_v41 }
 0x1f0   :  { %6774 = vmatpush3.msra.mxu1 %v8516_v52  ;;  %6809 = vmatpush3.msra.mxu0 %v8819_v36 }
 0x1f1   :  { %6775 = vmatprep.subr.mxu1 %v7653_v41  ;;  %6810 = vmatprep.subr.mxu0 %v7653_v41 }
 0x1f2   :  { %6776 = vmatpush3.msra.mxu1 %v8525_v53  ;;  %6811 = vmatpush3.msra.mxu0 %v8828_v37 }
 0x1f3   :  { %6777 = vmatprep.subr.mxu1 %v7653_v41  ;;  %6812 = vmatprep.subr.mxu0 %v7653_v41 }
 0x1f4   :  { %6778 = vmatpush3.msra.mxu1 %v8534_v54  ;;  %6813 = vmatpush3.msra.mxu0 %v8837_v38 }
 0x1f5   :  { %6779 = vmatprep.subr.mxu1 %v7653_v41  ;;  %6814 = vmatprep.subr.mxu0 %v7653_v41 }
 0x1f6   :  { %6780 = vmatpush3.msra.mxu1 %v8543_v55  ;;  %6815 = vmatpush3.msra.mxu0 %v8846_v40 }
 0x1f7   :  { %6781 = vmatprep.subr.mxu1 %v7653_v41  ;;  %6816 = vmatprep.subr.mxu0 %v7653_v41 }
 0x1f8   :  { %6782 = vmatpush3.msra.mxu1 %v8552_v56  ;;  %6817 = vmatpush3.msra.mxu0 %v8855_v32  ;;  %v1029_v21 = vpop.f32.mrf.mxu1  ;;  %v8963_v20 = vpop.f32.mrf.mxu0 }
 0x1f9   :  { %6783 = vmatprep.subr.mxu1 %v7653_v41  ;;  %6818 = vmatprep.subr.mxu0 %v7653_v41  ;;  %v1033_v18 = vadd.f32 %v1029_v21, %v945_v17  ;;  %v5174_v17 = vld [vmem:[%s10268_s5 + $0x98] sm:$0xff]  ;;  %v5173_v21 = vld [vmem:[%s10268_s5 + $0x90] sm:$0xff] }
 0x1fa   :  { %6784 = vmatpush3.msra.mxu1 %v8561_v57  ;;  %6819 = vmatpush3.msra.mxu0 %v8864_v11  ;;  %v6375_v25 = vpop.f32.mrf.mxu1  ;;  %v6410_v28 = vpop.f32.mrf.mxu0 }
 0x1fb   :  { %6785 = vmatprep.subr.mxu1 %v7653_v41  ;;  %6820 = vmatprep.subr.mxu0 %v7653_v41  ;;  %v1034_v29 = vmax.f32 %v1033_v18, 0.0  ;;  %v5171_v18 = vld [vmem:[%s10268_s5 + $0x80] sm:$0xff] }
 0x1fc   :  { %6786 = vmatpush3.msra.mxu1 %v8708_v39  ;;  %6821 = vmatpush3.msra.mxu0 %v8877_v14 }
 0x1fd   :  { %6787 = vmatprep.subr.mxu1 %v7653_v41  ;;  %6822 = vmatprep.subr.mxu0 %v7653_v41  ;;  %1035 = vst.msk [vmem:[#allocation3 + $0x4] sm:$0xf] %vm760_vm2, %v1034_v29 }
 0x1fe   :  { %6788 = vmatpush3.msra.mxu1 %v8723_v10  ;;  %6823 = vmatpush3.msra.mxu0 %v8886_v42 }
 0x1ff   :  { %6789 = vmatprep.subr.mxu1 %v7653_v41  ;;  %6824 = vmatprep.subr.mxu0 %v7653_v41 }
 0x200   :  { %6790 = vmatpush3.msra.mxu1 %v8737_v23  ;;  %6825 = vmatpush3.msra.mxu0 %v8895_v44 }
 0x201   :  { %6791 = vmatprep.subr.mxu1 %v7653_v41  ;;  %6826 = vmatprep.subr.mxu0 %v7653_v41 }
 0x202   :  { %6792 = vmatpush3.msra.mxu1 %v8753_v27  ;;  %6793 = vmatprep.mubr.msk.f32.mxu1 %vm7654_vm1, %v7653_v41 }
 0x203   :  { %6827 = vmatpush3.msra.mxu0 %v8904_v58  ;;  %6828 = vmatprep.mubr.msk.f32.mxu0 %vm7654_vm1, %v7653_v41 }
 0x204   :  { %6794 = vmatmul.mubr.f32.vlgmr.msra.gmra.mxu1 %v2042_v12  ;;  %6829 = vmatmul.mubr.f32.vlgmr.msra.gmra.mxu0 %v2140_v13 }
 0x205   :  { %6831 = vmatprep.subr.mxu1 %v7653_v41  ;;  %6866 = vmatprep.subr.mxu0 %v7653_v41 }
 0x206   :  { %6832 = vmatpush3.msra.mxu1 %v8592_v60  ;;  %6867 = vmatpush3.msra.mxu0 %v8464_v46  ;;  %v1131_v46 = vadd.f32 %v8694_v8, %v8963_v20  ;;  %v5172_v20 = vld [vmem:[%s10268_s5 + $0x88] sm:$0xff] }
 0x207   :  { %6833 = vmatprep.subr.mxu1 %v7653_v41  ;;  %6868 = vmatprep.subr.mxu0 %v7653_v41 }
 0x208   :  { %6834 = vmatpush3.msra.mxu1 %v8599_v61  ;;  %6869 = vmatpush3.msra.mxu0 %v8471_v47 }
 0x209   :  { %6835 = vmatprep.subr.mxu1 %v7653_v41  ;;  %6870 = vmatprep.subr.mxu0 %v7653_v41 }
 0x20a   :  { %6836 = vmatpush3.msra.mxu1 %v8608_v62  ;;  %6871 = vmatpush3.msra.mxu0 %v8480_v48 }
 0x20b   :  { %6837 = vmatprep.subr.mxu1 %v7653_v41  ;;  %6872 = vmatprep.subr.mxu0 %v7653_v41 }
 0x20c   :  { %6838 = vmatpush3.msra.mxu1 %v8617_v63  ;;  %6873 = vmatpush3.msra.mxu0 %v8489_v49 }
 0x20d   :  { %6839 = vmatprep.subr.mxu1 %v7653_v41  ;;  %6874 = vmatprep.subr.mxu0 %v7653_v41 }
 0x20e   :  { %6840 = vmatpush3.msra.mxu1 %v8626_v0  ;;  %6875 = vmatpush3.msra.mxu0 %v8498_v50 }
 0x20f   :  { %6841 = vmatprep.subr.mxu1 %v7653_v41  ;;  %6876 = vmatprep.subr.mxu0 %v7653_v41 }
 0x210   :  { %6842 = vmatpush3.msra.mxu1 %v8635_v1  ;;  %6877 = vmatpush3.msra.mxu0 %v8507_v51 }
 0x211   :  { %6843 = vmatprep.subr.mxu1 %v7653_v41  ;;  %6878 = vmatprep.subr.mxu0 %v7653_v41 }
 0x212   :  { %6844 = vmatpush3.msra.mxu1 %v8644_v2  ;;  %6879 = vmatpush3.msra.mxu0 %v8516_v52 }
 0x213   :  { %6845 = vmatprep.subr.mxu1 %v7653_v41  ;;  %6880 = vmatprep.subr.mxu0 %v7653_v41 }
 0x214   :  { %6846 = vmatpush3.msra.mxu1 %v8653_v3  ;;  %6881 = vmatpush3.msra.mxu0 %v8525_v53 }
 0x215   :  { %6847 = vmatprep.subr.mxu1 %v7653_v41  ;;  %6882 = vmatprep.subr.mxu0 %v7653_v41 }
 0x216   :  { %6848 = vmatpush3.msra.mxu1 %v8662_v4  ;;  %6883 = vmatpush3.msra.mxu0 %v8534_v54  ;;  %v2228_v54 = vld [vmem:[#allocation2 + $0x30] sm:$0xf] }
 0x217   :  { %6849 = vmatprep.subr.mxu1 %v7653_v41  ;;  %6884 = vmatprep.subr.mxu0 %v7653_v41 }
 0x218   :  { %6850 = vmatpush3.msra.mxu1 %v8671_v5  ;;  %6885 = vmatpush3.msra.mxu0 %v8543_v55  ;;  %v2316_v55 = vld [vmem:[#allocation2 + $0x34] sm:$0xf] }
 0x219   :  { %6851 = vmatprep.subr.mxu1 %v7653_v41  ;;  %6886 = vmatprep.subr.mxu0 %v7653_v41 }
 0x21a   :  { %6852 = vmatpush3.msra.mxu1 %v8680_v6  ;;  %6887 = vmatpush3.msra.mxu0 %v8552_v56  ;;  %v1215_v47 = vpop.f32.mrf.mxu1  ;;  %v1303_v48 = vpop.f32.mrf.mxu0 }
 0x21b   :  { %6853 = vmatprep.subr.mxu1 %v7653_v41  ;;  %6888 = vmatprep.subr.mxu0 %v7653_v41  ;;  %v1219_v49 = vadd.f32 %v1215_v47, %v1131_v46 }
 0x21c   :  { %6854 = vmatpush3.msra.mxu1 %v8689_v7  ;;  %6889 = vmatpush3.msra.mxu0 %v8561_v57  ;;  %v6445_v50 = vpop.f32.mrf.mxu1  ;;  %v6480_v51 = vpop.f32.mrf.mxu0 }
 0x21d   :  { %6855 = vmatprep.subr.mxu1 %v7653_v41  ;;  %6890 = vmatprep.subr.mxu0 %v7653_v41  ;;  %v1307_v52 = vadd.f32 %v1303_v48, %v1219_v49 }
 0x21e   :  { %6856 = vmatpush3.msra.mxu1 %v8703_v9  ;;  %6891 = vmatpush3.msra.mxu0 %v8708_v39  ;;  %v5149_v39 = vld [vmem:[%s10266_s3 + $0x158] sm:$0xff] }
 0x21f   :  { %6857 = vmatprep.subr.mxu1 %v7653_v41  ;;  %6892 = vmatprep.subr.mxu0 %v7653_v41  ;;  %v1308_v53 = vmax.f32 %v1307_v52, 0.0 }
 0x220   :  { %6858 = vmatpush3.msra.mxu1 %v8718_v19  ;;  %6893 = vmatpush3.msra.mxu0 %v8723_v10 }
 0x221   :  { %6859 = vmatprep.subr.mxu1 %v7653_v41  ;;  %6894 = vmatprep.subr.mxu0 %v7653_v41  ;;  %1309 = vst.msk [vmem:[#allocation3 + $0x8] sm:$0xf] %vm760_vm2, %v1308_v53 }
 0x222   :  { %6860 = vmatpush3.msra.mxu1 %v8732_v22  ;;  %6895 = vmatpush3.msra.mxu0 %v8737_v23 }
 0x223   :  { %6861 = vmatprep.subr.mxu1 %v7653_v41  ;;  %6896 = vmatprep.subr.mxu0 %v7653_v41 }
 0x224   :  { %6862 = vmatpush3.msra.mxu1 %v8746_v26  ;;  %6863 = vmatprep.mubr.msk.f32.mxu1 %vm7654_vm1, %v7653_v41 }
 0x225   :  { %6897 = vmatpush3.msra.mxu0 %v8753_v27  ;;  %6898 = vmatprep.mubr.msk.f32.mxu0 %vm7654_vm1, %v7653_v41 }
 0x226   :  { %6864 = vmatmul.mubr.f32.vlgmr.msra.gmra.mxu1 %v2228_v54  ;;  %6899 = vmatmul.mubr.f32.vlgmr.msra.gmra.mxu0 %v2316_v55  ;;  %v2815_v54 = vld [vmem:[%s10268_s5 + $0x30] sm:$0xff]  ;;  %v2814_v55 = vld [vmem:[%s10268_s5 + $0x28] sm:$0xff] }
 0x227   :  { %6901 = vmatprep.subr.mxu1 %v7653_v41  ;;  %6936 = vmatprep.subr.mxu0 %v7653_v41 }
 0x228   :  { %6902 = vmatpush3.msra.mxu1 %v8767_v30  ;;  %6937 = vmatpush3.msra.mxu0 %v8592_v60  ;;  %v5147_v30 = vld [vmem:[%s10266_s3 + $0x148] sm:$0xff] }
 0x229   :  { %6903 = vmatprep.subr.mxu1 %v7653_v41  ;;  %6938 = vmatprep.subr.mxu0 %v7653_v41  ;;  %v2926_v16 = vld [vmem:[#allocation3 + $0x4] sm:$0xff] }
 0x22a   :  { %6904 = vmatpush3.msra.mxu1 %v8774_v24  ;;  %6939 = vmatpush3.msra.mxu0 %v8599_v61  ;;  %v5155_v24 = vld [vmem:[%s10268_s5 + $0x48] sm:$0xff] }
 0x22b   :  { %6905 = vmatprep.subr.mxu1 %v7653_v41  ;;  %6940 = vmatprep.subr.mxu0 %v7653_v41 }
 0x22c   :  { %6906 = vmatpush3.msra.mxu1 %v8783_v31  ;;  %6941 = vmatpush3.msra.mxu0 %v8608_v62  ;;  %v2414_v62 = vld [vmem:[#allocation2 + $0x34] sm:$0xf]  ;;  %v5146_v31 = vld [vmem:[%s10266_s3 + $0x140] sm:$0xff] }
 0x22d   :  { %6907 = vmatprep.subr.mxu1 %v7653_v41  ;;  %6942 = vmatprep.subr.mxu0 %v7653_v41 }
 0x22e   :  { %6908 = vmatpush3.msra.mxu1 %v8792_v33  ;;  %6943 = vmatpush3.msra.mxu0 %v8617_v63  ;;  %v2502_v63 = vld [vmem:[#allocation2 + $0x38] sm:$0xf]  ;;  %v5154_v33 = vld [vmem:[%s10268_s5 + $0x40] sm:$0xff] }
 0x22f   :  { %6909 = vmatprep.subr.mxu1 %v7653_v41  ;;  %6944 = vmatprep.subr.mxu0 %v7653_v41 }
 0x230   :  { %6910 = vmatpush3.msra.mxu1 %v8801_v34  ;;  %6945 = vmatpush3.msra.mxu0 %v8626_v0  ;;  %v5153_v0 = vld [vmem:[%s10266_s3 + $0x178] sm:$0xff] }
 0x231   :  { %6911 = vmatprep.subr.mxu1 %v7653_v41  ;;  %6946 = vmatprep.subr.mxu0 %v7653_v41  ;;  %v5145_v34 = vld [vmem:[%s10266_s3 + $0x138] sm:$0xff] }
 0x232   :  { %6912 = vmatpush3.msra.mxu1 %v8810_v35  ;;  %6947 = vmatpush3.msra.mxu0 %v8635_v1  ;;  %v5161_v1 = vld [vmem:[%s10268_s5 + $0x78] sm:$0xff] }
 0x233   :  { %6913 = vmatprep.subr.mxu1 %v7653_v41  ;;  %6948 = vmatprep.subr.mxu0 %v7653_v41 }
 0x234   :  { %6914 = vmatpush3.msra.mxu1 %v8819_v36  ;;  %6949 = vmatpush3.msra.mxu0 %v8644_v2  ;;  %v9139_v2 = vld [vmem:[#allocation3] sm:$0xff]  ;;  %v5144_v36 = vld [vmem:[%s10266_s3 + $0x130] sm:$0xff] }
 0x235   :  { %6915 = vmatprep.subr.mxu1 %v7653_v41  ;;  %6950 = vmatprep.subr.mxu0 %v7653_v41 }
 0x236   :  { %6916 = vmatpush3.msra.mxu1 %v8828_v37  ;;  %6951 = vmatpush3.msra.mxu0 %v8653_v3  ;;  %v5152_v3 = vld [vmem:[%s10266_s3 + $0x170] sm:$0xff]  ;;  %v5143_v37 = vld [vmem:[%s10266_s3 + $0x128] sm:$0xff] }
 0x237   :  { %6917 = vmatprep.subr.mxu1 %v7653_v41  ;;  %6952 = vmatprep.subr.mxu0 %v7653_v41 }
 0x238   :  { %6918 = vmatpush3.msra.mxu1 %v8837_v38  ;;  %6953 = vmatpush3.msra.mxu0 %v8662_v4  ;;  %v5160_v4 = vld [vmem:[%s10268_s5 + $0x70] sm:$0xff] }
 0x239   :  { %6919 = vmatprep.subr.mxu1 %v7653_v41  ;;  %6954 = vmatprep.subr.mxu0 %v7653_v41 }
 0x23a   :  { %6920 = vmatpush3.msra.mxu1 %v8846_v40  ;;  %6955 = vmatpush3.msra.mxu0 %v8671_v5  ;;  %v5151_v5 = vld [vmem:[%s10266_s3 + $0x168] sm:$0xff]  ;;  %v5142_v40 = vld [vmem:[%s10266_s3 + $0x120] sm:$0xff] }
 0x23b   :  { %6921 = vmatprep.subr.mxu1 %v7653_v41  ;;  %6956 = vmatprep.subr.mxu0 %v7653_v41 }
 0x23c   :  { %6922 = vmatpush3.msra.mxu1 %v8855_v32  ;;  %6957 = vmatpush3.msra.mxu0 %v8680_v6  ;;  %v9105_v56 = vpop.f32.mrf.mxu1  ;;  %v9107_v57 = vpop.f32.mrf.mxu0  ;;  %v5159_v6 = vld [vmem:[%s10268_s5 + $0x68] sm:$0xff] }
 0x23d   :  { %6923 = vmatprep.subr.mxu1 %v7653_v41  ;;  %6958 = vmatprep.subr.mxu0 %v7653_v41  ;;  %v1405_v35 = vadd.f32 %v8694_v8, %v9105_v56  ;;  %v2813_v56 = vld [vmem:[%s10268_s5 + $0x20] sm:$0xff] }
 0x23e   :  { %6924 = vmatpush3.msra.mxu1 %v8864_v11  ;;  %6959 = vmatpush3.msra.mxu0 %v8689_v7  ;;  %v6515_v60 = vpop.f32.mrf.mxu1  ;;  %v6550_v61 = vpop.f32.mrf.mxu0  ;;  %v5150_v7 = vld [vmem:[%s10266_s3 + $0x160] sm:$0xff] }
 0x23f   :  { %6925 = vmatprep.subr.mxu1 %v7653_v41  ;;  %6960 = vmatprep.subr.mxu0 %v7653_v41  ;;  %v1493_v38 = vadd.f32 %v9107_v57, %v1405_v35  ;;  %v2812_v57 = vld [vmem:[%s10268_s5 + $0x18] sm:$0xff]  ;;  %v2811_v60 = vld [vmem:[%s10268_s5 + $0x10] sm:$0xff]  ;;  %v2810_v61 = vld [vmem:[%s10268_s5 + $0x8] sm:$0xff] }
 0x240   :  { %6926 = vmatpush3.msra.mxu1 %v8877_v14  ;;  %6961 = vmatpush3.msra.mxu0 %v8703_v9  ;;  %v5158_v9 = vld [vmem:[%s10268_s5 + $0x60] sm:$0xff]  ;;  %v5141_v14 = vld [vmem:[%s10266_s3 + $0x118] sm:$0xff] }
 0x241   :  { %6927 = vmatprep.subr.mxu1 %v7653_v41  ;;  %6962 = vmatprep.subr.mxu0 %v7653_v41 }
 0x242   :  { %6928 = vmatpush3.msra.mxu1 %v8886_v42  ;;  %6963 = vmatpush3.msra.mxu0 %v8718_v19  ;;  %v5157_v19 = vld [vmem:[%s10268_s5 + $0x58] sm:$0xff] }
 0x243   :  { %6929 = vmatprep.subr.mxu1 %v7653_v41  ;;  %6964 = vmatprep.subr.mxu0 %v7653_v41 }
 0x244   :  { %6930 = vmatpush3.msra.mxu1 %v8895_v44  ;;  %6965 = vmatpush3.msra.mxu0 %v8732_v22  ;;  %v5148_v22 = vld [vmem:[%s10266_s3 + $0x150] sm:$0xff]  ;;  %s4841_s3 = sshll.u32 %s7655_s24, 4  ;;  %s4842_s3 = int_to_ptr.vmem [resolvable:$true] %s4841_s3 }
 0x245   :  { %6931 = vmatprep.subr.mxu1 %v7653_v41  ;;  %6966 = vmatprep.subr.mxu0 %v7653_v41  ;;  %s7631_s25 = scalar_lea.vmem %s4842_s3, 32  ;;  %p7636_p1 = scmp.lt.s32.totalorder %s4842_s3, %s4842_s3 }
 0x246   :  { %6932 = vmatpush3.msra.mxu1 %v8904_v58  ;;  %6933 = vmatprep.mubr.msk.f32.mxu1 %vm7654_vm1, %v7653_v41  ;;  %v5178_v58 = vld [vmem:[%s10268_s5 + $0xb8] sm:$0xff]  ;;  %p7632_p0 = scmp.ne.s32.totalorder %s4842_s3, %s7631_s25  ;;  %p7637_p2 = scmp.lt.s32.totalorder %s7631_s25, %s7631_s25 }
 0x247   :  { %6967 = vmatpush3.msra.mxu0 %v8746_v26  ;;  %6968 = vmatprep.mubr.msk.f32.mxu0 %vm7654_vm1, %v7653_v41  ;;  %v5156_v26 = vld [vmem:[%s10268_s5 + $0x50] sm:$0xff] }
 0x248   :  { %6934 = vmatmul.mubr.f32.vlgmr.msra.gmra.mxu1 %v2414_v62  ;;  %6969 = vmatmul.mubr.f32.vlgmr.msra.gmra.mxu0 %v2502_v63  ;;  %v2809_v62 = vld [vmem:[%s10268_s5] sm:$0xff]  ;;  %p7638_p3 = por %p7637_p2, %p7636_p1 }
 0x249   :  { %6971 = vmatprep.subr.mxu1 %v7653_v41  ;;  %7022 = vmatprep.mubr.msk.f32.mxu0 %vm72_vm0, %v9139_v2  ;;  %v5055_v63 = vld [vmem:[%s10267_s4] ss:$0 sm:$0xff] }
 0x24a   :  { %6972 = vmatpush3.msra.mxu1 %v5153_v0  ;;  %7006 = vmatprep.subr.mxu0 %v5161_v1  ;;  %p7639_p4 = pnand %p7638_p3, %p7632_p0 }
 0x24b   :  { %6973 = vmatprep.subr.mxu1 %v7653_v41  ;;  %7007 = vmatpush3.msra.mxu0 %v5161_v1 }
 0x24c   :  { %6974 = vmatpush3.msra.mxu1 %v5152_v3  ;;  %7003 = vmatprep.mubr.msk.f32.mxu1 %vm7654_vm1, %v7653_v41 }
 0x24d   :  { %6975 = vmatprep.subr.mxu1 %v7653_v41  ;;  %7008 = vmatprep.subr.mxu0 %v5160_v4 }
 0x24e   :  { %6976 = vmatpush3.msra.mxu1 %v5151_v5  ;;  %7009 = vmatpush3.msra.mxu0 %v5160_v4 }
 0x24f   :  { %6977 = vmatprep.subr.mxu1 %v7653_v41  ;;  %7010 = vmatprep.subr.mxu0 %v5159_v6 }
 0x250   :  { %6978 = vmatpush3.msra.mxu1 %v5150_v7  ;;  %7011 = vmatpush3.msra.mxu0 %v5159_v6 }
 0x251   :  { %6979 = vmatprep.subr.mxu1 %v7653_v41  ;;  %7012 = vmatprep.subr.mxu0 %v5158_v9 }
 0x252   :  { %6980 = vmatpush3.msra.mxu1 %v5149_v39  ;;  %7013 = vmatpush3.msra.mxu0 %v5158_v9 }
 0x253   :  { %6981 = vmatprep.subr.mxu1 %v7653_v41  ;;  %7014 = vmatprep.subr.mxu0 %v5157_v19 }
 0x254   :  { %6982 = vmatpush3.msra.mxu1 %v5148_v22  ;;  %7015 = vmatpush3.msra.mxu0 %v5157_v19 }
 0x255   :  { %6983 = vmatprep.subr.mxu1 %v7653_v41  ;;  %7016 = vmatprep.subr.mxu0 %v5156_v26 }
 0x256   :  { %6984 = vmatpush3.msra.mxu1 %v5147_v30  ;;  %7017 = vmatpush3.msra.mxu0 %v5156_v26 }
 0x257   :  { %6985 = vmatprep.subr.mxu1 %v7653_v41  ;;  %7018 = vmatprep.subr.mxu0 %v5155_v24 }
 0x258   :  { %6986 = vmatpush3.msra.mxu1 %v5146_v31  ;;  %7019 = vmatpush3.msra.mxu0 %v5155_v24 }
 0x259   :  { %6987 = vmatprep.subr.mxu1 %v7653_v41  ;;  %7020 = vmatprep.subr.mxu0 %v5154_v33 }
 0x25a   :  { %6988 = vmatpush3.msra.mxu1 %v5145_v34  ;;  %7021 = vmatpush3.msra.mxu0 %v5154_v33 }
 0x25b   :  { %6989 = vmatprep.subr.mxu1 %v7653_v41 }
 0x25c   :  { %6990 = vmatpush3.msra.mxu1 %v5144_v36 }
 0x25d   :  { %6991 = vmatprep.subr.mxu1 %v7653_v41 }
 0x25e   :  { %6992 = vmatpush3.msra.mxu1 %v5143_v37  ;;  %v1577_v32 = vpop.f32.mrf.mxu1  ;;  %v1675_v11 = vpop.f32.mrf.mxu0 }
 0x25f   :  { %6993 = vmatprep.subr.mxu1 %v7653_v41  ;;  %v1581_v43 = vadd.f32 %v1577_v32, %v1493_v38  ;;  %v1679_v25 = vadd.f32 %v8694_v8, %v1675_v11  ;;  %v2816_v8 = vld [vmem:[%s10268_s5 + $0x38] sm:$0xff] }
 0x260   :  { %6994 = vmatpush3.msra.mxu1 %v5142_v40  ;;  %v6585_v45 = vpop.f32.mrf.mxu1  ;;  %v6620_v42 = vpop.f32.mrf.mxu0  ;;  %7028 = vmatprep.subr.mxu0 %v2816_v8 }
 0x261   :  { %6995 = vmatprep.subr.mxu1 %v7653_v41  ;;  %v1582_v44 = vmax.f32 %v1581_v43, 0.0  ;;  %v9293_v43 = vld [vmem:[%s10269_s6] ss:$0 sm:$0xff] }
 0x262   :  { %6996 = vmatpush3.msra.mxu1 %v5141_v14 }
 0x263   :  { %6997 = vmatprep.subr.mxu1 %v7653_v41  ;;  %1583 = vst.msk [vmem:[#allocation3 + $0xc] sm:$0xf] %vm760_vm2, %v1582_v44 }
 0x264   :  { %6998 = vmatpush3.msra.mxu1 %v8723_v10 }
 0x265   :  { %6999 = vmatprep.subr.mxu1 %v7653_v41 }
 0x266   :  { %7000 = vmatpush3.msra.mxu1 %v8737_v23  ;;  %v5176_v23 = vld [vmem:[%s10268_s5 + $0xa8] sm:$0xff] }
 0x267   :  { %7001 = vmatprep.subr.mxu1 %v7653_v41 }
 0x268   :  { %7002 = vmatpush3.msra.mxu1 %v8753_v27  ;;  %v5175_v27 = vld [vmem:[%s10268_s5 + $0xa0] sm:$0xff] }
 0x269   :  { %7004 = vmatmul.mubr.f32.vlgmr.msra.gmra.mxu1 %v2590_v59  ;;  %7050 = vmatprep.subr.mxu1 %v5178_v58 }
 0x26a   :  { %7066 = vmatprep.mubr.msk.f32.mxu1 %vm72_vm0, %v2926_v16  ;;  %v9232_v10 = vld [vmem:[#allocation3 + $0x8] sm:$0xff]  ;;  %7051 = vmatpush3.msra.mxu1 %v5178_v58 }
 0x26b   :  { %7023 = vmatmul.mubr.msk.f32.vlgmr.msra.gmra.mxu0 %vm72_vm0, %v9232_v10  ;;  %7052 = vmatprep.subr.mxu1 %v5177_v15 }
 0x26c   :  { %7053 = vmatpush3.msra.mxu1 %v5177_v15  ;;  %7029 = vmatpush3.msra.mxu0 %v2816_v8  ;;  %v9439_v8 = vld [vmem:[%s10270_s7 + $0xb0] sm:$0xff] }
 0x26d   :  { %7054 = vmatprep.subr.mxu1 %v5176_v23  ;;  %7030 = vmatprep.subr.mxu0 %v2815_v54 }
 0x26e   :  { %7055 = vmatpush3.msra.mxu1 %v5176_v23  ;;  %7031 = vmatpush3.msra.mxu0 %v2815_v54  ;;  %v9444_v54 = vld [vmem:[%s10270_s7 + $0x130] sm:$0xff] }
 0x26f   :  { %7056 = vmatprep.subr.mxu1 %v5175_v27  ;;  %7032 = vmatprep.subr.mxu0 %v2814_v55 }
 0x270   :  { %7057 = vmatpush3.msra.mxu1 %v5175_v27  ;;  %7033 = vmatpush3.msra.mxu0 %v2814_v55  ;;  %v9453_v55 = vld [vmem:[%s10270_s7 + $0xa8] sm:$0xff] }
 0x271   :  { %7058 = vmatprep.subr.mxu1 %v5174_v17  ;;  %7034 = vmatprep.subr.mxu0 %v2813_v56 }
 0x272   :  { %7059 = vmatpush3.msra.mxu1 %v5174_v17  ;;  %7035 = vmatpush3.msra.mxu0 %v2813_v56  ;;  %v9458_v56 = vld [vmem:[%s10270_s7 + $0x128] sm:$0xff] }
 0x273   :  { %7060 = vmatprep.subr.mxu1 %v5173_v21  ;;  %7036 = vmatprep.subr.mxu0 %v2812_v57 }
 0x274   :  { %7061 = vmatpush3.msra.mxu1 %v5173_v21  ;;  %7037 = vmatpush3.msra.mxu0 %v2812_v57  ;;  %v9313_v21 = vld [vmem:[%s10270_s7 + $0xf8] sm:$0xff]  ;;  %v9467_v57 = vld [vmem:[%s10270_s7 + $0xa0] sm:$0xff] }
 0x275   :  { %7062 = vmatprep.subr.mxu1 %v5172_v20  ;;  %7038 = vmatprep.subr.mxu0 %v2811_v60 }
 0x276   :  { %7063 = vmatpush3.msra.mxu1 %v5172_v20  ;;  %7039 = vmatpush3.msra.mxu0 %v2811_v60  ;;  %v9332_v20 = vld [vmem:[%s10270_s7 + $0x170] sm:$0xff]  ;;  %v9472_v60 = vld [vmem:[%s10270_s7 + $0x120] sm:$0xff] }
 0x277   :  { %7064 = vmatprep.subr.mxu1 %v5171_v18  ;;  %7040 = vmatprep.subr.mxu0 %v2810_v61 }
 0x278   :  { %7065 = vmatpush3.msra.mxu1 %v5171_v18  ;;  %7041 = vmatpush3.msra.mxu0 %v2810_v61  ;;  %v9341_v18 = vld [vmem:[%s10270_s7 + $0xe8] sm:$0xff]  ;;  %v9481_v61 = vld [vmem:[%s10270_s7 + $0x98] sm:$0xff] }
 0x279   :  { %7107 = vmatprep.subr.mxu1 %v7653_v41  ;;  %7042 = vmatprep.subr.mxu0 %v2809_v62 }
 0x27a   :  { %7043 = vmatpush3.msra.mxu0 %v2809_v62  ;;  %v9486_v62 = vld [vmem:[%s10270_s7 + $0x118] sm:$0xff] }
 0x27b   :  { %7072 = vmatprep.subr.mxu0 %v7653_v41 }
 0x280   :  { %v1763_v28 = vpop.f32.mrf.mxu1  ;;  %v1851_v29 = vpop.f32.mrf.mxu0 }
 0x281   :  { %v1767_v12 = vadd.f32 %v1763_v28, %v1679_v25  ;;  %v9346_v25 = vld [vmem:[%s10270_s7 + $0x168] sm:$0xff]  ;;  %v9355_v28 = vld [vmem:[%s10270_s7 + $0xe0] sm:$0xff] }
 0x282   :  { %v6655_v13 = vpop.f32.mrf.mxu1  ;;  %v6690_v46 = vpop.f32.mrf.mxu0 }
 0x283   :  { %v1855_v47 = vadd.f32 %v1851_v29, %v1767_v12  ;;  %v9360_v29 = vld [vmem:[%s10270_s7 + $0x160] sm:$0xff]  ;;  %v9369_v12 = vld [vmem:[%s10270_s7 + $0xd8] sm:$0xff]  ;;  %v9383_v46 = vld [vmem:[%s10270_s7 + $0xd0] sm:$0xff] }
 0x284   :  { %v9374_v13 = vld [vmem:[%s10270_s7 + $0x158] sm:$0xff] }
 0x285   :  { %v1856_v48 = vmax.f32 %v1855_v47, 0.0  ;;  %v9388_v47 = vld [vmem:[%s10270_s7 + $0x150] sm:$0xff] }
 0x287   :  { %1857 = vst.msk [vmem:[#allocation3 + $0x10] sm:$0xf] %vm760_vm2, %v1856_v48  ;;  %v9397_v48 = vld [vmem:[%s10270_s7 + $0xc8] sm:$0xff] }
 0x28e   :  { %v2927_v49 = vld [vmem:[#allocation3 + $0xc] sm:$0xff] }
 0x28f   :  { %7067 = vmatmul.mubr.msk.f32.vlgmr.msra.gmra.mxu1 %vm72_vm0, %v2927_v49  ;;  %v9402_v49 = vld [vmem:[%s10270_s7 + $0x148] sm:$0xff] }
 0x2a2   :  { %v1949_v50 = vpop.f32.mrf.mxu1  ;;  %v2037_v51 = vpop.f32.mrf.mxu0 }
 0x2a3   :  { %v1953_v0 = vadd.f32 %v5055_v63, %v1949_v50  ;;  %v9411_v50 = vld [vmem:[%s10270_s7 + $0xc0] sm:$0xff] }
 0x2a4   :  { %v6725_v52 = vpop.f32.mrf.mxu1  ;;  %v6760_v53 = vpop.f32.mrf.mxu0 }
 0x2a5   :  { %v2041_v1 = vadd.f32 %v2037_v51, %v1953_v0  ;;  %v9416_v51 = vld [vmem:[%s10270_s7 + $0x140] sm:$0xff]  ;;  %v9425_v52 = vld [vmem:[%s10270_s7 + $0xb8] sm:$0xff]  ;;  %v9500_v0 = vld [vmem:[%s10270_s7 + $0x110] sm:$0xff] }
 0x2a6   :  { %v9430_v53 = vld [vmem:[%s10270_s7 + $0x138] sm:$0xff] }
 0x2c4   :  { %v2125_v3 = vpop.f32.mrf.mxu1  ;;  %v2223_v4 = vpop.f32.mrf.mxu0 }
 0x2c5   :  { %v2129_v5 = vadd.f32 %v2125_v3, %v2041_v1  ;;  %v2227_v19 = vadd.f32 %v5055_v63, %v2223_v4  ;;  %v9509_v1 = vld [vmem:[%s10270_s7 + $0x88] sm:$0xff]  ;;  %v9523_v4 = vld [vmem:[%s10270_s7 + $0x80] sm:$0xff] }
 0x2c6   :  { %v6795_v6 = vpop.f32.mrf.mxu1  ;;  %v6830_v7 = vpop.f32.mrf.mxu0  ;;  %v9514_v3 = vld [vmem:[%s10270_s7 + $0x108] sm:$0xff] }
 0x2c7   :  { %v2130_v9 = vmax.f32 %v2129_v5, 0.0  ;;  %v9528_v5 = vld [vmem:[%s10270_s7 + $0x100] sm:$0xff] }
 0x2c9   :  { %2131 = vst.msk [vmem:[#allocation3 + $0x14] sm:$0xf] %vm760_vm2, %v2130_v9 }
 0x2d0   :  { %v2682_v39 = vld [vmem:[#allocation3 + $0x10] sm:$0xff] }
 0x2d1   :  { %7025 = vmatprep.mubr.msk.f32.mxu0 %vm72_vm0, %v2682_v39 }
 0x2e6   :  { %v2311_v22 = vpop.f32.mrf.mxu1  ;;  %v2399_v26 = vpop.f32.mrf.mxu0 }
 0x2e7   :  { %v2315_v30 = vadd.f32 %v2311_v22, %v2227_v19 }
 0x2e8   :  { %v6865_v24 = vpop.f32.mrf.mxu1  ;;  %v6900_v31 = vpop.f32.mrf.mxu0 }
 0x2e9   :  { %v2403_v33 = vadd.f32 %v2399_v26, %v2315_v30 }
 0x2eb   :  { %v2404_v34 = vmax.f32 %v2403_v33, 0.0 }
 0x2ed   :  { %2405 = vst.msk [vmem:[#allocation3 + $0x18] sm:$0xf] %vm760_vm2, %v2404_v34 }
 0x2f4   :  { %v2928_v35 = vld [vmem:[#allocation3 + $0x14] sm:$0xff] }
 0x2f5   :  { %7069 = vmatprep.mubr.msk.f32.mxu1 %vm72_vm0, %v2928_v35  ;;  %v2808_v17 = vld [vmem:[#allocation3 + $0x18] sm:$0xf] }
 0x308   :  { %v2497_v36 = vpop.f32.mrf.mxu1  ;;  %v2585_v37 = vpop.f32.mrf.mxu0 }
 0x309   :  { %v2501_v32 = vadd.f32 %v5055_v63, %v2497_v36  ;;  %v9495_v63 = vld [vmem:[%s10270_s7 + $0x90] sm:$0xff] }
 0x30a   :  { %v6935_v38 = vpop.f32.mrf.mxu1  ;;  %v6970_v40 = vpop.f32.mrf.mxu0 }
 0x30b   :  { %v2589_v11 = vadd.f32 %v2585_v37, %v2501_v32 }
 0x329   :  { %v2673_v14 = vpop.f32.mrf.mxu1 }
 0x32a   :  { %v2677_v45 = vadd.f32 %v2673_v14, %v2589_v11 }
 0x32b   :  { %v7005_v42 = vpop.f32.mrf.mxu1  ;;  %v7024_v44 = vpop.f32.mrf.mxu0 }
 0x32c   :  { %v2678_v58 = vmax.f32 %v2677_v45, 0.0  ;;  %v2784_v59 = vadd.f32 %v7024_v44, %v9293_v43 }
 0x32d   :  { %v2778_v15 = vpop.f32.mrf.mxu0 }
 0x32e   :  { %2679 = vst.msk [vmem:[#allocation3 + $0x1c] sm:$0xf] %vm760_vm2, %v2678_v58  ;;  %2798 = vst [vmem:[#allocation4 + $0x8] sm:$0xff] %v2784_v59  ;;  %v2779_v16 = vadd.f32 %v9293_v43, %v2778_v15 }
 0x330   :  { %2797 = vst [vmem:[#allocation4] sm:$0xff] %v2779_v16 }
 0x335   :  { %v2683_v23 = vld [vmem:[#allocation3 + $0x18] sm:$0xff] }
 0x336   :  { %v2929_v27 = vld [vmem:[#allocation3 + $0x1c] sm:$0xf]  ;;  %7026 = vmatmul.mubr.msk.f32.gmra.mxu0 %vm72_vm0, %v2683_v23 }
 0x337   :  { %7070 = vmatmul.mubr.msk.f32.gmra.mxu1 %vm72_vm0, %v2929_v27  ;;  %7044 = vmatprep.mubr.msk.f32.mxu0 %vm72_vm0, %v9139_v2  ;;  %v9318_v2 = vld [vmem:[%s10270_s7 + $0x178] sm:$0xff]  ;;  %v2801_v22 = vld [vmem:[#allocation4 + $0x4] sm:$0xff] }
 0x338   :  { %7139 = vmatprep.mubr.msk.f32.mxu1 %vm7654_vm1, %v7653_v41  ;;  %7108 = vmatpush3.msra.mxu1 %v9318_v2 }
 0x339   :  { %7109 = vmatprep.subr.mxu1 %v7653_v41 }
 0x33a   :  { %7045 = vmatmul.mubr.msk.f32.vlgmr.msra.gmra.mxu0 %vm72_vm0, %v9232_v10  ;;  %v9327_v10 = vld [vmem:[%s10270_s7 + $0xf0] sm:$0xff]  ;;  %7110 = vmatpush3.msra.mxu1 %v9332_v20 }
 0x33b   :  { %7047 = vmatprep.mubr.msk.f32.mxu0 %vm72_vm0, %v2682_v39  ;;  %7073 = vmatpush3.msra.mxu0 %v9313_v21 }
 0x33c   :  { %7074 = vmatprep.subr.mxu0 %v7653_v41  ;;  %7111 = vmatprep.subr.mxu1 %v7653_v41 }
 0x33d   :  { %7075 = vmatpush3.msra.mxu0 %v9327_v10  ;;  %7112 = vmatpush3.msra.mxu1 %v9346_v25 }
 0x33e   :  { %7048 = vmatmul.mubr.msk.f32.gmra.mxu0 %vm72_vm0, %v2808_v17  ;;  %7076 = vmatprep.subr.mxu0 %v7653_v41 }
 0x33f   :  { %7104 = vmatprep.mubr.msk.f32.mxu0 %vm7654_vm1, %v7653_v41  ;;  %7077 = vmatpush3.msra.mxu0 %v9341_v18 }
 0x340   :  { %7078 = vmatprep.subr.mxu0 %v7653_v41  ;;  %7113 = vmatprep.subr.mxu1 %v7653_v41 }
 0x341   :  { %7079 = vmatpush3.msra.mxu0 %v9355_v28  ;;  %7114 = vmatpush3.msra.mxu1 %v9360_v29 }
 0x342   :  { %7080 = vmatprep.subr.mxu0 %v7653_v41  ;;  %7115 = vmatprep.subr.mxu1 %v7653_v41 }
 0x343   :  { %7081 = vmatpush3.msra.mxu0 %v9369_v12  ;;  %7116 = vmatpush3.msra.mxu1 %v9374_v13 }
 0x344   :  { %7082 = vmatprep.subr.mxu0 %v7653_v41  ;;  %7117 = vmatprep.subr.mxu1 %v7653_v41 }
 0x345   :  { %7083 = vmatpush3.msra.mxu0 %v9383_v46  ;;  %7118 = vmatpush3.msra.mxu1 %v9388_v47 }
 0x346   :  { %7084 = vmatprep.subr.mxu0 %v7653_v41  ;;  %7119 = vmatprep.subr.mxu1 %v7653_v41 }
 0x347   :  { %7085 = vmatpush3.msra.mxu0 %v9397_v48  ;;  %7120 = vmatpush3.msra.mxu1 %v9402_v49 }
 0x348   :  { %7086 = vmatprep.subr.mxu0 %v7653_v41  ;;  %7121 = vmatprep.subr.mxu1 %v7653_v41 }
 0x349   :  { %7087 = vmatpush3.msra.mxu0 %v9411_v50  ;;  %7122 = vmatpush3.msra.mxu1 %v9416_v51 }
 0x34a   :  { %7088 = vmatprep.subr.mxu0 %v7653_v41  ;;  %7123 = vmatprep.subr.mxu1 %v7653_v41 }
 0x34b   :  { %7089 = vmatpush3.msra.mxu0 %v9425_v52  ;;  %7124 = vmatpush3.msra.mxu1 %v9430_v53 }
 0x34c   :  { %7090 = vmatprep.subr.mxu0 %v7653_v41  ;;  %7125 = vmatprep.subr.mxu1 %v7653_v41 }
 0x34d   :  { %7091 = vmatpush3.msra.mxu0 %v9439_v8  ;;  %7126 = vmatpush3.msra.mxu1 %v9444_v54 }
 0x34e   :  { %7092 = vmatprep.subr.mxu0 %v7653_v41  ;;  %7127 = vmatprep.subr.mxu1 %v7653_v41 }
 0x34f   :  { %7093 = vmatpush3.msra.mxu0 %v9453_v55  ;;  %7128 = vmatpush3.msra.mxu1 %v9458_v56  ;;  %v7068_v34 = vpop.f32.mrf.mxu1 }
 0x350   :  { %7094 = vmatprep.subr.mxu0 %v7653_v41  ;;  %7129 = vmatprep.subr.mxu1 %v7653_v41 }
 0x351   :  { %7095 = vmatpush3.msra.mxu0 %v9467_v57  ;;  %7130 = vmatpush3.msra.mxu1 %v9472_v60  ;;  %v3017_v32 = vpop.f32.mrf.mxu1 }
 0x352   :  { %7096 = vmatprep.subr.mxu0 %v7653_v41  ;;  %7131 = vmatprep.subr.mxu1 %v7653_v41 }
 0x353   :  { %7097 = vmatpush3.msra.mxu0 %v9481_v61  ;;  %7132 = vmatpush3.msra.mxu1 %v9486_v62 }
 0x354   :  { %7098 = vmatprep.subr.mxu0 %v7653_v41  ;;  %7133 = vmatprep.subr.mxu1 %v7653_v41 }
 0x355   :  { %7099 = vmatpush3.msra.mxu0 %v9495_v63  ;;  %7134 = vmatpush3.msra.mxu1 %v9500_v0 }
 0x356   :  { %7100 = vmatprep.subr.mxu0 %v7653_v41  ;;  %7135 = vmatprep.subr.mxu1 %v7653_v41 }
 0x357   :  { %7101 = vmatpush3.msra.mxu0 %v9509_v1  ;;  %7136 = vmatpush3.msra.mxu1 %v9514_v3 }
 0x358   :  { %7102 = vmatprep.subr.mxu0 %v7653_v41  ;;  %7137 = vmatprep.subr.mxu1 %v7653_v41 }
 0x359   :  { %7103 = vmatpush3.msra.mxu0 %v9523_v4  ;;  %7138 = vmatpush3.msra.mxu1 %v9528_v5 }
 0x35a   :  { %7142 = vmatprep.subr.mxu0 %v7653_v41  ;;  %7177 = vmatprep.subr.mxu1 %v7653_v41 }
 0x3f6   :  { %v7027_v6 = vpop.f32.mrf.mxu0 }
 0x3f7   :  { %v2794_v7 = vadd.f32 %v7027_v6, %v9293_v43  ;;  %v9539_v6 = vld [vmem:[%s10270_s7 + $0x78] sm:$0xff] }
 0x3f8   :  { %v2788_v9 = vpop.f32.mrf.mxu0 }
 0x3f9   :  { %2800 = vst [vmem:[#allocation4 + $0x18] sm:$0xff] %v2794_v7  ;;  %v2789_v39 = vadd.f32 %v9293_v43, %v2788_v9  ;;  %v7071_v43 = vpop.f32.mrf.mxu1 }
 0x3fa   :  { %v7046_v19 = vpop.f32.mrf.mxu0 }
 0x3fb   :  { %2799 = vst [vmem:[#allocation4 + $0x10] sm:$0xff] %v2789_v39  ;;  %v3027_v42 = vpop.f32.mrf.mxu1  ;;  %v9544_v39 = vld [vmem:[%s10270_s7 + $0x70] sm:$0xff] }
 0x3fc   :  { %v2895_v26 = vpop.f32.mrf.mxu0 }
 0x3fd   :  { %v2914_v30 = vadd.f32 %v2895_v26, %v2801_v22 }
 0x3fe   :  { %v7049_v24 = vpop.f32.mrf.mxu0 }
 0x3ff   :  { %2918 = vst [vmem:[#allocation4 + $0x4] sm:$0xff] %v2914_v30  ;;  %v9562_v30 = vld [vmem:[%s10270_s7 + $0x60] sm:$0xff] }
 0x400   :  { %v2804_v31 = vld [vmem:[#allocation4 + $0x1c] sm:$0xf]  ;;  %v2905_v37 = vpop.f32.mrf.mxu0 }
 0x401   :  { %v2917_v33 = vadd.f32 %v7049_v24, %v2804_v31  ;;  %v9571_v24 = vld [vmem:[%s10270_s7 + $0x58] sm:$0xff]  ;;  %v9580_v31 = vld [vmem:[%s10270_s7 + $0x50] sm:$0xff] }
 0x402   :  { %v2802_v35 = vld [vmem:[#allocation4 + $0xc] sm:$0xff]  ;;  %v2803_v36 = vld [vmem:[#allocation4 + $0x14] sm:$0xff] }
 0x403   :  { %v2915_v38 = vadd.f32 %v7046_v19, %v2802_v35  ;;  %2921 = vst [vmem:[#allocation4 + $0x1c] sm:$0xf] %v2917_v33  ;;  %v2916_v40 = vadd.f32 %v2905_v37, %v2803_v36  ;;  %v9553_v19 = vld [vmem:[%s10270_s7 + $0x68] sm:$0xff]  ;;  %v9607_v35 = vld [vmem:[%s10270_s7 + $0x38] sm:$0xff]  ;;  %v9616_v36 = vld [vmem:[%s10270_s7 + $0x30] sm:$0xff] }
 0x404   :  { %v9589_v33 = vld [vmem:[%s10270_s7 + $0x48] sm:$0xff] }
 0x405   :  { %2919 = vst [vmem:[#allocation4 + $0xc] sm:$0xff] %v2915_v38  ;;  %2920 = vst [vmem:[#allocation4 + $0x14] sm:$0xff] %v2916_v40  ;;  %v9625_v37 = vld [vmem:[%s10270_s7 + $0x28] sm:$0xff]  ;;  %v9634_v38 = vld [vmem:[%s10270_s7 + $0x20] sm:$0xff] }
 0x406   :  { %v2922_v11 = vld [vmem:[#allocation4] sm:$0xff]  ;;  %v9643_v40 = vld [vmem:[%s10270_s7 + $0x18] sm:$0xff] }
 0x407   :  { %v3036_v14 = vadd.f32 %v3017_v32, %v2922_v11  ;;  %v9652_v32 = vld [vmem:[%s10270_s7 + $0x10] sm:$0xff]  ;;  %v9661_v11 = vld [vmem:[%s10270_s7 + $0x8] sm:$0xff] }
 0x409   :  { %v3048_v45 = vmax.f32 %v3036_v14, 0.0  ;;  %v9670_v14 = vld [vmem:[%s10270_s7] sm:$0xff] }
 0x40b   :  { %3052 = vst [vmem:[#allocation4] sm:$0xff] %v3048_v45 }
 0x40c   :  { %v2923_v44 = vld [vmem:[#allocation4 + $0x8] sm:$0xff]  ;;  %v2924_v58 = vld [vmem:[#allocation4 + $0x10] sm:$0xff]  ;;  %v2925_v59 = vld [vmem:[#allocation4 + $0x18] sm:$0xf] }
 0x40d   :  { %v3037_v15 = vadd.f32 %v7068_v34, %v2923_v44  ;;  %v3038_v16 = vadd.f32 %v3027_v42, %v2924_v58  ;;  %v3039_v23 = vadd.f32 %v7071_v43, %v2925_v59  ;;  %v9598_v34 = vld [vmem:[%s10270_s7 + $0x40] sm:$0xff]  ;;  %v4165_v58 = vld [vmem:[%s10273_s10 + $0x38] sm:$0xff] }
 0x40f   :  { %v3049_v27 = vmax.f32 %v3037_v15, 0.0  ;;  %3043 = vst [vmem:[#allocation4 + $0x18] sm:$0xf] %v3039_v23  ;;  %v3050_v17 = vmax.f32 %v3038_v16, 0.0  ;;  %v4164_v15 = vld [vmem:[%s10273_s10 + $0x30] sm:$0xff]  ;;  %v4163_v16 = vld [vmem:[%s10273_s10 + $0x28] sm:$0xff] }
 0x410   :  { %v4162_v23 = vld [vmem:[%s10273_s10 + $0x20] sm:$0xff] }
 0x411   :  { %3053 = vst [vmem:[#allocation4 + $0x8] sm:$0xff] %v3049_v27  ;;  %3054 = vst [vmem:[#allocation4 + $0x10] sm:$0xff] %v3050_v17  ;;  %v4161_v27 = vld [vmem:[%s10273_s10 + $0x18] sm:$0xff]  ;;  %v4160_v17 = vld [vmem:[%s10273_s10 + $0x10] sm:$0xff] }
 0x412   :  { %v3064_v7 = vld [vmem:[#allocation4] sm:$0xf]  ;;  %v3153_v9 = vld [vmem:[#allocation4 + $0x4] sm:$0xf] }
 0x413   :  { %7105 = vmatmul.mubr.f32.vlgmr.msra.gmra.mxu0 %v3064_v7  ;;  %7140 = vmatmul.mubr.f32.vlgmr.msra.gmra.mxu1 %v3153_v9  ;;  %v3252_v43 = vld [vmem:[#allocation4 + $0x4] sm:$0xf]  ;;  %v5334_v9 = vld [vmem:[%s10273_s10 + $0x78] sm:$0xff] }
 0x414   :  { %7143 = vmatpush3.msra.mxu0 %v9539_v6  ;;  %7178 = vmatpush3.msra.mxu1 %v9313_v21  ;;  %v4158_v7 = vld [vmem:[%s10273_s10] sm:$0xff] }
 0x415   :  { %7144 = vmatprep.subr.mxu0 %v7653_v41  ;;  %7179 = vmatprep.subr.mxu1 %v7653_v41 }
 0x416   :  { %v3047_v22 = vld [vmem:[#allocation4 + $0x18] sm:$0xff]  ;;  %7145 = vmatpush3.msra.mxu0 %v9544_v39  ;;  %7180 = vmatpush3.msra.mxu1 %v9327_v10 }
 0x417   :  { %v3051_v26 = vmax.f32 %v3047_v22, 0.0  ;;  %7146 = vmatprep.subr.mxu0 %v7653_v41  ;;  %7181 = vmatprep.subr.mxu1 %v7653_v41 }
 0x418   :  { %7147 = vmatpush3.msra.mxu0 %v9553_v19  ;;  %7182 = vmatpush3.msra.mxu1 %v9341_v18  ;;  %v3340_v45 = vld [vmem:[#allocation4 + $0x8] sm:$0xf]  ;;  %v3428_v42 = vld [vmem:[#allocation4 + $0xc] sm:$0xf] }
 0x419   :  { %3055 = vst [vmem:[#allocation4 + $0x18] sm:$0xff] %v3051_v26  ;;  %7148 = vmatprep.subr.mxu0 %v7653_v41  ;;  %7183 = vmatprep.subr.mxu1 %v7653_v41  ;;  %v3526_v44 = vld [vmem:[#allocation4 + $0xc] sm:$0xf] }
 0x41a   :  { %7149 = vmatpush3.msra.mxu0 %v9562_v30  ;;  %7184 = vmatpush3.msra.mxu1 %v9355_v28 }
 0x41b   :  { %7150 = vmatprep.subr.mxu0 %v7653_v41  ;;  %7185 = vmatprep.subr.mxu1 %v7653_v41 }
 0x41c   :  { %7151 = vmatpush3.msra.mxu0 %v9571_v24  ;;  %7186 = vmatpush3.msra.mxu1 %v9369_v12 }
 0x41d   :  { %7152 = vmatprep.subr.mxu0 %v7653_v41  ;;  %7187 = vmatprep.subr.mxu1 %v7653_v41 }
 0x41e   :  { %7153 = vmatpush3.msra.mxu0 %v9580_v31  ;;  %7188 = vmatpush3.msra.mxu1 %v9383_v46 }
 0x41f   :  { %7154 = vmatprep.subr.mxu0 %v7653_v41  ;;  %7189 = vmatprep.subr.mxu1 %v7653_v41 }
 0x420   :  { %7155 = vmatpush3.msra.mxu0 %v9589_v33  ;;  %7190 = vmatpush3.msra.mxu1 %v9397_v48 }
 0x421   :  { %7156 = vmatprep.subr.mxu0 %v7653_v41  ;;  %7191 = vmatprep.subr.mxu1 %v7653_v41 }
 0x422   :  { %7157 = vmatpush3.msra.mxu0 %v9598_v34  ;;  %7192 = vmatpush3.msra.mxu1 %v9411_v50 }
 0x423   :  { %7158 = vmatprep.subr.mxu0 %v7653_v41  ;;  %7193 = vmatprep.subr.mxu1 %v7653_v41 }
 0x424   :  { %7159 = vmatpush3.msra.mxu0 %v9607_v35  ;;  %7194 = vmatpush3.msra.mxu1 %v9425_v52 }
 0x425   :  { %7160 = vmatprep.subr.mxu0 %v7653_v41  ;;  %7195 = vmatprep.subr.mxu1 %v7653_v41 }
 0x426   :  { %7161 = vmatpush3.msra.mxu0 %v9616_v36  ;;  %7196 = vmatpush3.msra.mxu1 %v9439_v8 }
 0x427   :  { %7162 = vmatprep.subr.mxu0 %v7653_v41  ;;  %7197 = vmatprep.subr.mxu1 %v7653_v41 }
 0x428   :  { %7163 = vmatpush3.msra.mxu0 %v9625_v37  ;;  %7198 = vmatpush3.msra.mxu1 %v9453_v55 }
 0x429   :  { %7164 = vmatprep.subr.mxu0 %v7653_v41  ;;  %7199 = vmatprep.subr.mxu1 %v7653_v41 }
 0x42a   :  { %7165 = vmatpush3.msra.mxu0 %v9634_v38  ;;  %7200 = vmatpush3.msra.mxu1 %v9467_v57 }
 0x42b   :  { %7166 = vmatprep.subr.mxu0 %v7653_v41  ;;  %7201 = vmatprep.subr.mxu1 %v7653_v41 }
 0x42c   :  { %7167 = vmatpush3.msra.mxu0 %v9643_v40  ;;  %7202 = vmatpush3.msra.mxu1 %v9481_v61 }
 0x42d   :  { %7168 = vmatprep.subr.mxu0 %v7653_v41  ;;  %7203 = vmatprep.subr.mxu1 %v7653_v41 }
 0x42e   :  { %7169 = vmatpush3.msra.mxu0 %v9652_v32  ;;  %7204 = vmatpush3.msra.mxu1 %v9495_v63 }
 0x42f   :  { %7170 = vmatprep.subr.mxu0 %v7653_v41  ;;  %7205 = vmatprep.subr.mxu1 %v7653_v41 }
 0x430   :  { %7171 = vmatpush3.msra.mxu0 %v9661_v11  ;;  %7206 = vmatpush3.msra.mxu1 %v9509_v1 }
 0x431   :  { %7172 = vmatprep.subr.mxu0 %v7653_v41  ;;  %7207 = vmatprep.subr.mxu1 %v7653_v41 }
 0x432   :  { %7173 = vmatpush3.msra.mxu0 %v9670_v14  ;;  %7174 = vmatprep.mubr.msk.f32.mxu0 %vm7654_vm1, %v7653_v41 }
 0x433   :  { %7208 = vmatpush3.msra.mxu1 %v9523_v4  ;;  %7209 = vmatprep.mubr.msk.f32.mxu1 %vm7654_vm1, %v7653_v41 }
 0x434   :  { %7175 = vmatmul.mubr.f32.vlgmr.msra.gmra.mxu0 %v3252_v43  ;;  %7210 = vmatmul.mubr.f32.vlgmr.msra.gmra.mxu1 %v3340_v45 }
 0x435   :  { %7212 = vmatprep.subr.mxu0 %v7653_v41  ;;  %7247 = vmatprep.subr.mxu1 %v7653_v41 }
 0x436   :  { %7213 = vmatpush3.msra.mxu0 %v9318_v2  ;;  %7248 = vmatpush3.msra.mxu1 %v9539_v6 }
 0x437   :  { %7214 = vmatprep.subr.mxu0 %v7653_v41  ;;  %7249 = vmatprep.subr.mxu1 %v7653_v41 }
 0x438   :  { %7215 = vmatpush3.msra.mxu0 %v9332_v20  ;;  %7250 = vmatpush3.msra.mxu1 %v9544_v39 }
 0x439   :  { %7216 = vmatprep.subr.mxu0 %v7653_v41  ;;  %7251 = vmatprep.subr.mxu1 %v7653_v41 }
 0x43a   :  { %7217 = vmatpush3.msra.mxu0 %v9346_v25  ;;  %7252 = vmatpush3.msra.mxu1 %v9553_v19 }
 0x43b   :  { %7218 = vmatprep.subr.mxu0 %v7653_v41  ;;  %7253 = vmatprep.subr.mxu1 %v7653_v41 }
 0x43c   :  { %7219 = vmatpush3.msra.mxu0 %v9360_v29  ;;  %7254 = vmatpush3.msra.mxu1 %v9562_v30 }
 0x43d   :  { %7220 = vmatprep.subr.mxu0 %v7653_v41  ;;  %7255 = vmatprep.subr.mxu1 %v7653_v41 }
 0x43e   :  { %7221 = vmatpush3.msra.mxu0 %v9374_v13  ;;  %7256 = vmatpush3.msra.mxu1 %v9571_v24 }
 0x43f   :  { %7222 = vmatprep.subr.mxu0 %v7653_v41  ;;  %7257 = vmatprep.subr.mxu1 %v7653_v41 }
 0x440   :  { %7223 = vmatpush3.msra.mxu0 %v9388_v47  ;;  %7258 = vmatpush3.msra.mxu1 %v9580_v31 }
 0x441   :  { %7224 = vmatprep.subr.mxu0 %v7653_v41  ;;  %7259 = vmatprep.subr.mxu1 %v7653_v41 }
 0x442   :  { %7225 = vmatpush3.msra.mxu0 %v9402_v49  ;;  %7260 = vmatpush3.msra.mxu1 %v9589_v33 }
 0x443   :  { %7226 = vmatprep.subr.mxu0 %v7653_v41  ;;  %7261 = vmatprep.subr.mxu1 %v7653_v41 }
 0x444   :  { %7227 = vmatpush3.msra.mxu0 %v9416_v51  ;;  %7262 = vmatpush3.msra.mxu1 %v9598_v34 }
 0x445   :  { %7228 = vmatprep.subr.mxu0 %v7653_v41  ;;  %7263 = vmatprep.subr.mxu1 %v7653_v41 }
 0x446   :  { %7229 = vmatpush3.msra.mxu0 %v9430_v53  ;;  %7264 = vmatpush3.msra.mxu1 %v9607_v35 }
 0x447   :  { %7230 = vmatprep.subr.mxu0 %v7653_v41  ;;  %7265 = vmatprep.subr.mxu1 %v7653_v41 }
 0x448   :  { %7231 = vmatpush3.msra.mxu0 %v9444_v54  ;;  %7266 = vmatpush3.msra.mxu1 %v9616_v36 }
 0x449   :  { %7232 = vmatprep.subr.mxu0 %v7653_v41  ;;  %7267 = vmatprep.subr.mxu1 %v7653_v41 }
 0x44a   :  { %7233 = vmatpush3.msra.mxu0 %v9458_v56  ;;  %7268 = vmatpush3.msra.mxu1 %v9625_v37 }
 0x44b   :  { %7234 = vmatprep.subr.mxu0 %v7653_v41  ;;  %7269 = vmatprep.subr.mxu1 %v7653_v41 }
 0x44c   :  { %7235 = vmatpush3.msra.mxu0 %v9472_v60  ;;  %7270 = vmatpush3.msra.mxu1 %v9634_v38 }
 0x44d   :  { %7236 = vmatprep.subr.mxu0 %v7653_v41  ;;  %7271 = vmatprep.subr.mxu1 %v7653_v41 }
 0x44e   :  { %7237 = vmatpush3.msra.mxu0 %v9486_v62  ;;  %7272 = vmatpush3.msra.mxu1 %v9643_v40 }
 0x44f   :  { %7238 = vmatprep.subr.mxu0 %v7653_v41  ;;  %7273 = vmatprep.subr.mxu1 %v7653_v41 }
 0x450   :  { %7239 = vmatpush3.msra.mxu0 %v9500_v0  ;;  %7274 = vmatpush3.msra.mxu1 %v9652_v32 }
 0x451   :  { %7240 = vmatprep.subr.mxu0 %v7653_v41  ;;  %7275 = vmatprep.subr.mxu1 %v7653_v41 }
 0x452   :  { %7241 = vmatpush3.msra.mxu0 %v9514_v3  ;;  %7276 = vmatpush3.msra.mxu1 %v9661_v11 }
 0x453   :  { %7242 = vmatprep.subr.mxu0 %v7653_v41  ;;  %7277 = vmatprep.subr.mxu1 %v7653_v41 }
 0x454   :  { %7243 = vmatpush3.msra.mxu0 %v9528_v5  ;;  %7244 = vmatprep.mubr.msk.f32.mxu0 %vm7654_vm1, %v7653_v41 }
 0x455   :  { %7278 = vmatpush3.msra.mxu1 %v9670_v14  ;;  %7279 = vmatprep.mubr.msk.f32.mxu1 %vm7654_vm1, %v7653_v41 }
 0x456   :  { %7245 = vmatmul.mubr.f32.vlgmr.msra.gmra.mxu0 %v3428_v42  ;;  %7280 = vmatmul.mubr.f32.vlgmr.msra.gmra.mxu1 %v3526_v44  ;;  %v5343_v44 = vld [vmem:[%s10272_s9 + $0xb8] sm:$0xff] }
 0x457   :  { %7282 = vmatprep.subr.mxu0 %v7653_v41  ;;  %7317 = vmatprep.subr.mxu1 %v7653_v41 }
 0x458   :  { %7283 = vmatpush3.msra.mxu0 %v9313_v21  ;;  %7318 = vmatpush3.msra.mxu1 %v9318_v2  ;;  %v3614_v2 = vld [vmem:[#allocation4 + $0x10] sm:$0xf] }
 0x459   :  { %7284 = vmatprep.subr.mxu0 %v7653_v41  ;;  %7319 = vmatprep.subr.mxu1 %v7653_v41 }
 0x45a   :  { %7285 = vmatpush3.msra.mxu0 %v9327_v10  ;;  %7320 = vmatpush3.msra.mxu1 %v9332_v20  ;;  %v3702_v20 = vld [vmem:[#allocation4 + $0x14] sm:$0xf] }
 0x45b   :  { %7286 = vmatprep.subr.mxu0 %v7653_v41  ;;  %7321 = vmatprep.subr.mxu1 %v7653_v41 }
 0x45c   :  { %7287 = vmatpush3.msra.mxu0 %v9341_v18  ;;  %7322 = vmatpush3.msra.mxu1 %v9346_v25  ;;  %v4082_v25 = vld [vmem:[%s10272_s9 + $0x38] sm:$0xff] }
 0x45d   :  { %7288 = vmatprep.subr.mxu0 %v7653_v41  ;;  %7323 = vmatprep.subr.mxu1 %v7653_v41 }
 0x45e   :  { %7289 = vmatpush3.msra.mxu0 %v9355_v28  ;;  %7324 = vmatpush3.msra.mxu1 %v9360_v29 }
 0x45f   :  { %7290 = vmatprep.subr.mxu0 %v7653_v41  ;;  %7325 = vmatprep.subr.mxu1 %v7653_v41 }
 0x460   :  { %7291 = vmatpush3.msra.mxu0 %v9369_v12  ;;  %7326 = vmatpush3.msra.mxu1 %v9374_v13 }
 0x461   :  { %7292 = vmatprep.subr.mxu0 %v7653_v41  ;;  %7327 = vmatprep.subr.mxu1 %v7653_v41 }
 0x462   :  { %7293 = vmatpush3.msra.mxu0 %v9383_v46  ;;  %7328 = vmatpush3.msra.mxu1 %v9388_v47 }
 0x463   :  { %7294 = vmatprep.subr.mxu0 %v7653_v41  ;;  %7329 = vmatprep.subr.mxu1 %v7653_v41 }
 0x464   :  { %7295 = vmatpush3.msra.mxu0 %v9397_v48  ;;  %7330 = vmatpush3.msra.mxu1 %v9402_v49 }
 0x465   :  { %7296 = vmatprep.subr.mxu0 %v7653_v41  ;;  %7331 = vmatprep.subr.mxu1 %v7653_v41 }
 0x466   :  { %7297 = vmatpush3.msra.mxu0 %v9411_v50  ;;  %7332 = vmatpush3.msra.mxu1 %v9416_v51 }
 0x467   :  { %7298 = vmatprep.subr.mxu0 %v7653_v41  ;;  %7333 = vmatprep.subr.mxu1 %v7653_v41 }
 0x468   :  { %7299 = vmatpush3.msra.mxu0 %v9425_v52  ;;  %7334 = vmatpush3.msra.mxu1 %v9430_v53 }
 0x469   :  { %7300 = vmatprep.subr.mxu0 %v7653_v41  ;;  %7335 = vmatprep.subr.mxu1 %v7653_v41 }
 0x46a   :  { %7301 = vmatpush3.msra.mxu0 %v9439_v8  ;;  %7336 = vmatpush3.msra.mxu1 %v9444_v54 }
 0x46b   :  { %7302 = vmatprep.subr.mxu0 %v7653_v41  ;;  %7337 = vmatprep.subr.mxu1 %v7653_v41 }
 0x46c   :  { %7303 = vmatpush3.msra.mxu0 %v9453_v55  ;;  %7338 = vmatpush3.msra.mxu1 %v9458_v56 }
 0x46d   :  { %7304 = vmatprep.subr.mxu0 %v7653_v41  ;;  %7339 = vmatprep.subr.mxu1 %v7653_v41 }
 0x46e   :  { %7305 = vmatpush3.msra.mxu0 %v9467_v57  ;;  %7340 = vmatpush3.msra.mxu1 %v9472_v60 }
 0x46f   :  { %7306 = vmatprep.subr.mxu0 %v7653_v41  ;;  %7341 = vmatprep.subr.mxu1 %v7653_v41 }
 0x470   :  { %7307 = vmatpush3.msra.mxu0 %v9481_v61  ;;  %7342 = vmatpush3.msra.mxu1 %v9486_v62 }
 0x471   :  { %7308 = vmatprep.subr.mxu0 %v7653_v41  ;;  %7343 = vmatprep.subr.mxu1 %v7653_v41 }
 0x472   :  { %7309 = vmatpush3.msra.mxu0 %v9495_v63  ;;  %7344 = vmatpush3.msra.mxu1 %v9500_v0 }
 0x473   :  { %7310 = vmatprep.subr.mxu0 %v7653_v41  ;;  %7345 = vmatprep.subr.mxu1 %v7653_v41 }
 0x474   :  { %7311 = vmatpush3.msra.mxu0 %v9509_v1  ;;  %7346 = vmatpush3.msra.mxu1 %v9514_v3 }
 0x475   :  { %7312 = vmatprep.subr.mxu0 %v7653_v41  ;;  %7347 = vmatprep.subr.mxu1 %v7653_v41 }
 0x476   :  { %7313 = vmatpush3.msra.mxu0 %v9523_v4  ;;  %7314 = vmatprep.mubr.msk.f32.mxu0 %vm7654_vm1, %v7653_v41 }
 0x477   :  { %7348 = vmatpush3.msra.mxu1 %v9528_v5  ;;  %7349 = vmatprep.mubr.msk.f32.mxu1 %vm7654_vm1, %v7653_v41 }
 0x478   :  { %7315 = vmatmul.mubr.f32.vlgmr.msra.gmra.mxu0 %v3614_v2  ;;  %7350 = vmatmul.mubr.f32.vlgmr.msra.gmra.mxu1 %v3702_v20  ;;  %v5352_v2 = vld [vmem:[%s10273_s10 + $0xb8] sm:$0xff] }
 0x479   :  { %7352 = vmatprep.subr.mxu0 %v7653_v41  ;;  %7387 = vmatprep.subr.mxu1 %v7653_v41 }
 0x47a   :  { %7353 = vmatpush3.msra.mxu0 %v9539_v6  ;;  %7388 = vmatpush3.msra.mxu1 %v9313_v21  ;;  %v3800_v21 = vld [vmem:[#allocation4 + $0x14] sm:$0xf]  ;;  %v4159_v6 = vld [vmem:[%s10273_s10 + $0x8] sm:$0xff] }
 0x47b   :  { %7354 = vmatprep.subr.mxu0 %v7653_v41  ;;  %7389 = vmatprep.subr.mxu1 %v7653_v41 }
 0x47c   :  { %7355 = vmatpush3.msra.mxu0 %v9544_v39  ;;  %7390 = vmatpush3.msra.mxu1 %v9327_v10  ;;  %v3888_v10 = vld [vmem:[#allocation4 + $0x18] sm:$0xf] }
 0x47d   :  { %7356 = vmatprep.subr.mxu0 %v7653_v41  ;;  %7391 = vmatprep.subr.mxu1 %v7653_v41 }
 0x47e   :  { %7357 = vmatpush3.msra.mxu0 %v9553_v19  ;;  %7392 = vmatpush3.msra.mxu1 %v9341_v18  ;;  %v5314_v18 = vld [vmem:[%s10270_s7 + $0x178] sm:$0xff]  ;;  %v5333_v19 = vld [vmem:[%s10273_s10 + $0x70] sm:$0xff] }
 0x47f   :  { %7358 = vmatprep.subr.mxu0 %v7653_v41  ;;  %7393 = vmatprep.subr.mxu1 %v7653_v41 }
 0x480   :  { %7359 = vmatpush3.msra.mxu0 %v9562_v30  ;;  %7394 = vmatpush3.msra.mxu1 %v9355_v28  ;;  %v5313_v28 = vld [vmem:[%s10270_s7 + $0x170] sm:$0xff]  ;;  %v5332_v30 = vld [vmem:[%s10273_s10 + $0x68] sm:$0xff] }
 0x481   :  { %7360 = vmatprep.subr.mxu0 %v7653_v41  ;;  %7395 = vmatprep.subr.mxu1 %v7653_v41 }
 0x482   :  { %7361 = vmatpush3.msra.mxu0 %v9571_v24  ;;  %7396 = vmatpush3.msra.mxu1 %v9369_v12  ;;  %v4081_v12 = vld [vmem:[%s10272_s9 + $0x30] sm:$0xff] }
 0x483   :  { %7362 = vmatprep.subr.mxu0 %v7653_v41  ;;  %7397 = vmatprep.subr.mxu1 %v7653_v41 }
 0x484   :  { %7363 = vmatpush3.msra.mxu0 %v9580_v31  ;;  %7398 = vmatpush3.msra.mxu1 %v9383_v46  ;;  %v5312_v46 = vld [vmem:[%s10270_s7 + $0x168] sm:$0xff] }
 0x485   :  { %7364 = vmatprep.subr.mxu0 %v7653_v41  ;;  %7399 = vmatprep.subr.mxu1 %v7653_v41 }
 0x486   :  { %7365 = vmatpush3.msra.mxu0 %v9589_v33  ;;  %7400 = vmatpush3.msra.mxu1 %v9397_v48  ;;  %v4080_v48 = vld [vmem:[%s10272_s9 + $0x28] sm:$0xff]  ;;  %v5331_v33 = vld [vmem:[%s10273_s10 + $0x60] sm:$0xff] }
 0x487   :  { %7366 = vmatprep.subr.mxu0 %v7653_v41  ;;  %7401 = vmatprep.subr.mxu1 %v7653_v41 }
 0x488   :  { %7367 = vmatpush3.msra.mxu0 %v9598_v34  ;;  %7402 = vmatpush3.msra.mxu1 %v9411_v50  ;;  %v4079_v50 = vld [vmem:[%s10272_s9 + $0x20] sm:$0xff]  ;;  %v5330_v34 = vld [vmem:[%s10273_s10 + $0x58] sm:$0xff] }
 0x489   :  { %7368 = vmatprep.subr.mxu0 %v7653_v41  ;;  %7403 = vmatprep.subr.mxu1 %v7653_v41 }
 0x48a   :  { %7369 = vmatpush3.msra.mxu0 %v9607_v35  ;;  %7404 = vmatpush3.msra.mxu1 %v9425_v52  ;;  %v4078_v52 = vld [vmem:[%s10272_s9 + $0x18] sm:$0xff]  ;;  %v5329_v35 = vld [vmem:[%s10273_s10 + $0x50] sm:$0xff] }
 0x48b   :  { %7370 = vmatprep.subr.mxu0 %v7653_v41  ;;  %7405 = vmatprep.subr.mxu1 %v7653_v41 }
 0x48c   :  { %7371 = vmatpush3.msra.mxu0 %v9616_v36  ;;  %7406 = vmatpush3.msra.mxu1 %v9439_v8  ;;  %v4077_v8 = vld [vmem:[%s10272_s9 + $0x10] sm:$0xff]  ;;  %v5328_v36 = vld [vmem:[%s10273_s10 + $0x48] sm:$0xff] }
 0x48d   :  { %7372 = vmatprep.subr.mxu0 %v7653_v41  ;;  %7407 = vmatprep.subr.mxu1 %v7653_v41 }
 0x48e   :  { %7373 = vmatpush3.msra.mxu0 %v9625_v37  ;;  %7408 = vmatpush3.msra.mxu1 %v9453_v55  ;;  %v5321_v55 = vld [vmem:[%s10272_s9 + $0x58] sm:$0xff]  ;;  %v5327_v37 = vld [vmem:[%s10273_s10 + $0x40] sm:$0xff] }
 0x48f   :  { %7374 = vmatprep.subr.mxu0 %v7653_v41  ;;  %7409 = vmatprep.subr.mxu1 %v7653_v41 }
 0x490   :  { %7375 = vmatpush3.msra.mxu0 %v9634_v38  ;;  %7410 = vmatpush3.msra.mxu1 %v9467_v57  ;;  %v5319_v57 = vld [vmem:[%s10272_s9 + $0x48] sm:$0xff] }
 0x491   :  { %7376 = vmatprep.subr.mxu0 %v7653_v41  ;;  %7411 = vmatprep.subr.mxu1 %v7653_v41 }
 0x492   :  { %7377 = vmatpush3.msra.mxu0 %v9643_v40  ;;  %7412 = vmatpush3.msra.mxu1 %v9481_v61  ;;  %v9999_v61 = vld [vmem:[%s10271_s8] ss:$0 sm:$0xff] }
 0x493   :  { %7378 = vmatprep.subr.mxu0 %v7653_v41  ;;  %7413 = vmatprep.subr.mxu1 %v7653_v41 }
 0x494   :  { %7379 = vmatpush3.msra.mxu0 %v9652_v32  ;;  %7414 = vmatpush3.msra.mxu1 %v9495_v63 }
 0x495   :  { %7380 = vmatprep.subr.mxu0 %v7653_v41  ;;  %7415 = vmatprep.subr.mxu1 %v7653_v41 }
 0x496   :  { %7381 = vmatpush3.msra.mxu0 %v9661_v11  ;;  %7416 = vmatpush3.msra.mxu1 %v9509_v1 }
 0x497   :  { %7382 = vmatprep.subr.mxu0 %v7653_v41  ;;  %7417 = vmatprep.subr.mxu1 %v7653_v41 }
 0x498   :  { %7383 = vmatpush3.msra.mxu0 %v9670_v14  ;;  %7384 = vmatprep.mubr.msk.f32.mxu0 %vm7654_vm1, %v7653_v41 }
 0x499   :  { %7418 = vmatpush3.msra.mxu1 %v9523_v4  ;;  %7419 = vmatprep.mubr.msk.f32.mxu1 %vm7654_vm1, %v7653_v41 }
 0x49a   :  { %7385 = vmatmul.mubr.f32.vlgmr.msra.gmra.mxu0 %v3800_v21  ;;  %7420 = vmatmul.mubr.f32.vlgmr.msra.gmra.mxu1 %v3888_v10  ;;  %v5342_v10 = vld [vmem:[%s10272_s9 + $0xb0] sm:$0xff] }
 0x49b   :  { %7422 = vmatprep.subr.mxu0 %v7653_v41  ;;  %7454 = vmatprep.mubr.msk.f32.mxu0 %vm7654_vm1, %v7653_v41 }
 0x49c   :  { %7423 = vmatpush3.msra.mxu0 %v5314_v18  ;;  %7457 = vmatprep.subr.mxu1 %v7653_v41  ;;  %v5351_v18 = vld [vmem:[%s10273_s10 + $0xb0] sm:$0xff] }
 0x49d   :  { %7424 = vmatprep.subr.mxu0 %v7653_v41  ;;  %7458 = vmatpush3.msra.mxu1 %v4082_v25  ;;  %v5341_v25 = vld [vmem:[%s10272_s9 + $0xa8] sm:$0xff] }
 0x49e   :  { %7425 = vmatpush3.msra.mxu0 %v5313_v28  ;;  %7459 = vmatprep.subr.mxu1 %v7653_v41  ;;  %v5350_v28 = vld [vmem:[%s10273_s10 + $0xa8] sm:$0xff] }
 0x49f   :  { %7426 = vmatprep.subr.mxu0 %v7653_v41  ;;  %7460 = vmatpush3.msra.mxu1 %v4081_v12  ;;  %v5340_v12 = vld [vmem:[%s10272_s9 + $0xa0] sm:$0xff] }
 0x4a0   :  { %7427 = vmatpush3.msra.mxu0 %v5312_v46  ;;  %7461 = vmatprep.subr.mxu1 %v7653_v41  ;;  %v5349_v46 = vld [vmem:[%s10273_s10 + $0xa0] sm:$0xff] }
 0x4a1   :  { %7428 = vmatprep.subr.mxu0 %v7653_v41  ;;  %7462 = vmatpush3.msra.mxu1 %v4080_v48  ;;  %v5339_v48 = vld [vmem:[%s10272_s9 + $0x98] sm:$0xff] }
 0x4a2   :  { %7429 = vmatpush3.msra.mxu0 %v9360_v29  ;;  %7463 = vmatprep.subr.mxu1 %v7653_v41  ;;  %v4076_v29 = vld [vmem:[%s10272_s9 + $0x8] sm:$0xff] }
 0x4a3   :  { %7430 = vmatprep.subr.mxu0 %v7653_v41  ;;  %7464 = vmatpush3.msra.mxu1 %v4079_v50  ;;  %v5348_v50 = vld [vmem:[%s10273_s10 + $0x98] sm:$0xff] }
 0x4a4   :  { %7431 = vmatpush3.msra.mxu0 %v9374_v13  ;;  %7465 = vmatprep.subr.mxu1 %v7653_v41  ;;  %v4075_v13 = vld [vmem:[%s10272_s9] sm:$0xff] }
 0x4a5   :  { %7432 = vmatprep.subr.mxu0 %v7653_v41  ;;  %7466 = vmatpush3.msra.mxu1 %v4078_v52  ;;  %v5338_v52 = vld [vmem:[%s10272_s9 + $0x90] sm:$0xff] }
 0x4a6   :  { %7433 = vmatpush3.msra.mxu0 %v9388_v47  ;;  %7467 = vmatprep.subr.mxu1 %v7653_v41  ;;  %v5325_v47 = vld [vmem:[%s10272_s9 + $0x78] sm:$0xff] }
 0x4a7   :  { %7434 = vmatprep.subr.mxu0 %v7653_v41  ;;  %7468 = vmatpush3.msra.mxu1 %v4077_v8  ;;  %v5347_v8 = vld [vmem:[%s10273_s10 + $0x90] sm:$0xff] }
 0x4a8   :  { %7435 = vmatpush3.msra.mxu0 %v9402_v49  ;;  %7469 = vmatprep.subr.mxu1 %v7653_v41  ;;  %v3976_v49 = vld [vmem:[#allocation4 + $0x1c] sm:$0xf] }
 0x4a9   :  { %7436 = vmatprep.subr.mxu0 %v7653_v41  ;;  %7470 = vmatpush3.msra.mxu1 %v4076_v29  ;;  %v5337_v29 = vld [vmem:[%s10272_s9 + $0x88] sm:$0xff] }
 0x4aa   :  { %7437 = vmatpush3.msra.mxu0 %v9416_v51  ;;  %7471 = vmatprep.subr.mxu1 %v7653_v41  ;;  %v5324_v51 = vld [vmem:[%s10272_s9 + $0x70] sm:$0xff] }
 0x4ab   :  { %7438 = vmatprep.subr.mxu0 %v7653_v41  ;;  %7472 = vmatpush3.msra.mxu1 %v4075_v13  ;;  %v5346_v13 = vld [vmem:[%s10273_s10 + $0x88] sm:$0xff] }
 0x4ac   :  { %7439 = vmatpush3.msra.mxu0 %v9430_v53  ;;  %7473 = vmatprep.mubr.msk.f32.mxu1 %vm7654_vm1, %v7653_v41  ;;  %v5323_v53 = vld [vmem:[%s10272_s9 + $0x68] sm:$0xff] }
 0x4ad   :  { %7440 = vmatprep.subr.mxu0 %v7653_v41  ;;  %7476 = vmatprep.subr.mxu1 %v7653_v41 }
 0x4ae   :  { %7441 = vmatpush3.msra.mxu0 %v9444_v54  ;;  %v5322_v54 = vld [vmem:[%s10272_s9 + $0x60] sm:$0xff] }
 0x4af   :  { %7442 = vmatprep.subr.mxu0 %v7653_v41 }
 0x4b0   :  { %7443 = vmatpush3.msra.mxu0 %v9458_v56  ;;  %v5320_v56 = vld [vmem:[%s10272_s9 + $0x50] sm:$0xff] }
 0x4b1   :  { %7444 = vmatprep.subr.mxu0 %v7653_v41 }
 0x4b2   :  { %7445 = vmatpush3.msra.mxu0 %v9472_v60  ;;  %v5318_v60 = vld [vmem:[%s10272_s9 + $0x40] sm:$0xff] }
 0x4b3   :  { %7446 = vmatprep.subr.mxu0 %v7653_v41 }
 0x4b4   :  { %7447 = vmatpush3.msra.mxu0 %v9486_v62 }
 0x4b5   :  { %7448 = vmatprep.subr.mxu0 %v7653_v41 }
 0x4b6   :  { %7449 = vmatpush3.msra.mxu0 %v9500_v0 }
 0x4b7   :  { %7450 = vmatprep.subr.mxu0 %v7653_v41 }
 0x4b8   :  { %7451 = vmatpush3.msra.mxu0 %v9514_v3 }
 0x4b9   :  { %7452 = vmatprep.subr.mxu0 %v7653_v41 }
 0x4ba   :  { %7453 = vmatpush3.msra.mxu0 %v9528_v5 }
 0x4bb   :  { %7455 = vmatmul.mubr.f32.vlgmr.msra.gmra.mxu0 %v3976_v49  ;;  %7495 = vmatprep.subr.mxu0 %v7653_v41  ;;  %v5345_v49 = vld [vmem:[%s10273_s10 + $0x80] sm:$0xff] }
 0x4bc   :  { %7496 = vmatpush3.msra.mxu0 %v5325_v47  ;;  %7511 = vmatprep.mubr.msk.f32.mxu0 %vm7654_vm1, %v7653_v41  ;;  %v5336_v47 = vld [vmem:[%s10272_s9 + $0x80] sm:$0xff] }
 0x4bd   :  { %7497 = vmatprep.subr.mxu0 %v7653_v41 }
 0x4be   :  { %7498 = vmatpush3.msra.mxu0 %v5324_v51 }
 0x4bf   :  { %7499 = vmatprep.subr.mxu0 %v7653_v41 }
 0x4c0   :  { %7500 = vmatpush3.msra.mxu0 %v5323_v53 }
 0x4c1   :  { %7501 = vmatprep.subr.mxu0 %v7653_v41 }
 0x4c2   :  { %7502 = vmatpush3.msra.mxu0 %v5322_v54 }
 0x4c3   :  { %7503 = vmatprep.subr.mxu0 %v7653_v41 }
 0x4c4   :  { %7504 = vmatpush3.msra.mxu0 %v5321_v55 }
 0x4c5   :  { %7505 = vmatprep.subr.mxu0 %v7653_v41 }
 0x4c6   :  { %7506 = vmatpush3.msra.mxu0 %v5320_v56 }
 0x4c7   :  { %7507 = vmatprep.subr.mxu0 %v7653_v41 }
 0x4c8   :  { %7508 = vmatpush3.msra.mxu0 %v5319_v57 }
 0x4c9   :  { %7509 = vmatprep.subr.mxu0 %v7653_v41 }
 0x4ca   :  { %7510 = vmatpush3.msra.mxu0 %v5318_v60 }
 0x4cb   :  { %7533 = vmatprep.subr.mxu0 %v7653_v41 }
 0x4d3   :  { %v3148_v62 = vpop.f32.mrf.mxu0  ;;  %v3237_v63 = vpop.f32.mrf.mxu1 }
 0x4d4   :  { %v3152_v0 = vadd.f32 %v9999_v61, %v3148_v62 }
 0x4d5   :  { %v7106_v1 = vpop.f32.mrf.mxu0  ;;  %v7141_v3 = vpop.f32.mrf.mxu1 }
 0x4d6   :  { %v3241_v4 = vadd.f32 %v3237_v63, %v3152_v0  ;;  %v5361_v63 = vld [vmem:[%s10272_s9 + $0xf8] sm:$0xff] }
 0x4d7   :  { %v5370_v0 = vld [vmem:[%s10273_s10 + $0xf8] sm:$0xff] }
 0x4d8   :  { %v3242_v5 = vmax.f32 %v3241_v4, 0.0  ;;  %v5360_v4 = vld [vmem:[%s10272_s9 + $0xf0] sm:$0xff] }
 0x4da   :  { %3243 = vst.msk [vmem:[#allocation5] sm:$0xf] %vm760_vm2, %v3242_v5  ;;  %v5369_v5 = vld [vmem:[%s10273_s10 + $0xf0] sm:$0xff] }
 0x4e1   :  { %v4074_v59 = vld [vmem:[#allocation5] sm:$0x3]  ;;  %v4157_v39 = vld [vmem:[#allocation5 + $0x2] sm:$0x3] }
 0x4e2   :  { %7474 = vmatmul.mubr.msk.f32.vlgmr.msra.gmra.mxu1 %vm72_vm0, %v4074_v59  ;;  %v5368_v59 = vld [vmem:[%s10273_s10 + $0xe8] sm:$0xff] }
 0x4e3   :  { %7477 = vmatpush3.msra.mxu1 %v4165_v58  ;;  %7492 = vmatprep.mubr.msk.f32.mxu1 %vm7654_vm1, %v7653_v41  ;;  %v5359_v58 = vld [vmem:[%s10272_s9 + $0xe8] sm:$0xff] }
 0x4e4   :  { %7478 = vmatprep.subr.mxu1 %v7653_v41 }
 0x4e5   :  { %7479 = vmatpush3.msra.mxu1 %v4164_v15  ;;  %v5358_v15 = vld [vmem:[%s10272_s9 + $0xe0] sm:$0xff] }
 0x4e6   :  { %7480 = vmatprep.subr.mxu1 %v7653_v41 }
 0x4e7   :  { %7481 = vmatpush3.msra.mxu1 %v4163_v16  ;;  %v5367_v16 = vld [vmem:[%s10273_s10 + $0xe0] sm:$0xff] }
 0x4e8   :  { %7482 = vmatprep.subr.mxu1 %v7653_v41 }
 0x4e9   :  { %7483 = vmatpush3.msra.mxu1 %v4162_v23  ;;  %v5357_v23 = vld [vmem:[%s10272_s9 + $0xd8] sm:$0xff] }
 0x4ea   :  { %7484 = vmatprep.subr.mxu1 %v7653_v41 }
 0x4eb   :  { %7485 = vmatpush3.msra.mxu1 %v4161_v27  ;;  %v5366_v27 = vld [vmem:[%s10273_s10 + $0xd8] sm:$0xff] }
 0x4ec   :  { %7486 = vmatprep.subr.mxu1 %v7653_v41 }
 0x4ed   :  { %7487 = vmatpush3.msra.mxu1 %v4160_v17  ;;  %v5356_v17 = vld [vmem:[%s10272_s9 + $0xd0] sm:$0xff] }
 0x4ee   :  { %7488 = vmatprep.subr.mxu1 %v7653_v41 }
 0x4ef   :  { %7489 = vmatpush3.msra.mxu1 %v4159_v6  ;;  %v5365_v6 = vld [vmem:[%s10273_s10 + $0xd0] sm:$0xff] }
 0x4f0   :  { %7490 = vmatprep.subr.mxu1 %v7653_v41 }
 0x4f1   :  { %7491 = vmatpush3.msra.mxu1 %v4158_v7  ;;  %v5355_v7 = vld [vmem:[%s10272_s9 + $0xc8] sm:$0xff] }
 0x4f2   :  { %7493 = vmatmul.mubr.msk.f32.vlgmr.msra.gmra.mxu1 %vm72_vm0, %v4157_v39  ;;  %7514 = vmatprep.subr.mxu1 %v7653_v41  ;;  %v5354_v39 = vld [vmem:[%s10272_s9 + $0xc0] sm:$0xff] }
 0x4f3   :  { %7515 = vmatpush3.msra.mxu1 %v5334_v9  ;;  %7530 = vmatprep.mubr.msk.f32.mxu1 %vm7654_vm1, %v7653_v41  ;;  %v5364_v9 = vld [vmem:[%s10273_s10 + $0xc8] sm:$0xff] }
 0x4f4   :  { %v3335_v22 = vpop.f32.mrf.mxu0  ;;  %v3423_v26 = vpop.f32.mrf.mxu1  ;;  %7516 = vmatprep.subr.mxu1 %v7653_v41 }
 0x4f5   :  { %7517 = vmatpush3.msra.mxu1 %v5333_v19  ;;  %v3339_v38 = vadd.f32 %v9999_v61, %v3335_v22  ;;  %v5363_v19 = vld [vmem:[%s10273_s10 + $0xc0] sm:$0xff] }
 0x4f6   :  { %v7176_v24 = vpop.f32.mrf.mxu0  ;;  %v7211_v31 = vpop.f32.mrf.mxu1  ;;  %7518 = vmatprep.subr.mxu1 %v7653_v41 }
 0x4f7   :  { %7519 = vmatpush3.msra.mxu1 %v5332_v30  ;;  %v3427_v40 = vadd.f32 %v3423_v26, %v3339_v38 }
 0x4f8   :  { %7520 = vmatprep.subr.mxu1 %v7653_v41 }
 0x4f9   :  { %7521 = vmatpush3.msra.mxu1 %v5331_v33 }
 0x4fa   :  { %7522 = vmatprep.subr.mxu1 %v7653_v41 }
 0x4fb   :  { %7523 = vmatpush3.msra.mxu1 %v5330_v34 }
 0x4fc   :  { %7524 = vmatprep.subr.mxu1 %v7653_v41 }
 0x4fd   :  { %7525 = vmatpush3.msra.mxu1 %v5329_v35 }
 0x4fe   :  { %7526 = vmatprep.subr.mxu1 %v7653_v41 }
 0x4ff   :  { %7527 = vmatpush3.msra.mxu1 %v5328_v36 }
 0x500   :  { %7528 = vmatprep.subr.mxu1 %v7653_v41 }
 0x501   :  { %7529 = vmatpush3.msra.mxu1 %v5327_v37 }
 0x502   :  { %7552 = vmatprep.subr.mxu1 %v7653_v41 }
 0x516   :  { %v3511_v32 = vpop.f32.mrf.mxu0  ;;  %v3609_v11 = vpop.f32.mrf.mxu1 }
 0x517   :  { %v3515_v14 = vadd.f32 %v3511_v32, %v3427_v40  ;;  %v3613_v51 = vadd.f32 %v9999_v61, %v3609_v11  ;;  %v4751_v32 = vld [vmem:[%s10275_s12 + $0x30] sm:$0xff]  ;;  %v4750_v11 = vld [vmem:[%s10275_s12 + $0x28] sm:$0xff] }
 0x518   :  { %v7246_v43 = vpop.f32.mrf.mxu0  ;;  %v7281_v45 = vpop.f32.mrf.mxu1 }
 0x519   :  { %v3516_v42 = vmax.f32 %v3515_v14, 0.0  ;;  %v4749_v14 = vld [vmem:[%s10275_s12 + $0x20] sm:$0xff] }
 0x51b   :  { %3517 = vst.msk [vmem:[#allocation5 + $0x4] sm:$0xf] %vm760_vm2, %v3516_v42  ;;  %v5315_v42 = vld [vmem:[%s10274_s11] ss:$0 sm:$0xff] }
 0x522   :  { %v4240_v20 = vld [vmem:[#allocation5 + $0x4] sm:$0x3]  ;;  %v4324_v21 = vld [vmem:[#allocation5 + $0x6] sm:$0x3] }
 0x523   :  { %7512 = vmatmul.mubr.msk.f32.vlgmr.msra.gmra.mxu0 %vm72_vm0, %v4240_v20  ;;  %7531 = vmatmul.mubr.msk.f32.vlgmr.msra.gmra.mxu1 %vm72_vm0, %v4324_v21 }
 0x524   :  { %7534 = vmatpush3.msra.mxu0 %v5343_v44  ;;  %7553 = vmatpush3.msra.mxu1 %v5352_v2 }
 0x525   :  { %7535 = vmatprep.subr.mxu0 %v7653_v41  ;;  %7554 = vmatprep.subr.mxu1 %v7653_v41 }
 0x526   :  { %7536 = vmatpush3.msra.mxu0 %v5342_v10  ;;  %7555 = vmatpush3.msra.mxu1 %v5351_v18  ;;  %v4748_v10 = vld [vmem:[%s10275_s12 + $0x18] sm:$0xff]  ;;  %v4747_v18 = vld [vmem:[%s10275_s12 + $0x10] sm:$0xff] }
 0x527   :  { %7537 = vmatprep.subr.mxu0 %v7653_v41  ;;  %7556 = vmatprep.subr.mxu1 %v7653_v41 }
 0x528   :  { %7538 = vmatpush3.msra.mxu0 %v5341_v25  ;;  %7557 = vmatpush3.msra.mxu1 %v5350_v28  ;;  %v4746_v25 = vld [vmem:[%s10275_s12 + $0x8] sm:$0xff]  ;;  %v4745_v28 = vld [vmem:[%s10275_s12] sm:$0xff] }
 0x529   :  { %7539 = vmatprep.subr.mxu0 %v7653_v41  ;;  %7558 = vmatprep.subr.mxu1 %v7653_v41 }
 0x52a   :  { %7540 = vmatpush3.msra.mxu0 %v5340_v12  ;;  %7559 = vmatpush3.msra.mxu1 %v5349_v46 }
 0x52b   :  { %7541 = vmatprep.subr.mxu0 %v7653_v41  ;;  %7560 = vmatprep.subr.mxu1 %v7653_v41 }
 0x52c   :  { %7542 = vmatpush3.msra.mxu0 %v5339_v48  ;;  %7561 = vmatpush3.msra.mxu1 %v5348_v50 }
 0x52d   :  { %7543 = vmatprep.subr.mxu0 %v7653_v41  ;;  %7562 = vmatprep.subr.mxu1 %v7653_v41 }
 0x52e   :  { %7544 = vmatpush3.msra.mxu0 %v5338_v52  ;;  %7563 = vmatpush3.msra.mxu1 %v5347_v8 }
 0x52f   :  { %7545 = vmatprep.subr.mxu0 %v7653_v41  ;;  %7564 = vmatprep.subr.mxu1 %v7653_v41 }
 0x530   :  { %7546 = vmatpush3.msra.mxu0 %v5337_v29  ;;  %7565 = vmatpush3.msra.mxu1 %v5346_v13 }
 0x531   :  { %7547 = vmatprep.subr.mxu0 %v7653_v41  ;;  %7566 = vmatprep.subr.mxu1 %v7653_v41 }
 0x532   :  { %7548 = vmatpush3.msra.mxu0 %v5336_v47  ;;  %7549 = vmatprep.mubr.msk.f32.mxu0 %vm7654_vm1, %v7653_v41 }
 0x533   :  { %7567 = vmatpush3.msra.mxu1 %v5345_v49  ;;  %7568 = vmatprep.mubr.msk.f32.mxu1 %vm7654_vm1, %v7653_v41 }
 0x534   :  { %7571 = vmatprep.subr.mxu0 %v7653_v41  ;;  %7590 = vmatprep.subr.mxu1 %v7653_v41 }
 0x538   :  { %v3697_v53 = vpop.f32.mrf.mxu0  ;;  %v3785_v54 = vpop.f32.mrf.mxu1 }
 0x539   :  { %v3701_v55 = vadd.f32 %v3697_v53, %v3613_v51 }
 0x53a   :  { %v7316_v56 = vpop.f32.mrf.mxu0  ;;  %v7351_v57 = vpop.f32.mrf.mxu1 }
 0x53b   :  { %v3789_v60 = vadd.f32 %v3785_v54, %v3701_v55 }
 0x53d   :  { %v3790_v62 = vmax.f32 %v3789_v60, 0.0 }
 0x53f   :  { %3791 = vst.msk [vmem:[#allocation5 + $0x8] sm:$0xf] %vm760_vm2, %v3790_v62 }
 0x546   :  { %v4408_v1 = vld [vmem:[#allocation5 + $0x8] sm:$0x3]  ;;  %v4492_v3 = vld [vmem:[#allocation5 + $0xa] sm:$0x3] }
 0x547   :  { %7550 = vmatmul.mubr.msk.f32.vlgmr.msra.gmra.mxu0 %vm72_vm0, %v4408_v1  ;;  %7569 = vmatmul.mubr.msk.f32.vlgmr.msra.gmra.mxu1 %vm72_vm0, %v4492_v3 }
 0x548   :  { %7572 = vmatpush3.msra.mxu0 %v5361_v63  ;;  %7591 = vmatpush3.msra.mxu1 %v5370_v0  ;;  %v5372_v63 = vld [vmem:[%s10276_s13] ss:$0 sm:$0xff] }
 0x549   :  { %7573 = vmatprep.subr.mxu0 %v7653_v41  ;;  %7592 = vmatprep.subr.mxu1 %v7653_v41 }
 0x54a   :  { %7574 = vmatpush3.msra.mxu0 %v5360_v4  ;;  %7593 = vmatpush3.msra.mxu1 %v5369_v5 }
 0x54b   :  { %7575 = vmatprep.subr.mxu0 %v7653_v41  ;;  %7594 = vmatprep.subr.mxu1 %v7653_v41 }
 0x54c   :  { %7576 = vmatpush3.msra.mxu0 %v5359_v58  ;;  %7595 = vmatpush3.msra.mxu1 %v5368_v59 }
 0x54d   :  { %7577 = vmatprep.subr.mxu0 %v7653_v41  ;;  %7596 = vmatprep.subr.mxu1 %v7653_v41 }
 0x54e   :  { %7578 = vmatpush3.msra.mxu0 %v5358_v15  ;;  %7597 = vmatpush3.msra.mxu1 %v5367_v16 }
 0x54f   :  { %7579 = vmatprep.subr.mxu0 %v7653_v41  ;;  %7598 = vmatprep.subr.mxu1 %v7653_v41 }
 0x550   :  { %7580 = vmatpush3.msra.mxu0 %v5357_v23  ;;  %7599 = vmatpush3.msra.mxu1 %v5366_v27 }
 0x551   :  { %7581 = vmatprep.subr.mxu0 %v7653_v41  ;;  %7600 = vmatprep.subr.mxu1 %v7653_v41 }
 0x552   :  { %7582 = vmatpush3.msra.mxu0 %v5356_v17  ;;  %7601 = vmatpush3.msra.mxu1 %v5365_v6 }
 0x553   :  { %7583 = vmatprep.subr.mxu0 %v7653_v41  ;;  %7602 = vmatprep.subr.mxu1 %v7653_v41 }
 0x554   :  { %7584 = vmatpush3.msra.mxu0 %v5355_v7  ;;  %7603 = vmatpush3.msra.mxu1 %v5364_v9 }
 0x555   :  { %7585 = vmatprep.subr.mxu0 %v7653_v41  ;;  %7604 = vmatprep.subr.mxu1 %v7653_v41 }
 0x556   :  { %7586 = vmatpush3.msra.mxu0 %v5354_v39  ;;  %7587 = vmatprep.mubr.msk.f32.mxu0 %vm7654_vm1, %v7653_v41 }
 0x557   :  { %7605 = vmatpush3.msra.mxu1 %v5363_v19  ;;  %7606 = vmatprep.mubr.msk.f32.mxu1 %vm7654_vm1, %v7653_v41 }
 0x558   :  { %7609 = vmatprep.subr.mxu0 %v7653_v41 }
 0x55a   :  { %v3883_v22 = vpop.f32.mrf.mxu0  ;;  %v3971_v26 = vpop.f32.mrf.mxu1 }
 0x55b   :  { %v3887_v31 = vadd.f32 %v9999_v61, %v3883_v22  ;;  %v4752_v61 = vld [vmem:[%s10275_s12 + $0x38] sm:$0xff] }
 0x55c   :  { %v7386_v30 = vpop.f32.mrf.mxu0  ;;  %v7421_v24 = vpop.f32.mrf.mxu1 }
 0x55d   :  { %v3975_v33 = vadd.f32 %v3971_v26, %v3887_v31 }
 0x57b   :  { %v4059_v34 = vpop.f32.mrf.mxu0 }
 0x57c   :  { %v4063_v35 = vadd.f32 %v4059_v34, %v3975_v33 }
 0x57d   :  { %v7456_v36 = vpop.f32.mrf.mxu0 }
 0x57e   :  { %v4064_v37 = vmax.f32 %v4063_v35, 0.0 }
 0x580   :  { %4065 = vst.msk [vmem:[#allocation5 + $0xc] sm:$0xf] %vm760_vm2, %v4064_v37 }
 0x587   :  { %v4576_v38 = vld [vmem:[#allocation5 + $0xc] sm:$0x3]  ;;  %v4660_v40 = vld [vmem:[#allocation5 + $0xe] sm:$0x3] }
 0x588   :  { %7588 = vmatmul.mubr.msk.f32.vlgmr.msra.gmra.mxu0 %vm72_vm0, %v4576_v38  ;;  %7607 = vmatmul.mubr.msk.f32.vlgmr.msra.gmra.mxu1 %vm72_vm0, %v4660_v40 }
 0x589   :  { %7625 = vmatprep.mubr.msk.f32.mxu0 %vm7654_vm1, %v7653_v41  ;;  %7610 = vmatpush3.msra.mxu0 %v4752_v61 }
 0x58a   :  { %7611 = vmatprep.subr.mxu0 %v7653_v41 }
 0x58b   :  { %7612 = vmatpush3.msra.mxu0 %v4751_v32 }
 0x58c   :  { %7613 = vmatprep.subr.mxu0 %v7653_v41 }
 0x58d   :  { %7614 = vmatpush3.msra.mxu0 %v4750_v11 }
 0x58e   :  { %7615 = vmatprep.subr.mxu0 %v7653_v41 }
 0x58f   :  { %7616 = vmatpush3.msra.mxu0 %v4749_v14 }
 0x590   :  { %7617 = vmatprep.subr.mxu0 %v7653_v41 }
 0x591   :  { %7618 = vmatpush3.msra.mxu0 %v4748_v10 }
 0x592   :  { %7619 = vmatprep.subr.mxu0 %v7653_v41 }
 0x593   :  { %7620 = vmatpush3.msra.mxu0 %v4747_v18 }
 0x594   :  { %7621 = vmatprep.subr.mxu0 %v7653_v41 }
 0x595   :  { %7622 = vmatpush3.msra.mxu0 %v4746_v25 }
 0x596   :  { %7623 = vmatprep.subr.mxu0 %v7653_v41 }
 0x597   :  { %7624 = vmatpush3.msra.mxu0 %v4745_v28 }
 0x5a2   :  { %v4152_v43 = vpop.f32.mrf.mxu1 }
 0x5a3   :  { %v4156_v44 = vadd.f32 %v5315_v42, %v4152_v43 }
 0x5a4   :  { %v7475_v45 = vpop.f32.mrf.mxu1 }
 0x5b2   :  { %v4235_v2 = vpop.f32.mrf.mxu1 }
 0x5b3   :  { %v4239_v20 = vadd.f32 %v4235_v2, %v4156_v44 }
 0x5b4   :  { %v7494_v21 = vpop.f32.mrf.mxu1 }
 0x5e3   :  { %v4319_v12 = vpop.f32.mrf.mxu0  ;;  %v4403_v46 = vpop.f32.mrf.mxu1 }
 0x5e4   :  { %v4323_v48 = vadd.f32 %v4319_v12, %v4239_v20 }
 0x5e5   :  { %v7513_v50 = vpop.f32.mrf.mxu0  ;;  %v7532_v52 = vpop.f32.mrf.mxu1 }
 0x5e6   :  { %v4407_v8 = vadd.f32 %v4403_v46, %v4323_v48 }
 0x607   :  { %v4487_v29 = vpop.f32.mrf.mxu0  ;;  %v4571_v13 = vpop.f32.mrf.mxu1 }
 0x608   :  { %v4491_v51 = vadd.f32 %v4487_v29, %v4407_v8 }
 0x609   :  { %v7551_v47 = vpop.f32.mrf.mxu0  ;;  %v7570_v49 = vpop.f32.mrf.mxu1 }
 0x60a   :  { %v4575_v53 = vadd.f32 %v4571_v13, %v4491_v51 }
 0x648   :  { %v4655_v54 = vpop.f32.mrf.mxu0  ;;  %v4739_v55 = vpop.f32.mrf.mxu1 }
 0x649   :  { %v4659_v41 = vadd.f32 %v4655_v54, %v4575_v53 }
 0x64a   :  { %v7589_v56 = vpop.f32.mrf.mxu0  ;;  %v7608_v57 = vpop.f32.mrf.mxu1 }
 0x64b   :  { %v4743_v60 = vadd.f32 %v4739_v55, %v4659_v41 }
 0x64d   :  { %v4744_v62 = vmax.f32 %v4743_v60, 0.0 }
 0x64f   :  { %7626 = vmatmul.mubr.msk.f32.vlgmr.msra.gmra.mxu0 %vm72_vm0, %v4744_v62 }
 0x70f   :  { %v4829_v0 = vpop.f32.mrf.mxu0 }
 0x710   :  { %v4830_v1 = vadd.f32 %v5372_v63, %v4829_v0 }
 0x711   :  { %v7627_v3 = vpop.f32.mrf.mxu0 }
 0x712   :  { %4834 = vst.msk [vmem:[#allocation6] sm:$0x3] %vm4833_vm3, %v4830_v1 }
 0x713   :  { %7642 = shalt.err (!%p7639_p4)
}
 0x714   :  { %4844 = dma.vmem_to_hbm [thread:$0]  %s4842_s3, 32, %s10277_s14, [#allocation7]  }
 0x715   :  { %7651 = dma.done.wait [#allocation7], 32  }
 0x716   :  { %7652 = vsyncadd [#allocation7], 4294967264 }
 0x717   :  { %4848 = vsyncpa [#allocation7], 1 }

</bundles_post_ra>
